<compile_context>
chip_gen: v7x
topology: tpu7x:2x2x1
jax: 0.10.0
libtpu: 0.0.40
codegen_flags: <defaults>
</compile_context>

<pallas_src>
import functools

import numpy as np
import jax
import jax.numpy as jnp
from jax import lax
from jax.experimental import pallas as pl
from jax.experimental.pallas import tpu as pltpu

VMEM_LIMIT = 32 * 1024 * 1024  # raises v5e's 16MiB default, matches v6e/v7x defaults


# ---------------------------------------------------------------------------
# Host-side (static) separable linear operators, PyTorch-exact formulas.
# ---------------------------------------------------------------------------
def adaptive_pool_matrix(out_size, in_size):
    m = np.zeros((out_size, in_size), np.float32)
    for i in range(out_size):
        start = (i * in_size) // out_size
        end = -((-(i + 1) * in_size) // out_size)      # ceil((i+1)*in/out)
        m[i, start:end] = 1.0 / (end - start)
    return m


def bilinear_matrix(out_size, in_size):
    # upsample_bilinear2d, align_corners=False, per-axis weights.
    m = np.zeros((out_size, in_size), np.float32)
    scale = in_size / out_size
    for i in range(out_size):
        src = max((i + 0.5) * scale - 0.5, 0.0)
        i0 = min(int(np.floor(src)), in_size - 1)
        i1 = min(i0 + 1, in_size - 1)
        lam = src - i0
        m[i, i0] += 1.0 - lam
        m[i, i1] += lam
    return m


# ---------------------------------------------------------------------------
# Pallas kernels
# ---------------------------------------------------------------------------
def _channel_mix_kernel(x_ref, w_ref, o_ref):
    """Z[n] = Wstack @ F[n]:  ((P+1)*Cmid, Cin) @ (Cin, H*W)  -- one matmul per image."""
    x = x_ref[0].astype(jnp.bfloat16)
    o_ref[0] = jnp.dot(w_ref[...], x,
                       preferred_element_type=jnp.float32).astype(o_ref.dtype)


def _ppm_upsample_kernel(z_ref, l_ref, r_ref, b_ref, o_ref, y_ref):
    """up[n,c] = [L_0|...|L_P] @ vstack_p(Z[n,p,c] @ R_p) + b[c]   (all branches, one step).

    z_ref: (1, P+1, Cmid*H, W) bf16      l_ref: (TH, (P+1)*H) bf16 (L_cat)
    r_ref: (P+1, W, TW) bf16             b_ref: (Cmid,) f32 in SMEM
    o_ref: (Cmid, TH, TW) bf16           y_ref: VMEM (Cmid, (P+1)*H, TW) bf16 scratch
    """
    p1, _, _ = r_ref.shape
    cmid, k_cat, _ = y_ref.shape
    h = k_cat // p1

    # Right spatial op per branch (single (Cmid*H, W)@(W, TW) matmul), scattered into the
    # channel-major scratch so the left op can contract all branches in one K=(P+1)*H pass.
    for p in range(p1):
        yp = jnp.dot(z_ref[0, p], r_ref[p],
                     preferred_element_type=jnp.float32).astype(jnp.bfloat16)
        # TODO(synk): at real scale (Cmid=80) turn this static scatter into a fori_loop
        # (or reorder stage-1 output rows) to keep code size bounded.
        for c in range(cmid):
            y_ref[c, p * h:(p + 1) * h, :] = yp[c * h:(c + 1) * h, :]

    # Left spatial op: one deep-K matmul per channel against the shared L_cat operand.
    lcat = l_ref[...]                                    # (TH, (P+1)*H)

    def chan_body(c, carry):
        o_ref[c] = (jnp.dot(lcat, y_ref[c], preferred_element_type=jnp.float32)
                    + b_ref[c]).astype(o_ref.dtype)
        return carry

    # Short fixed trip count here; at real scale (Cmid=80) use a modest unroll (e.g. 4).
    lax.fori_loop(0, cmid, chan_body, 0, unroll=True)


def _seg_conv3x3_kernel(x_ref, w_ref, m_ref, b_ref, o_ref,
                        xmid_ref, xl_ref, xr_ref, *, tw):
    """3x3/stride1/pad1 conv, one image, flattened NCHW, 9 accumulated tap matmuls.

    x_ref: (1, Cmid, S) bf16   w_ref: (9, nc, Cmid) bf16   m_ref: (2, S) bf16
    b_ref: (nc, 1) f32         o_ref: (1, nc, S) f32
    xmid/xl/xr: VMEM (Cmid, S + 2*pad) bf16 (zero-halo buffers; xl/xr are pre-masked).
    """
    cmid, spad = xmid_ref.shape
    s = x_ref.shape[2]
    pad = (spad - s) // 2

    # Zero only the halo stripes (the data region is fully overwritten below).  Done every
    # step (cheap: 2*pad lanes per buffer) instead of once at program_id==0 so the kernel
    # stays correct when the "parallel" image axis is split across TensorCores (each core
    # owns its own scratch and may never execute step 0).
    zstripe = jnp.zeros((cmid, pad), jnp.bfloat16)
    for buf in (xmid_ref, xl_ref, xr_ref):
        buf[:, :pad] = zstripe
        buf[:, pad + s:spad] = zstripe

    x = x_ref[0]                                         # (Cmid, S) bf16
    xmid_ref[:, pad:pad + s] = x
    # Source-frame pre-masked copies: dx=0 taps must never see source column TW-1
    # (flat-index wrap from the previous row); dx=2 taps must never see source column 0.
    # 2 full-size multiplies total (was 6 per-window masked multiplies).
    xl_ref[:, pad:pad + s] = x * m_ref[0:1, :]
    xr_ref[:, pad:pad + s] = x * m_ref[1:2, :]

    # 9 accumulated tap matmuls; each shifted window feeds the MXU directly (no im2col
    # operand, no concat copies).  On v7x the compiler can accumulate in the MRB.
    srcs = (xl_ref, xmid_ref, xr_ref)                    # indexed by dx
    acc = None
    for dy in range(3):
        for dx in range(3):
            k = dy * 3 + dx
            off = (dy - 1) * tw + (dx - 1)
            win = srcs[dx][:, pad + off:pad + off + s]   # (Cmid, S) shifted window
            part = jnp.dot(w_ref[k], win, preferred_element_type=jnp.float32)
            acc = part if acc is None else acc + part
    o_ref[0] = acc + b_ref[...]                          # (nc, S) lane-dense f32 store


# ---------------------------------------------------------------------------
# Parameters (deterministic synthetic, PyTorch layouts then rearranged).
# ---------------------------------------------------------------------------
def init_params(key, in_channels, mid_channels, num_classes, num_pools):
    k1, k2, k3, k4 = jax.random.split(key, 4)
    p1 = num_pools + 1
    k_cat = in_channels * p1
    w_ppm = 0.05 * jax.random.normal(k1, (mid_channels, k_cat, 1, 1), jnp.float32)  # OIHW
    b_ppm = 0.05 * jax.random.normal(k2, (mid_channels,), jnp.float32)
    w_seg = 0.05 * jax.random.normal(k3, (num_classes, mid_channels, 3, 3), jnp.float32)
    b_seg = 0.05 * jax.random.normal(k4, (num_classes,), jnp.float32)

    # 1x1 PPM conv weight split into per-branch (Cmid, Cin) blocks, stacked branch-major
    # (stage-1 output row = p*Cmid + c).
    w2 = w_ppm[:, :, 0, 0].reshape(mid_channels, p1, in_channels)
    w_stack = jnp.transpose(w2, (1, 0, 2)).reshape(p1 * mid_channels, in_channels)
    # 3x3 conv weight as 9 per-tap (nc, Cmid) blocks, tap index k = dy*3 + dx.
    w9 = jnp.transpose(w_seg, (2, 3, 0, 1)).reshape(9, num_classes, mid_channels)
    return {
        "w_ppm": w_stack.astype(jnp.bfloat16),           # ((P+1)*Cmid, Cin) bf16
        "b_ppm": b_ppm,                                  # (Cmid,) f32  (SMEM scalar table)
        "w_seg": w9.astype(jnp.bfloat16),                # (9, nc, Cmid) bf16
        "b_seg": b_seg.reshape(num_classes, 1),          # (nc, 1) f32
    }


# ---------------------------------------------------------------------------
# Forward pass == YoloSemPPM.forward
# ---------------------------------------------------------------------------
@functools.partial(jax.jit, static_argnames=("pool_sizes", "target_size"))
def yolo_sem_ppm_forward(f, params, pool_sizes=(1, 2, 3, 6), target_size=(48, 48)):
    n, cin, h, w = f.shape
    p1 = len(pool_sizes) + 1
    cmid = params["b_ppm"].shape[0]
    nc = params["b_seg"].shape[0]
    th, tw = target_size
    s = th * tw

    # Fused separable operators: branch 0 = identity branch (just the final bilinear),
    # branch p = adaptive-pool -> bilinear(H,W) -> bilinear(TH,TW), composed exactly.
    vy = bilinear_matrix(th, h)                               # (TH, H)
    vxt = bilinear_matrix(tw, w).T                            # (W, TW)
    l_list, r_list = [vy], [vxt]
    for ps in pool_sizes:
        a_p = bilinear_matrix(h, ps) @ adaptive_pool_matrix(ps, h)   # (H, H)
        b_p = bilinear_matrix(w, ps) @ adaptive_pool_matrix(ps, w)   # (W, W)
        l_list.append(vy @ a_p)
        r_list.append(b_p.T @ vxt)
    l_cat = jnp.asarray(np.concatenate(l_list, axis=1), dtype=jnp.bfloat16)  # (TH, (P+1)*H)
    r_stack = jnp.asarray(np.stack(r_list), dtype=jnp.bfloat16)              # (P+1, W, TW)

    # Source-frame column-edge keep-masks for the 3x3 taps:
    # row 0 -> applied to the dx=0 (left) taps  : drop source column TW-1
    # row 1 -> applied to the dx=2 (right) taps : drop source column 0
    xcol = np.arange(s, dtype=np.int64) % tw
    edge_mask = jnp.asarray(
        np.stack([(xcol != tw - 1), (xcol != 0)]).astype(np.float32),
        dtype=jnp.bfloat16)                                               # (2, S)

    # ---- Stage 1: per-branch channel mix (fused cat + 1x1 conv weights) ----
    f2 = f.reshape(n, cin, h * w)
    z = pl.pallas_call(
        _channel_mix_kernel,
        out_shape=jax.ShapeDtypeStruct((n, p1 * cmid, h * w), jnp.bfloat16),
        grid=(n,),
        in_specs=[pl.BlockSpec((1, cin, h * w), lambda i: (i, 0, 0)),
                  pl.BlockSpec((p1 * cmid, cin), lambda i: (0, 0))],
        out_specs=pl.BlockSpec((1, p1 * cmid, h * w), lambda i: (i, 0, 0)),
        compiler_params=pltpu.CompilerParams(
            dimension_semantics=("parallel",), vmem_limit_bytes=VMEM_LIMIT),
    )(f2, params["w_ppm"])

    # Free relayout through HBM: (n, p1*cmid, h*w) -> (n, p1, cmid*h, w)  (same bytes).
    z4 = z.reshape(n, p1, cmid * h, w)

    # ---- Stage 2: all-branch spatial transforms + accumulate + bias, one step/image ----
    up = pl.pallas_call(
        _ppm_upsample_kernel,
        out_shape=jax.ShapeDtypeStruct((n, cmid, th, tw), jnp.bfloat16),
        grid=(n,),
        in_specs=[pl.BlockSpec((1, p1, cmid * h, w), lambda i: (i, 0, 0, 0)),
                  pl.BlockSpec((th, p1 * h), lambda i: (0, 0)),
                  pl.BlockSpec((p1, w, tw), lambda i: (0, 0, 0)),
                  pl.BlockSpec(memory_space=pltpu.MemorySpace.SMEM)],
        out_specs=pl.BlockSpec((None, cmid, th, tw), lambda i: (i, 0, 0, 0)),
        scratch_shapes=[pltpu.VMEM((cmid, p1 * h, tw), jnp.bfloat16)],
        compiler_params=pltpu.CompilerParams(
            dimension_semantics=("parallel",), vmem_limit_bytes=VMEM_LIMIT),
    )(z4, l_cat, r_stack, params["b_ppm"])

    # ---- Stage 3: 3x3 segment conv, flattened NCHW, 9 accumulated tap matmuls ----
    upf = up.reshape(n, cmid, s)                               # free reshape
    pad = ((tw + 1 + 127) // 128) * 128                        # halo >= tw+1, lane-aligned
    seg = pl.pallas_call(
        functools.partial(_seg_conv3x3_kernel, tw=tw),
        out_shape=jax.ShapeDtypeStruct((n, nc, s), jnp.float32),
        grid=(n,),
        in_specs=[pl.BlockSpec((1, cmid, s), lambda i: (i, 0, 0)),
                  pl.BlockSpec((9, nc, cmid), lambda i: (0, 0, 0)),
                  pl.BlockSpec((2, s), lambda i: (0, 0)),
                  pl.BlockSpec((nc, 1), lambda i: (0, 0))],
        out_specs=pl.BlockSpec((1, nc, s), lambda i: (i, 0, 0)),
        scratch_shapes=[pltpu.VMEM((cmid, s + 2 * pad), jnp.bfloat16),
                        pltpu.VMEM((cmid, s + 2 * pad), jnp.bfloat16),
                        pltpu.VMEM((cmid, s + 2 * pad), jnp.bfloat16)],
        compiler_params=pltpu.CompilerParams(
            dimension_semantics=("parallel",), vmem_limit_bytes=VMEM_LIMIT),
    )(upf, params["w_seg"], edge_mask, params["b_seg"])

    return seg.reshape(n, nc, th, tw)                          # free reshape, NCHW output


# ---------------------------------------------------------------------------
# Pure-JAX reference (same math, f32) for self-verification at toy scale.
# ---------------------------------------------------------------------------
def reference_forward(f, params, pool_sizes, target_size):
    n, cin, h, w = f.shape
    p1 = len(pool_sizes) + 1
    th, tw = target_size
    cmid = params["b_ppm"].shape[0]
    nc = params["b_seg"].shape[0]
    hi = lax.Precision.HIGHEST

    vy = bilinear_matrix(th, h)
    vxt = bilinear_matrix(tw, w).T
    l_list, r_list = [vy], [vxt]
    for ps in pool_sizes:
        a_p = bilinear_matrix(h, ps) @ adaptive_pool_matrix(ps, h)
        b_p = bilinear_matrix(w, ps) @ adaptive_pool_matrix(ps, w)
        l_list.append(vy @ a_p)
        r_list.append(b_p.T @ vxt)

    w_stack = params["w_ppm"].astype(jnp.float32)              # ((P+1)*Cmid, Cin)
    z = jnp.einsum("oc,nchw->nohw", w_stack, f.astype(jnp.float32), precision=hi)
    z = z.reshape(n, p1, cmid, h, w)
    up = jnp.zeros((n, cmid, th, tw), jnp.float32)
    for p in range(p1):
        t = jnp.einsum("ah,nchw->ncaw", jnp.asarray(l_list[p]), z[:, p], precision=hi)
        up = up + jnp.einsum("ncaw,wb->ncab", t, jnp.asarray(r_list[p]), precision=hi)
    up = up + params["b_ppm"].astype(jnp.float32)[None, :, None, None]

    w9 = params["w_seg"].astype(jnp.float32)                   # (9, nc, Cmid)
    w_oihw = jnp.transpose(w9.reshape(3, 3, nc, cmid), (2, 3, 0, 1))
    out = lax.conv_general_dilated(up, w_oihw, (1, 1), ((1, 1), (1, 1)),
                                   dimension_numbers=("NCHW", "OIHW", "NCHW"),
                                   precision=hi)
    return out + params["b_seg"].astype(jnp.float32).reshape(1, nc, 1, 1)


if __name__ == "__main__":
    # Small-scale analog of YoloSemPPM(numClasses): real module uses in_channels=320,
    # out_channels=80, pool_sizes=[1,2,3,6], final upsample to (640, 640).
    N, CIN, H, W = 2, 16, 12, 12
    CMID, NUM_CLASSES = 8, 4
    TARGET = (48, 48)
    POOLS = (1, 2, 3, 6)

    key = jax.random.PRNGKey(0)
    k_in, k_par = jax.random.split(key)
    f = jax.random.normal(k_in, (N, CIN, H, W), jnp.float32)
    params = init_params(k_par, CIN, CMID, NUM_CLASSES, len(POOLS))

    out = yolo_sem_ppm_forward(f, params, pool_sizes=POOLS, target_size=TARGET)
    out = jax.block_until_ready(out)
    assert out.shape == (N, NUM_CLASSES) + TARGET
    assert bool(jnp.all(jnp.isfinite(out)))

    ref = reference_forward(f, params, POOLS, TARGET)
    err = float(jnp.max(jnp.abs(out - ref)))
    assert err < 3e-2, f"max abs err vs reference too large: {err}"
    print("KERNEL_OK")
</pallas_src>

<mosaic_0001>
module attributes {stable_mosaic.version = 11 : i64} {
  func.func @_channel_mix_kernel(%arg0: i32, %arg1: memref<1x16x144xf32, #tpu.memory_space<vmem>>, %arg2: memref<40x16xbf16, #tpu.memory_space<vmem>>, %arg3: memref<1x40x144xbf16, #tpu.memory_space<vmem>>) attributes {dimension_semantics = [#tpu.dimension_semantics<parallel>], iteration_bounds = array<i64: 2>, scalar_prefetch = 0 : i64, scratch_operands = 0 : i64, tpu.core_type = #tpu.core_type<tc>, window_params = [{transform_indices = @transform_0, window_bounds = array<i64: 1, 16, 144>}, {pipeline_mode = #tpu.pipeline_mode<synchronous>, transform_indices = @transform_1, window_bounds = array<i64: 40, 16>}, {transform_indices = @transform_2, window_bounds = array<i64: 1, 40, 144>}]} {
    %c0 = arith.constant 0 : index
    %c0_0 = arith.constant 0 : index
    %c0_1 = arith.constant 0 : index
    %0 = vector.load %arg1[%c0, %c0_0, %c0_1] : memref<1x16x144xf32, #tpu.memory_space<vmem>>, vector<1x16x144xf32>
    %1 = vector.shape_cast %0 : vector<1x16x144xf32> to vector<16x144xf32>
    %2 = arith.truncf %1 : vector<16x144xf32> to vector<16x144xbf16>
    %c0_2 = arith.constant 0 : index
    %c0_3 = arith.constant 0 : index
    %3 = vector.load %arg2[%c0_2, %c0_3] : memref<40x16xbf16, #tpu.memory_space<vmem>>, vector<40x16xbf16>
    %cst = arith.constant dense<0.000000e+00> : vector<40x144xf32>
    %4 = tpu.matmul %3, %2, %cst {dimension_numbers = #tpu.dot_dimension_numbers<[1], [0], [0], [1], [0, 0, 1, 1], [], []>} : vector<40x16xbf16>, vector<16x144xbf16>, vector<40x144xf32> -> vector<40x144xf32>
    %5 = arith.truncf %4 : vector<40x144xf32> to vector<40x144xbf16>
    %c0_4 = arith.constant 0 : index
    %c0_5 = arith.constant 0 : index
    %c0_6 = arith.constant 0 : index
    %6 = vector.load %arg3[%c0_4, %c0_5, %c0_6] : memref<1x40x144xbf16, #tpu.memory_space<vmem>>, vector<1x40x144xbf16>
    %7 = vector.shape_cast %6 : vector<1x40x144xbf16> to vector<40x144xbf16>
    %8 = vector.shape_cast %5 : vector<40x144xbf16> to vector<1x40x144xbf16>
    tpu.vector_store %arg3[%c0_4, %c0_5, %c0_6], %8 {strides = array<i32>} : memref<1x40x144xbf16, #tpu.memory_space<vmem>>, vector<1x40x144xbf16>,
    return
  }
  func.func @transform_0(%arg0: i32) -> (i32, i32, i32) {
    %c0_i32 = arith.constant 0 : i32
    %c0_i32_0 = arith.constant 0 : i32
    %c0_i32_1 = arith.constant 0 : i32
    return %arg0, %c0_i32, %c0_i32_0 : i32, i32, i32
  }
  func.func @transform_1(%arg0: i32) -> (i32, i32) {
    %c0_i32 = arith.constant 0 : i32
    %c0_i32_0 = arith.constant 0 : i32
    %c0_i32_1 = arith.constant 0 : i32
    return %c0_i32, %c0_i32_0 : i32, i32
  }
  func.func @transform_2(%arg0: i32) -> (i32, i32, i32) {
    %c0_i32 = arith.constant 0 : i32
    %c0_i32_0 = arith.constant 0 : i32
    %c0_i32_1 = arith.constant 0 : i32
    return %arg0, %c0_i32, %c0_i32_0 : i32, i32, i32
  }
}

module attributes {stable_mosaic.version = 11 : i64} {
  func.func @_ppm_upsample_kernel(%arg0: i32, %arg1: memref<1x5x96x12xbf16, #tpu.memory_space<vmem>>, %arg2: memref<48x60xbf16, #tpu.memory_space<vmem>>, %arg3: memref<5x12x48xbf16, #tpu.memory_space<vmem>>, %arg4: memref<8xf32, #tpu.memory_space<smem>>, %arg5: memref<1x8x48x48xbf16, #tpu.memory_space<vmem>>, %arg6: memref<8x60x48xbf16, #tpu.memory_space<vmem>>) attributes {dimension_semantics = [#tpu.dimension_semantics<parallel>], iteration_bounds = array<i64: 2>, scalar_prefetch = 0 : i64, scratch_operands = 1 : i64, tpu.core_type = #tpu.core_type<tc>, window_params = [{transform_indices = @transform_0, window_bounds = array<i64: 1, 5, 96, 12>}, {pipeline_mode = #tpu.pipeline_mode<synchronous>, transform_indices = @transform_1, window_bounds = array<i64: 48, 60>}, {pipeline_mode = #tpu.pipeline_mode<synchronous>, transform_indices = @transform_2, window_bounds = array<i64: 5, 12, 48>}, {transform_indices = @transform_3, window_bounds = array<i64: 8>}, {transform_indices = @transform_4, window_bounds = array<i64: 1, 8, 48, 48>}]} {
    %c0 = arith.constant 0 : index
    %c0_0 = arith.constant 0 : index
    %c0_1 = arith.constant 0 : index
    %c0_2 = arith.constant 0 : index
    %0 = vector.load %arg1[%c0, %c0_0, %c0_1, %c0_2] : memref<1x5x96x12xbf16, #tpu.memory_space<vmem>>, vector<1x1x96x12xbf16>
    %1 = vector.shape_cast %0 : vector<1x1x96x12xbf16> to vector<96x12xbf16>
    %c0_3 = arith.constant 0 : index
    %c0_4 = arith.constant 0 : index
    %c0_5 = arith.constant 0 : index
    %2 = vector.load %arg3[%c0_3, %c0_4, %c0_5] : memref<5x12x48xbf16, #tpu.memory_space<vmem>>, vector<1x12x48xbf16>
    %3 = vector.shape_cast %2 : vector<1x12x48xbf16> to vector<12x48xbf16>
    %cst = arith.constant dense<0.000000e+00> : vector<96x48xf32>
    %4 = tpu.matmul %1, %3, %cst {dimension_numbers = #tpu.dot_dimension_numbers<[1], [0], [0], [1], [0, 0, 1, 1], [], []>} : vector<96x12xbf16>, vector<12x48xbf16>, vector<96x48xf32> -> vector<96x48xf32>
    %5 = arith.truncf %4 : vector<96x48xf32> to vector<96x48xbf16>
    %6 = vector.extract_strided_slice %5 {offsets = [0, 0], sizes = [12, 48], strides = [1, 1]} : vector<96x48xbf16> to vector<12x48xbf16>
    %c0_6 = arith.constant 0 : index
    %c0_7 = arith.constant 0 : index
    %c0_8 = arith.constant 0 : index
    %7 = vector.load %arg6[%c0_6, %c0_7, %c0_8] : memref<8x60x48xbf16, #tpu.memory_space<vmem>>, vector<1x12x48xbf16>
    %8 = vector.shape_cast %7 : vector<1x12x48xbf16> to vector<12x48xbf16>
    %9 = vector.shape_cast %6 : vector<12x48xbf16> to vector<1x12x48xbf16>
    tpu.vector_store %arg6[%c0_6, %c0_7, %c0_8], %9 {strides = array<i32>} : memref<8x60x48xbf16, #tpu.memory_space<vmem>>, vector<1x12x48xbf16>,
    %10 = vector.extract_strided_slice %5 {offsets = [12, 0], sizes = [12, 48], strides = [1, 1]} : vector<96x48xbf16> to vector<12x48xbf16>
    %c1 = arith.constant 1 : index
    %c0_9 = arith.constant 0 : index
    %c0_10 = arith.constant 0 : index
    %11 = vector.load %arg6[%c1, %c0_9, %c0_10] : memref<8x60x48xbf16, #tpu.memory_space<vmem>>, vector<1x12x48xbf16>
    %12 = vector.shape_cast %11 : vector<1x12x48xbf16> to vector<12x48xbf16>
    %13 = vector.shape_cast %10 : vector<12x48xbf16> to vector<1x12x48xbf16>
    tpu.vector_store %arg6[%c1, %c0_9, %c0_10], %13 {strides = array<i32>} : memref<8x60x48xbf16, #tpu.memory_space<vmem>>, vector<1x12x48xbf16>,
    %14 = vector.extract_strided_slice %5 {offsets = [24, 0], sizes = [12, 48], strides = [1, 1]} : vector<96x48xbf16> to vector<12x48xbf16>
    %c2 = arith.constant 2 : index
    %c0_11 = arith.constant 0 : index
    %c0_12 = arith.constant 0 : index
    %15 = vector.load %arg6[%c2, %c0_11, %c0_12] : memref<8x60x48xbf16, #tpu.memory_space<vmem>>, vector<1x12x48xbf16>
    %16 = vector.shape_cast %15 : vector<1x12x48xbf16> to vector<12x48xbf16>
    %17 = vector.shape_cast %14 : vector<12x48xbf16> to vector<1x12x48xbf16>
    tpu.vector_store %arg6[%c2, %c0_11, %c0_12], %17 {strides = array<i32>} : memref<8x60x48xbf16, #tpu.memory_space<vmem>>, vector<1x12x48xbf16>,
    %18 = vector.extract_strided_slice %5 {offsets = [36, 0], sizes = [12, 48], strides = [1, 1]} : vector<96x48xbf16> to vector<12x48xbf16>
    %c3 = arith.constant 3 : index
    %c0_13 = arith.constant 0 : index
    %c0_14 = arith.constant 0 : index
    %19 = vector.load %arg6[%c3, %c0_13, %c0_14] : memref<8x60x48xbf16, #tpu.memory_space<vmem>>, vector<1x12x48xbf16>
    %20 = vector.shape_cast %19 : vector<1x12x48xbf16> to vector<12x48xbf16>
    %21 = vector.shape_cast %18 : vector<12x48xbf16> to vector<1x12x48xbf16>
    tpu.vector_store %arg6[%c3, %c0_13, %c0_14], %21 {strides = array<i32>} : memref<8x60x48xbf16, #tpu.memory_space<vmem>>, vector<1x12x48xbf16>,
    %22 = vector.extract_strided_slice %5 {offsets = [48, 0], sizes = [12, 48], strides = [1, 1]} : vector<96x48xbf16> to vector<12x48xbf16>
    %c4 = arith.constant 4 : index
    %c0_15 = arith.constant 0 : index
    %c0_16 = arith.constant 0 : index
    %23 = vector.load %arg6[%c4, %c0_15, %c0_16] : memref<8x60x48xbf16, #tpu.memory_space<vmem>>, vector<1x12x48xbf16>
    %24 = vector.shape_cast %23 : vector<1x12x48xbf16> to vector<12x48xbf16>
    %25 = vector.shape_cast %22 : vector<12x48xbf16> to vector<1x12x48xbf16>
    tpu.vector_store %arg6[%c4, %c0_15, %c0_16], %25 {strides = array<i32>} : memref<8x60x48xbf16, #tpu.memory_space<vmem>>, vector<1x12x48xbf16>,
    %26 = vector.extract_strided_slice %5 {offsets = [60, 0], sizes = [12, 48], strides = [1, 1]} : vector<96x48xbf16> to vector<12x48xbf16>
    %c5 = arith.constant 5 : index
    %c0_17 = arith.constant 0 : index
    %c0_18 = arith.constant 0 : index
    %27 = vector.load %arg6[%c5, %c0_17, %c0_18] : memref<8x60x48xbf16, #tpu.memory_space<vmem>>, vector<1x12x48xbf16>
    %28 = vector.shape_cast %27 : vector<1x12x48xbf16> to vector<12x48xbf16>
    %29 = vector.shape_cast %26 : vector<12x48xbf16> to vector<1x12x48xbf16>
    tpu.vector_store %arg6[%c5, %c0_17, %c0_18], %29 {strides = array<i32>} : memref<8x60x48xbf16, #tpu.memory_space<vmem>>, vector<1x12x48xbf16>,
    %30 = vector.extract_strided_slice %5 {offsets = [72, 0], sizes = [12, 48], strides = [1, 1]} : vector<96x48xbf16> to vector<12x48xbf16>
    %c6 = arith.constant 6 : index
    %c0_19 = arith.constant 0 : index
    %c0_20 = arith.constant 0 : index
    %31 = vector.load %arg6[%c6, %c0_19, %c0_20] : memref<8x60x48xbf16, #tpu.memory_space<vmem>>, vector<1x12x48xbf16>
    %32 = vector.shape_cast %31 : vector<1x12x48xbf16> to vector<12x48xbf16>
    %33 = vector.shape_cast %30 : vector<12x48xbf16> to vector<1x12x48xbf16>
    tpu.vector_store %arg6[%c6, %c0_19, %c0_20], %33 {strides = array<i32>} : memref<8x60x48xbf16, #tpu.memory_space<vmem>>, vector<1x12x48xbf16>,
    %34 = vector.extract_strided_slice %5 {offsets = [84, 0], sizes = [12, 48], strides = [1, 1]} : vector<96x48xbf16> to vector<12x48xbf16>
    %c7 = arith.constant 7 : index
    %c0_21 = arith.constant 0 : index
    %c0_22 = arith.constant 0 : index
    %35 = vector.load %arg6[%c7, %c0_21, %c0_22] : memref<8x60x48xbf16, #tpu.memory_space<vmem>>, vector<1x12x48xbf16>
    %36 = vector.shape_cast %35 : vector<1x12x48xbf16> to vector<12x48xbf16>
    %37 = vector.shape_cast %34 : vector<12x48xbf16> to vector<1x12x48xbf16>
    tpu.vector_store %arg6[%c7, %c0_21, %c0_22], %37 {strides = array<i32>} : memref<8x60x48xbf16, #tpu.memory_space<vmem>>, vector<1x12x48xbf16>,
    %c0_23 = arith.constant 0 : index
    %c1_24 = arith.constant 1 : index
    %c0_25 = arith.constant 0 : index
    %c0_26 = arith.constant 0 : index
    %38 = vector.load %arg1[%c0_23, %c1_24, %c0_25, %c0_26] : memref<1x5x96x12xbf16, #tpu.memory_space<vmem>>, vector<1x1x96x12xbf16>
    %39 = vector.shape_cast %38 : vector<1x1x96x12xbf16> to vector<96x12xbf16>
    %c1_27 = arith.constant 1 : index
    %c0_28 = arith.constant 0 : index
    %c0_29 = arith.constant 0 : index
    %40 = vector.load %arg3[%c1_27, %c0_28, %c0_29] : memref<5x12x48xbf16, #tpu.memory_space<vmem>>, vector<1x12x48xbf16>
    %41 = vector.shape_cast %40 : vector<1x12x48xbf16> to vector<12x48xbf16>
    %cst_30 = arith.constant dense<0.000000e+00> : vector<96x48xf32>
    %42 = tpu.matmul %39, %41, %cst_30 {dimension_numbers = #tpu.dot_dimension_numbers<[1], [0], [0], [1], [0, 0, 1, 1], [], []>} : vector<96x12xbf16>, vector<12x48xbf16>, vector<96x48xf32> -> vector<96x48xf32>
    %43 = arith.truncf %42 : vector<96x48xf32> to vector<96x48xbf16>
    %44 = vector.extract_strided_slice %43 {offsets = [0, 0], sizes = [12, 48], strides = [1, 1]} : vector<96x48xbf16> to vector<12x48xbf16>
    %c0_31 = arith.constant 0 : index
    %c12 = arith.constant 12 : index
    %c0_32 = arith.constant 0 : index
    %45 = vector.load %arg6[%c0_31, %c12, %c0_32] : memref<8x60x48xbf16, #tpu.memory_space<vmem>>, vector<1x12x48xbf16>
    %46 = vector.shape_cast %45 : vector<1x12x48xbf16> to vector<12x48xbf16>
    %47 = vector.shape_cast %44 : vector<12x48xbf16> to vector<1x12x48xbf16>
    tpu.vector_store %arg6[%c0_31, %c12, %c0_32], %47 {strides = array<i32>} : memref<8x60x48xbf16, #tpu.memory_space<vmem>>, vector<1x12x48xbf16>,
    %48 = vector.extract_strided_slice %43 {offsets = [12, 0], sizes = [12, 48], strides = [1, 1]} : vector<96x48xbf16> to vector<12x48xbf16>
    %c1_33 = arith.constant 1 : index
    %c12_34 = arith.constant 12 : index
    %c0_35 = arith.constant 0 : index
    %49 = vector.load %arg6[%c1_33, %c12_34, %c0_35] : memref<8x60x48xbf16, #tpu.memory_space<vmem>>, vector<1x12x48xbf16>
    %50 = vector.shape_cast %49 : vector<1x12x48xbf16> to vector<12x48xbf16>
    %51 = vector.shape_cast %48 : vector<12x48xbf16> to vector<1x12x48xbf16>
    tpu.vector_store %arg6[%c1_33, %c12_34, %c0_35], %51 {strides = array<i32>} : memref<8x60x48xbf16, #tpu.memory_space<vmem>>, vector<1x12x48xbf16>,
    %52 = vector.extract_strided_slice %43 {offsets = [24, 0], sizes = [12, 48], strides = [1, 1]} : vector<96x48xbf16> to vector<12x48xbf16>
    %c2_36 = arith.constant 2 : index
    %c12_37 = arith.constant 12 : index
    %c0_38 = arith.constant 0 : index
    %53 = vector.load %arg6[%c2_36, %c12_37, %c0_38] : memref<8x60x48xbf16, #tpu.memory_space<vmem>>, vector<1x12x48xbf16>
    %54 = vector.shape_cast %53 : vector<1x12x48xbf16> to vector<12x48xbf16>
    %55 = vector.shape_cast %52 : vector<12x48xbf16> to vector<1x12x48xbf16>
    tpu.vector_store %arg6[%c2_36, %c12_37, %c0_38], %55 {strides = array<i32>} : memref<8x60x48xbf16, #tpu.memory_space<vmem>>, vector<1x12x48xbf16>,
    %56 = vector.extract_strided_slice %43 {offsets = [36, 0], sizes = [12, 48], strides = [1, 1]} : vector<96x48xbf16> to vector<12x48xbf16>
    %c3_39 = arith.constant 3 : index
    %c12_40 = arith.constant 12 : index
    %c0_41 = arith.constant 0 : index
    %57 = vector.load %arg6[%c3_39, %c12_40, %c0_41] : memref<8x60x48xbf16, #tpu.memory_space<vmem>>, vector<1x12x48xbf16>
    %58 = vector.shape_cast %57 : vector<1x12x48xbf16> to vector<12x48xbf16>
    %59 = vector.shape_cast %56 : vector<12x48xbf16> to vector<1x12x48xbf16>
    tpu.vector_store %arg6[%c3_39, %c12_40, %c0_41], %59 {strides = array<i32>} : memref<8x60x48xbf16, #tpu.memory_space<vmem>>, vector<1x12x48xbf16>,
    %60 = vector.extract_strided_slice %43 {offsets = [48, 0], sizes = [12, 48], strides = [1, 1]} : vector<96x48xbf16> to vector<12x48xbf16>
    %c4_42 = arith.constant 4 : index
    %c12_43 = arith.constant 12 : index
    %c0_44 = arith.constant 0 : index
    %61 = vector.load %arg6[%c4_42, %c12_43, %c0_44] : memref<8x60x48xbf16, #tpu.memory_space<vmem>>, vector<1x12x48xbf16>
    %62 = vector.shape_cast %61 : vector<1x12x48xbf16> to vector<12x48xbf16>
    %63 = vector.shape_cast %60 : vector<12x48xbf16> to vector<1x12x48xbf16>
    tpu.vector_store %arg6[%c4_42, %c12_43, %c0_44], %63 {strides = array<i32>} : memref<8x60x48xbf16, #tpu.memory_space<vmem>>, vector<1x12x48xbf16>,
    %64 = vector.extract_strided_slice %43 {offsets = [60, 0], sizes = [12, 48], strides = [1, 1]} : vector<96x48xbf16> to vector<12x48xbf16>
    %c5_45 = arith.constant 5 : index
    %c12_46 = arith.constant 12 : index
    %c0_47 = arith.constant 0 : index
    %65 = vector.load %arg6[%c5_45, %c12_46, %c0_47] : memref<8x60x48xbf16, #tpu.memory_space<vmem>>, vector<1x12x48xbf16>
    %66 = vector.shape_cast %65 : vector<1x12x48xbf16> to vector<12x48xbf16>
    %67 = vector.shape_cast %64 : vector<12x48xbf16> to vector<1x12x48xbf16>
    tpu.vector_store %arg6[%c5_45, %c12_46, %c0_47], %67 {strides = array<i32>} : memref<8x60x48xbf16, #tpu.memory_space<vmem>>, vector<1x12x48xbf16>,
    %68 = vector.extract_strided_slice %43 {offsets = [72, 0], sizes = [12, 48], strides = [1, 1]} : vector<96x48xbf16> to vector<12x48xbf16>
    %c6_48 = arith.constant 6 : index
    %c12_49 = arith.constant 12 : index
    %c0_50 = arith.constant 0 : index
    %69 = vector.load %arg6[%c6_48, %c12_49, %c0_50] : memref<8x60x48xbf16, #tpu.memory_space<vmem>>, vector<1x12x48xbf16>
    %70 = vector.shape_cast %69 : vector<1x12x48xbf16> to vector<12x48xbf16>
    %71 = vector.shape_cast %68 : vector<12x48xbf16> to vector<1x12x48xbf16>
    tpu.vector_store %arg6[%c6_48, %c12_49, %c0_50], %71 {strides = array<i32>} : memref<8x60x48xbf16, #tpu.memory_space<vmem>>, vector<1x12x48xbf16>,
    %72 = vector.extract_strided_slice %43 {offsets = [84, 0], sizes = [12, 48], strides = [1, 1]} : vector<96x48xbf16> to vector<12x48xbf16>
    %c7_51 = arith.constant 7 : index
    %c12_52 = arith.constant 12 : index
    %c0_53 = arith.constant 0 : index
    %73 = vector.load %arg6[%c7_51, %c12_52, %c0_53] : memref<8x60x48xbf16, #tpu.memory_space<vmem>>, vector<1x12x48xbf16>
    %74 = vector.shape_cast %73 : vector<1x12x48xbf16> to vector<12x48xbf16>
    %75 = vector.shape_cast %72 : vector<12x48xbf16> to vector<1x12x48xbf16>
    tpu.vector_store %arg6[%c7_51, %c12_52, %c0_53], %75 {strides = array<i32>} : memref<8x60x48xbf16, #tpu.memory_space<vmem>>, vector<1x12x48xbf16>,
    %c0_54 = arith.constant 0 : index
    %c2_55 = arith.constant 2 : index
    %c0_56 = arith.constant 0 : index
    %c0_57 = arith.constant 0 : index
    %76 = vector.load %arg1[%c0_54, %c2_55, %c0_56, %c0_57] : memref<1x5x96x12xbf16, #tpu.memory_space<vmem>>, vector<1x1x96x12xbf16>
    %77 = vector.shape_cast %76 : vector<1x1x96x12xbf16> to vector<96x12xbf16>
    %c2_58 = arith.constant 2 : index
    %c0_59 = arith.constant 0 : index
    %c0_60 = arith.constant 0 : index
    %78 = vector.load %arg3[%c2_58, %c0_59, %c0_60] : memref<5x12x48xbf16, #tpu.memory_space<vmem>>, vector<1x12x48xbf16>
    %79 = vector.shape_cast %78 : vector<1x12x48xbf16> to vector<12x48xbf16>
    %cst_61 = arith.constant dense<0.000000e+00> : vector<96x48xf32>
    %80 = tpu.matmul %77, %79, %cst_61 {dimension_numbers = #tpu.dot_dimension_numbers<[1], [0], [0], [1], [0, 0, 1, 1], [], []>} : vector<96x12xbf16>, vector<12x48xbf16>, vector<96x48xf32> -> vector<96x48xf32>
    %81 = arith.truncf %80 : vector<96x48xf32> to vector<96x48xbf16>
    %82 = vector.extract_strided_slice %81 {offsets = [0, 0], sizes = [12, 48], strides = [1, 1]} : vector<96x48xbf16> to vector<12x48xbf16>
    %c0_62 = arith.constant 0 : index
    %c24 = arith.constant 24 : index
    %c0_63 = arith.constant 0 : index
    %83 = vector.load %arg6[%c0_62, %c24, %c0_63] : memref<8x60x48xbf16, #tpu.memory_space<vmem>>, vector<1x12x48xbf16>
    %84 = vector.shape_cast %83 : vector<1x12x48xbf16> to vector<12x48xbf16>
    %85 = vector.shape_cast %82 : vector<12x48xbf16> to vector<1x12x48xbf16>
    tpu.vector_store %arg6[%c0_62, %c24, %c0_63], %85 {strides = array<i32>} : memref<8x60x48xbf16, #tpu.memory_space<vmem>>, vector<1x12x48xbf16>,
    %86 = vector.extract_strided_slice %81 {offsets = [12, 0], sizes = [12, 48], strides = [1, 1]} : vector<96x48xbf16> to vector<12x48xbf16>
    %c1_64 = arith.constant 1 : index
    %c24_65 = arith.constant 24 : index
    %c0_66 = arith.constant 0 : index
    %87 = vector.load %arg6[%c1_64, %c24_65, %c0_66] : memref<8x60x48xbf16, #tpu.memory_space<vmem>>, vector<1x12x48xbf16>
    %88 = vector.shape_cast %87 : vector<1x12x48xbf16> to vector<12x48xbf16>
    %89 = vector.shape_cast %86 : vector<12x48xbf16> to vector<1x12x48xbf16>
    tpu.vector_store %arg6[%c1_64, %c24_65, %c0_66], %89 {strides = array<i32>} : memref<8x60x48xbf16, #tpu.memory_space<vmem>>, vector<1x12x48xbf16>,
    %90 = vector.extract_strided_slice %81 {offsets = [24, 0], sizes = [12, 48], strides = [1, 1]} : vector<96x48xbf16> to vector<12x48xbf16>
    %c2_67 = arith.constant 2 : index
    %c24_68 = arith.constant 24 : index
    %c0_69 = arith.constant 0 : index
    %91 = vector.load %arg6[%c2_67, %c24_68, %c0_69] : memref<8x60x48xbf16, #tpu.memory_space<vmem>>, vector<1x12x48xbf16>
    %92 = vector.shape_cast %91 : vector<1x12x48xbf16> to vector<12x48xbf16>
    %93 = vector.shape_cast %90 : vector<12x48xbf16> to vector<1x12x48xbf16>
    tpu.vector_store %arg6[%c2_67, %c24_68, %c0_69], %93 {strides = array<i32>} : memref<8x60x48xbf16, #tpu.memory_space<vmem>>, vector<1x12x48xbf16>,
    %94 = vector.extract_strided_slice %81 {offsets = [36, 0], sizes = [12, 48], strides = [1, 1]} : vector<96x48xbf16> to vector<12x48xbf16>
    %c3_70 = arith.constant 3 : index
    %c24_71 = arith.constant 24 : index
    %c0_72 = arith.constant 0 : index
    %95 = vector.load %arg6[%c3_70, %c24_71, %c0_72] : memref<8x60x48xbf16, #tpu.memory_space<vmem>>, vector<1x12x48xbf16>
    %96 = vector.shape_cast %95 : vector<1x12x48xbf16> to vector<12x48xbf16>
    %97 = vector.shape_cast %94 : vector<12x48xbf16> to vector<1x12x48xbf16>
    tpu.vector_store %arg6[%c3_70, %c24_71, %c0_72], %97 {strides = array<i32>} : memref<8x60x48xbf16, #tpu.memory_space<vmem>>, vector<1x12x48xbf16>,
    %98 = vector.extract_strided_slice %81 {offsets = [48, 0], sizes = [12, 48], strides = [1, 1]} : vector<96x48xbf16> to vector<12x48xbf16>
    %c4_73 = arith.constant 4 : index
    %c24_74 = arith.constant 24 : index
    %c0_75 = arith.constant 0 : index
    %99 = vector.load %arg6[%c4_73, %c24_74, %c0_75] : memref<8x60x48xbf16, #tpu.memory_space<vmem>>, vector<1x12x48xbf16>
    %100 = vector.shape_cast %99 : vector<1x12x48xbf16> to vector<12x48xbf16>
    %101 = vector.shape_cast %98 : vector<12x48xbf16> to vector<1x12x48xbf16>
    tpu.vector_store %arg6[%c4_73, %c24_74, %c0_75], %101 {strides = array<i32>} : memref<8x60x48xbf16, #tpu.memory_space<vmem>>, vector<1x12x48xbf16>,
    %102 = vector.extract_strided_slice %81 {offsets = [60, 0], sizes = [12, 48], strides = [1, 1]} : vector<96x48xbf16> to vector<12x48xbf16>
    %c5_76 = arith.constant 5 : index
    %c24_77 = arith.constant 24 : index
    %c0_78 = arith.constant 0 : index
    %103 = vector.load %arg6[%c5_76, %c24_77, %c0_78] : memref<8x60x48xbf16, #tpu.memory_space<vmem>>, vector<1x12x48xbf16>
    %104 = vector.shape_cast %103 : vector<1x12x48xbf16> to vector<12x48xbf16>
    %105 = vector.shape_cast %102 : vector<12x48xbf16> to vector<1x12x48xbf16>
    tpu.vector_store %arg6[%c5_76, %c24_77, %c0_78], %105 {strides = array<i32>} : memref<8x60x48xbf16, #tpu.memory_space<vmem>>, vector<1x12x48xbf16>,
    %106 = vector.extract_strided_slice %81 {offsets = [72, 0], sizes = [12, 48], strides = [1, 1]} : vector<96x48xbf16> to vector<12x48xbf16>
    %c6_79 = arith.constant 6 : index
    %c24_80 = arith.constant 24 : index
    %c0_81 = arith.constant 0 : index
    %107 = vector.load %arg6[%c6_79, %c24_80, %c0_81] : memref<8x60x48xbf16, #tpu.memory_space<vmem>>, vector<1x12x48xbf16>
    %108 = vector.shape_cast %107 : vector<1x12x48xbf16> to vector<12x48xbf16>
    %109 = vector.shape_cast %106 : vector<12x48xbf16> to vector<1x12x48xbf16>
    tpu.vector_store %arg6[%c6_79, %c24_80, %c0_81], %109 {strides = array<i32>} : memref<8x60x48xbf16, #tpu.memory_space<vmem>>, vector<1x12x48xbf16>,
    %110 = vector.extract_strided_slice %81 {offsets = [84, 0], sizes = [12, 48], strides = [1, 1]} : vector<96x48xbf16> to vector<12x48xbf16>
    %c7_82 = arith.constant 7 : index
    %c24_83 = arith.constant 24 : index
    %c0_84 = arith.constant 0 : index
    %111 = vector.load %arg6[%c7_82, %c24_83, %c0_84] : memref<8x60x48xbf16, #tpu.memory_space<vmem>>, vector<1x12x48xbf16>
    %112 = vector.shape_cast %111 : vector<1x12x48xbf16> to vector<12x48xbf16>
    %113 = vector.shape_cast %110 : vector<12x48xbf16> to vector<1x12x48xbf16>
    tpu.vector_store %arg6[%c7_82, %c24_83, %c0_84], %113 {strides = array<i32>} : memref<8x60x48xbf16, #tpu.memory_space<vmem>>, vector<1x12x48xbf16>,
    %c0_85 = arith.constant 0 : index
    %c3_86 = arith.constant 3 : index
    %c0_87 = arith.constant 0 : index
    %c0_88 = arith.constant 0 : index
    %114 = vector.load %arg1[%c0_85, %c3_86, %c0_87, %c0_88] : memref<1x5x96x12xbf16, #tpu.memory_space<vmem>>, vector<1x1x96x12xbf16>
    %115 = vector.shape_cast %114 : vector<1x1x96x12xbf16> to vector<96x12xbf16>
    %c3_89 = arith.constant 3 : index
    %c0_90 = arith.constant 0 : index
    %c0_91 = arith.constant 0 : index
    %116 = vector.load %arg3[%c3_89, %c0_90, %c0_91] : memref<5x12x48xbf16, #tpu.memory_space<vmem>>, vector<1x12x48xbf16>
    %117 = vector.shape_cast %116 : vector<1x12x48xbf16> to vector<12x48xbf16>
    %cst_92 = arith.constant dense<0.000000e+00> : vector<96x48xf32>
    %118 = tpu.matmul %115, %117, %cst_92 {dimension_numbers = #tpu.dot_dimension_numbers<[1], [0], [0], [1], [0, 0, 1, 1], [], []>} : vector<96x12xbf16>, vector<12x48xbf16>, vector<96x48xf32> -> vector<96x48xf32>
    %119 = arith.truncf %118 : vector<96x48xf32> to vector<96x48xbf16>
    %120 = vector.extract_strided_slice %119 {offsets = [0, 0], sizes = [12, 48], strides = [1, 1]} : vector<96x48xbf16> to vector<12x48xbf16>
    %c0_93 = arith.constant 0 : index
    %c36 = arith.constant 36 : index
    %c0_94 = arith.constant 0 : index
    %121 = vector.load %arg6[%c0_93, %c36, %c0_94] : memref<8x60x48xbf16, #tpu.memory_space<vmem>>, vector<1x12x48xbf16>
    %122 = vector.shape_cast %121 : vector<1x12x48xbf16> to vector<12x48xbf16>
    %123 = vector.shape_cast %120 : vector<12x48xbf16> to vector<1x12x48xbf16>
    tpu.vector_store %arg6[%c0_93, %c36, %c0_94], %123 {strides = array<i32>} : memref<8x60x48xbf16, #tpu.memory_space<vmem>>, vector<1x12x48xbf16>,
    %124 = vector.extract_strided_slice %119 {offsets = [12, 0], sizes = [12, 48], strides = [1, 1]} : vector<96x48xbf16> to vector<12x48xbf16>
    %c1_95 = arith.constant 1 : index
    %c36_96 = arith.constant 36 : index
    %c0_97 = arith.constant 0 : index
    %125 = vector.load %arg6[%c1_95, %c36_96, %c0_97] : memref<8x60x48xbf16, #tpu.memory_space<vmem>>, vector<1x12x48xbf16>
    %126 = vector.shape_cast %125 : vector<1x12x48xbf16> to vector<12x48xbf16>
    %127 = vector.shape_cast %124 : vector<12x48xbf16> to vector<1x12x48xbf16>
    tpu.vector_store %arg6[%c1_95, %c36_96, %c0_97], %127 {strides = array<i32>} : memref<8x60x48xbf16, #tpu.memory_space<vmem>>, vector<1x12x48xbf16>,
    %128 = vector.extract_strided_slice %119 {offsets = [24, 0], sizes = [12, 48], strides = [1, 1]} : vector<96x48xbf16> to vector<12x48xbf16>
    %c2_98 = arith.constant 2 : index
    %c36_99 = arith.constant 36 : index
    %c0_100 = arith.constant 0 : index
    %129 = vector.load %arg6[%c2_98, %c36_99, %c0_100] : memref<8x60x48xbf16, #tpu.memory_space<vmem>>, vector<1x12x48xbf16>
    %130 = vector.shape_cast %129 : vector<1x12x48xbf16> to vector<12x48xbf16>
    %131 = vector.shape_cast %128 : vector<12x48xbf16> to vector<1x12x48xbf16>
    tpu.vector_store %arg6[%c2_98, %c36_99, %c0_100], %131 {strides = array<i32>} : memref<8x60x48xbf16, #tpu.memory_space<vmem>>, vector<1x12x48xbf16>,
    %132 = vector.extract_strided_slice %119 {offsets = [36, 0], sizes = [12, 48], strides = [1, 1]} : vector<96x48xbf16> to vector<12x48xbf16>
    %c3_101 = arith.constant 3 : index
    %c36_102 = arith.constant 36 : index
    %c0_103 = arith.constant 0 : index
    %133 = vector.load %arg6[%c3_101, %c36_102, %c0_103] : memref<8x60x48xbf16, #tpu.memory_space<vmem>>, vector<1x12x48xbf16>
    %134 = vector.shape_cast %133 : vector<1x12x48xbf16> to vector<12x48xbf16>
    %135 = vector.shape_cast %132 : vector<12x48xbf16> to vector<1x12x48xbf16>
    tpu.vector_store %arg6[%c3_101, %c36_102, %c0_103], %135 {strides = array<i32>} : memref<8x60x48xbf16, #tpu.memory_space<vmem>>, vector<1x12x48xbf16>,
    %136 = vector.extract_strided_slice %119 {offsets = [48, 0], sizes = [12, 48], strides = [1, 1]} : vector<96x48xbf16> to vector<12x48xbf16>
    %c4_104 = arith.constant 4 : index
    %c36_105 = arith.constant 36 : index
    %c0_106 = arith.constant 0 : index
    %137 = vector.load %arg6[%c4_104, %c36_105, %c0_106] : memref<8x60x48xbf16, #tpu.memory_space<vmem>>, vector<1x12x48xbf16>
    %138 = vector.shape_cast %137 : vector<1x12x48xbf16> to vector<12x48xbf16>
    %139 = vector.shape_cast %136 : vector<12x48xbf16> to vector<1x12x48xbf16>
    tpu.vector_store %arg6[%c4_104, %c36_105, %c0_106], %139 {strides = array<i32>} : memref<8x60x48xbf16, #tpu.memory_space<vmem>>, vector<1x12x48xbf16>,
    %140 = vector.extract_strided_slice %119 {offsets = [60, 0], sizes = [12, 48], strides = [1, 1]} : vector<96x48xbf16> to vector<12x48xbf16>
    %c5_107 = arith.constant 5 : index
    %c36_108 = arith.constant 36 : index
    %c0_109 = arith.constant 0 : index
    %141 = vector.load %arg6[%c5_107, %c36_108, %c0_109] : memref<8x60x48xbf16, #tpu.memory_space<vmem>>, vector<1x12x48xbf16>
    %142 = vector.shape_cast %141 : vector<1x12x48xbf16> to vector<12x48xbf16>
    %143 = vector.shape_cast %140 : vector<12x48xbf16> to vector<1x12x48xbf16>
    tpu.vector_store %arg6[%c5_107, %c36_108, %c0_109], %143 {strides = array<i32>} : memref<8x60x48xbf16, #tpu.memory_space<vmem>>, vector<1x12x48xbf16>,
    %144 = vector.extract_strided_slice %119 {offsets = [72, 0], sizes = [12, 48], strides = [1, 1]} : vector<96x48xbf16> to vector<12x48xbf16>
    %c6_110 = arith.constant 6 : index
    %c36_111 = arith.constant 36 : index
    %c0_112 = arith.constant 0 : index
    %145 = vector.load %arg6[%c6_110, %c36_111, %c0_112] : memref<8x60x48xbf16, #tpu.memory_space<vmem>>, vector<1x12x48xbf16>
    %146 = vector.shape_cast %145 : vector<1x12x48xbf16> to vector<12x48xbf16>
    %147 = vector.shape_cast %144 : vector<12x48xbf16> to vector<1x12x48xbf16>
    tpu.vector_store %arg6[%c6_110, %c36_111, %c0_112], %147 {strides = array<i32>} : memref<8x60x48xbf16, #tpu.memory_space<vmem>>, vector<1x12x48xbf16>,
    %148 = vector.extract_strided_slice %119 {offsets = [84, 0], sizes = [12, 48], strides = [1, 1]} : vector<96x48xbf16> to vector<12x48xbf16>
    %c7_113 = arith.constant 7 : index
    %c36_114 = arith.constant 36 : index
    %c0_115 = arith.constant 0 : index
    %149 = vector.load %arg6[%c7_113, %c36_114, %c0_115] : memref<8x60x48xbf16, #tpu.memory_space<vmem>>, vector<1x12x48xbf16>
    %150 = vector.shape_cast %149 : vector<1x12x48xbf16> to vector<12x48xbf16>
    %151 = vector.shape_cast %148 : vector<12x48xbf16> to vector<1x12x48xbf16>
    tpu.vector_store %arg6[%c7_113, %c36_114, %c0_115], %151 {strides = array<i32>} : memref<8x60x48xbf16, #tpu.memory_space<vmem>>, vector<1x12x48xbf16>,
    %c0_116 = arith.constant 0 : index
    %c4_117 = arith.constant 4 : index
    %c0_118 = arith.constant 0 : index
    %c0_119 = arith.constant 0 : index
    %152 = vector.load %arg1[%c0_116, %c4_117, %c0_118, %c0_119] : memref<1x5x96x12xbf16, #tpu.memory_space<vmem>>, vector<1x1x96x12xbf16>
    %153 = vector.shape_cast %152 : vector<1x1x96x12xbf16> to vector<96x12xbf16>
    %c4_120 = arith.constant 4 : index
    %c0_121 = arith.constant 0 : index
    %c0_122 = arith.constant 0 : index
    %154 = vector.load %arg3[%c4_120, %c0_121, %c0_122] : memref<5x12x48xbf16, #tpu.memory_space<vmem>>, vector<1x12x48xbf16>
    %155 = vector.shape_cast %154 : vector<1x12x48xbf16> to vector<12x48xbf16>
    %cst_123 = arith.constant dense<0.000000e+00> : vector<96x48xf32>
    %156 = tpu.matmul %153, %155, %cst_123 {dimension_numbers = #tpu.dot_dimension_numbers<[1], [0], [0], [1], [0, 0, 1, 1], [], []>} : vector<96x12xbf16>, vector<12x48xbf16>, vector<96x48xf32> -> vector<96x48xf32>
    %157 = arith.truncf %156 : vector<96x48xf32> to vector<96x48xbf16>
    %158 = vector.extract_strided_slice %157 {offsets = [0, 0], sizes = [12, 48], strides = [1, 1]} : vector<96x48xbf16> to vector<12x48xbf16>
    %c0_124 = arith.constant 0 : index
    %c48 = arith.constant 48 : index
    %c0_125 = arith.constant 0 : index
    %159 = vector.load %arg6[%c0_124, %c48, %c0_125] : memref<8x60x48xbf16, #tpu.memory_space<vmem>>, vector<1x12x48xbf16>
    %160 = vector.shape_cast %159 : vector<1x12x48xbf16> to vector<12x48xbf16>
    %161 = vector.shape_cast %158 : vector<12x48xbf16> to vector<1x12x48xbf16>
    tpu.vector_store %arg6[%c0_124, %c48, %c0_125], %161 {strides = array<i32>} : memref<8x60x48xbf16, #tpu.memory_space<vmem>>, vector<1x12x48xbf16>,
    %162 = vector.extract_strided_slice %157 {offsets = [12, 0], sizes = [12, 48], strides = [1, 1]} : vector<96x48xbf16> to vector<12x48xbf16>
    %c1_126 = arith.constant 1 : index
    %c48_127 = arith.constant 48 : index
    %c0_128 = arith.constant 0 : index
    %163 = vector.load %arg6[%c1_126, %c48_127, %c0_128] : memref<8x60x48xbf16, #tpu.memory_space<vmem>>, vector<1x12x48xbf16>
    %164 = vector.shape_cast %163 : vector<1x12x48xbf16> to vector<12x48xbf16>
    %165 = vector.shape_cast %162 : vector<12x48xbf16> to vector<1x12x48xbf16>
    tpu.vector_store %arg6[%c1_126, %c48_127, %c0_128], %165 {strides = array<i32>} : memref<8x60x48xbf16, #tpu.memory_space<vmem>>, vector<1x12x48xbf16>,
    %166 = vector.extract_strided_slice %157 {offsets = [24, 0], sizes = [12, 48], strides = [1, 1]} : vector<96x48xbf16> to vector<12x48xbf16>
    %c2_129 = arith.constant 2 : index
    %c48_130 = arith.constant 48 : index
    %c0_131 = arith.constant 0 : index
    %167 = vector.load %arg6[%c2_129, %c48_130, %c0_131] : memref<8x60x48xbf16, #tpu.memory_space<vmem>>, vector<1x12x48xbf16>
    %168 = vector.shape_cast %167 : vector<1x12x48xbf16> to vector<12x48xbf16>
    %169 = vector.shape_cast %166 : vector<12x48xbf16> to vector<1x12x48xbf16>
    tpu.vector_store %arg6[%c2_129, %c48_130, %c0_131], %169 {strides = array<i32>} : memref<8x60x48xbf16, #tpu.memory_space<vmem>>, vector<1x12x48xbf16>,
    %170 = vector.extract_strided_slice %157 {offsets = [36, 0], sizes = [12, 48], strides = [1, 1]} : vector<96x48xbf16> to vector<12x48xbf16>
    %c3_132 = arith.constant 3 : index
    %c48_133 = arith.constant 48 : index
    %c0_134 = arith.constant 0 : index
    %171 = vector.load %arg6[%c3_132, %c48_133, %c0_134] : memref<8x60x48xbf16, #tpu.memory_space<vmem>>, vector<1x12x48xbf16>
    %172 = vector.shape_cast %171 : vector<1x12x48xbf16> to vector<12x48xbf16>
    %173 = vector.shape_cast %170 : vector<12x48xbf16> to vector<1x12x48xbf16>
    tpu.vector_store %arg6[%c3_132, %c48_133, %c0_134], %173 {strides = array<i32>} : memref<8x60x48xbf16, #tpu.memory_space<vmem>>, vector<1x12x48xbf16>,
    %174 = vector.extract_strided_slice %157 {offsets = [48, 0], sizes = [12, 48], strides = [1, 1]} : vector<96x48xbf16> to vector<12x48xbf16>
    %c4_135 = arith.constant 4 : index
    %c48_136 = arith.constant 48 : index
    %c0_137 = arith.constant 0 : index
    %175 = vector.load %arg6[%c4_135, %c48_136, %c0_137] : memref<8x60x48xbf16, #tpu.memory_space<vmem>>, vector<1x12x48xbf16>
    %176 = vector.shape_cast %175 : vector<1x12x48xbf16> to vector<12x48xbf16>
    %177 = vector.shape_cast %174 : vector<12x48xbf16> to vector<1x12x48xbf16>
    tpu.vector_store %arg6[%c4_135, %c48_136, %c0_137], %177 {strides = array<i32>} : memref<8x60x48xbf16, #tpu.memory_space<vmem>>, vector<1x12x48xbf16>,
    %178 = vector.extract_strided_slice %157 {offsets = [60, 0], sizes = [12, 48], strides = [1, 1]} : vector<96x48xbf16> to vector<12x48xbf16>
    %c5_138 = arith.constant 5 : index
    %c48_139 = arith.constant 48 : index
    %c0_140 = arith.constant 0 : index
    %179 = vector.load %arg6[%c5_138, %c48_139, %c0_140] : memref<8x60x48xbf16, #tpu.memory_space<vmem>>, vector<1x12x48xbf16>
    %180 = vector.shape_cast %179 : vector<1x12x48xbf16> to vector<12x48xbf16>
    %181 = vector.shape_cast %178 : vector<12x48xbf16> to vector<1x12x48xbf16>
    tpu.vector_store %arg6[%c5_138, %c48_139, %c0_140], %181 {strides = array<i32>} : memref<8x60x48xbf16, #tpu.memory_space<vmem>>, vector<1x12x48xbf16>,
    %182 = vector.extract_strided_slice %157 {offsets = [72, 0], sizes = [12, 48], strides = [1, 1]} : vector<96x48xbf16> to vector<12x48xbf16>
    %c6_141 = arith.constant 6 : index
    %c48_142 = arith.constant 48 : index
    %c0_143 = arith.constant 0 : index
    %183 = vector.load %arg6[%c6_141, %c48_142, %c0_143] : memref<8x60x48xbf16, #tpu.memory_space<vmem>>, vector<1x12x48xbf16>
    %184 = vector.shape_cast %183 : vector<1x12x48xbf16> to vector<12x48xbf16>
    %185 = vector.shape_cast %182 : vector<12x48xbf16> to vector<1x12x48xbf16>
    tpu.vector_store %arg6[%c6_141, %c48_142, %c0_143], %185 {strides = array<i32>} : memref<8x60x48xbf16, #tpu.memory_space<vmem>>, vector<1x12x48xbf16>,
    %186 = vector.extract_strided_slice %157 {offsets = [84, 0], sizes = [12, 48], strides = [1, 1]} : vector<96x48xbf16> to vector<12x48xbf16>
    %c7_144 = arith.constant 7 : index
    %c48_145 = arith.constant 48 : index
    %c0_146 = arith.constant 0 : index
    %187 = vector.load %arg6[%c7_144, %c48_145, %c0_146] : memref<8x60x48xbf16, #tpu.memory_space<vmem>>, vector<1x12x48xbf16>
    %188 = vector.shape_cast %187 : vector<1x12x48xbf16> to vector<12x48xbf16>
    %189 = vector.shape_cast %186 : vector<12x48xbf16> to vector<1x12x48xbf16>
    tpu.vector_store %arg6[%c7_144, %c48_145, %c0_146], %189 {strides = array<i32>} : memref<8x60x48xbf16, #tpu.memory_space<vmem>>, vector<1x12x48xbf16>,
    %c0_147 = arith.constant 0 : index
    %c0_148 = arith.constant 0 : index
    %190 = vector.load %arg2[%c0_147, %c0_148] : memref<48x60xbf16, #tpu.memory_space<vmem>>, vector<48x60xbf16>
    %c0_i32 = arith.constant 0 : i32
    %191 = arith.index_cast %c0_i32 : i32 to index
    %c0_149 = arith.constant 0 : index
    %c0_150 = arith.constant 0 : index
    %192 = vector.load %arg6[%191, %c0_149, %c0_150] : memref<8x60x48xbf16, #tpu.memory_space<vmem>>, vector<1x60x48xbf16>
    %193 = vector.shape_cast %192 : vector<1x60x48xbf16> to vector<60x48xbf16>
    %cst_151 = arith.constant dense<0.000000e+00> : vector<48x48xf32>
    %194 = tpu.matmul %190, %193, %cst_151 {dimension_numbers = #tpu.dot_dimension_numbers<[1], [0], [0], [1], [0, 0, 1, 1], [], []>} : vector<48x60xbf16>, vector<60x48xbf16>, vector<48x48xf32> -> vector<48x48xf32>
    %195 = arith.index_cast %c0_i32 : i32 to index
    %196 = memref.load %arg4[%195] : memref<8xf32, #tpu.memory_space<smem>>
    %197 = vector.broadcast %196 : f32 to vector<48x48xf32>
    %198 = arith.addf %194, %197 : vector<48x48xf32>
    %199 = arith.truncf %198 : vector<48x48xf32> to vector<48x48xbf16>
    %c0_152 = arith.constant 0 : index
    %200 = arith.index_cast %c0_i32 : i32 to index
    %c0_153 = arith.constant 0 : index
    %c0_154 = arith.constant 0 : index
    %201 = vector.load %arg5[%c0_152, %200, %c0_153, %c0_154] : memref<1x8x48x48xbf16, #tpu.memory_space<vmem>>, vector<1x1x48x48xbf16>
    %202 = vector.shape_cast %201 : vector<1x1x48x48xbf16> to vector<48x48xbf16>
    %203 = vector.shape_cast %199 : vector<48x48xbf16> to vector<1x1x48x48xbf16>
    tpu.vector_store %arg5[%c0_152, %200, %c0_153, %c0_154], %203 {strides = array<i32>} : memref<1x8x48x48xbf16, #tpu.memory_space<vmem>>, vector<1x1x48x48xbf16>,
    %c1_i32 = arith.constant 1 : i32
    %204 = arith.index_cast %c1_i32 : i32 to index
    %c0_155 = arith.constant 0 : index
    %c0_156 = arith.constant 0 : index
    %205 = vector.load %arg6[%204, %c0_155, %c0_156] : memref<8x60x48xbf16, #tpu.memory_space<vmem>>, vector<1x60x48xbf16>
    %206 = vector.shape_cast %205 : vector<1x60x48xbf16> to vector<60x48xbf16>
    %cst_157 = arith.constant dense<0.000000e+00> : vector<48x48xf32>
    %207 = tpu.matmul %190, %206, %cst_157 {dimension_numbers = #tpu.dot_dimension_numbers<[1], [0], [0], [1], [0, 0, 1, 1], [], []>} : vector<48x60xbf16>, vector<60x48xbf16>, vector<48x48xf32> -> vector<48x48xf32>
    %208 = arith.index_cast %c1_i32 : i32 to index
    %209 = memref.load %arg4[%208] : memref<8xf32, #tpu.memory_space<smem>>
    %210 = vector.broadcast %209 : f32 to vector<48x48xf32>
    %211 = arith.addf %207, %210 : vector<48x48xf32>
    %212 = arith.truncf %211 : vector<48x48xf32> to vector<48x48xbf16>
    %c0_158 = arith.constant 0 : index
    %213 = arith.index_cast %c1_i32 : i32 to index
    %c0_159 = arith.constant 0 : index
    %c0_160 = arith.constant 0 : index
    %214 = vector.load %arg5[%c0_158, %213, %c0_159, %c0_160] : memref<1x8x48x48xbf16, #tpu.memory_space<vmem>>, vector<1x1x48x48xbf16>
    %215 = vector.shape_cast %214 : vector<1x1x48x48xbf16> to vector<48x48xbf16>
    %216 = vector.shape_cast %212 : vector<48x48xbf16> to vector<1x1x48x48xbf16>
    tpu.vector_store %arg5[%c0_158, %213, %c0_159, %c0_160], %216 {strides = array<i32>} : memref<1x8x48x48xbf16, #tpu.memory_space<vmem>>, vector<1x1x48x48xbf16>,
    %c2_i32 = arith.constant 2 : i32
    %217 = arith.index_cast %c2_i32 : i32 to index
    %c0_161 = arith.constant 0 : index
    %c0_162 = arith.constant 0 : index
    %218 = vector.load %arg6[%217, %c0_161, %c0_162] : memref<8x60x48xbf16, #tpu.memory_space<vmem>>, vector<1x60x48xbf16>
    %219 = vector.shape_cast %218 : vector<1x60x48xbf16> to vector<60x48xbf16>
    %cst_163 = arith.constant dense<0.000000e+00> : vector<48x48xf32>
    %220 = tpu.matmul %190, %219, %cst_163 {dimension_numbers = #tpu.dot_dimension_numbers<[1], [0], [0], [1], [0, 0, 1, 1], [], []>} : vector<48x60xbf16>, vector<60x48xbf16>, vector<48x48xf32> -> vector<48x48xf32>
    %221 = arith.index_cast %c2_i32 : i32 to index
    %222 = memref.load %arg4[%221] : memref<8xf32, #tpu.memory_space<smem>>
    %223 = vector.broadcast %222 : f32 to vector<48x48xf32>
    %224 = arith.addf %220, %223 : vector<48x48xf32>
    %225 = arith.truncf %224 : vector<48x48xf32> to vector<48x48xbf16>
    %c0_164 = arith.constant 0 : index
    %226 = arith.index_cast %c2_i32 : i32 to index
    %c0_165 = arith.constant 0 : index
    %c0_166 = arith.constant 0 : index
    %227 = vector.load %arg5[%c0_164, %226, %c0_165, %c0_166] : memref<1x8x48x48xbf16, #tpu.memory_space<vmem>>, vector<1x1x48x48xbf16>
    %228 = vector.shape_cast %227 : vector<1x1x48x48xbf16> to vector<48x48xbf16>
    %229 = vector.shape_cast %225 : vector<48x48xbf16> to vector<1x1x48x48xbf16>
    tpu.vector_store %arg5[%c0_164, %226, %c0_165, %c0_166], %229 {strides = array<i32>} : memref<1x8x48x48xbf16, #tpu.memory_space<vmem>>, vector<1x1x48x48xbf16>,
    %c3_i32 = arith.constant 3 : i32
    %230 = arith.index_cast %c3_i32 : i32 to index
    %c0_167 = arith.constant 0 : index
    %c0_168 = arith.constant 0 : index
    %231 = vector.load %arg6[%230, %c0_167, %c0_168] : memref<8x60x48xbf16, #tpu.memory_space<vmem>>, vector<1x60x48xbf16>
    %232 = vector.shape_cast %231 : vector<1x60x48xbf16> to vector<60x48xbf16>
    %cst_169 = arith.constant dense<0.000000e+00> : vector<48x48xf32>
    %233 = tpu.matmul %190, %232, %cst_169 {dimension_numbers = #tpu.dot_dimension_numbers<[1], [0], [0], [1], [0, 0, 1, 1], [], []>} : vector<48x60xbf16>, vector<60x48xbf16>, vector<48x48xf32> -> vector<48x48xf32>
    %234 = arith.index_cast %c3_i32 : i32 to index
    %235 = memref.load %arg4[%234] : memref<8xf32, #tpu.memory_space<smem>>
    %236 = vector.broadcast %235 : f32 to vector<48x48xf32>
    %237 = arith.addf %233, %236 : vector<48x48xf32>
    %238 = arith.truncf %237 : vector<48x48xf32> to vector<48x48xbf16>
    %c0_170 = arith.constant 0 : index
    %239 = arith.index_cast %c3_i32 : i32 to index
    %c0_171 = arith.constant 0 : index
    %c0_172 = arith.constant 0 : index
    %240 = vector.load %arg5[%c0_170, %239, %c0_171, %c0_172] : memref<1x8x48x48xbf16, #tpu.memory_space<vmem>>, vector<1x1x48x48xbf16>
    %241 = vector.shape_cast %240 : vector<1x1x48x48xbf16> to vector<48x48xbf16>
    %242 = vector.shape_cast %238 : vector<48x48xbf16> to vector<1x1x48x48xbf16>
    tpu.vector_store %arg5[%c0_170, %239, %c0_171, %c0_172], %242 {strides = array<i32>} : memref<1x8x48x48xbf16, #tpu.memory_space<vmem>>, vector<1x1x48x48xbf16>,
    %c4_i32 = arith.constant 4 : i32
    %243 = arith.index_cast %c4_i32 : i32 to index
    %c0_173 = arith.constant 0 : index
    %c0_174 = arith.constant 0 : index
    %244 = vector.load %arg6[%243, %c0_173, %c0_174] : memref<8x60x48xbf16, #tpu.memory_space<vmem>>, vector<1x60x48xbf16>
    %245 = vector.shape_cast %244 : vector<1x60x48xbf16> to vector<60x48xbf16>
    %cst_175 = arith.constant dense<0.000000e+00> : vector<48x48xf32>
    %246 = tpu.matmul %190, %245, %cst_175 {dimension_numbers = #tpu.dot_dimension_numbers<[1], [0], [0], [1], [0, 0, 1, 1], [], []>} : vector<48x60xbf16>, vector<60x48xbf16>, vector<48x48xf32> -> vector<48x48xf32>
    %247 = arith.index_cast %c4_i32 : i32 to index
    %248 = memref.load %arg4[%247] : memref<8xf32, #tpu.memory_space<smem>>
    %249 = vector.broadcast %248 : f32 to vector<48x48xf32>
    %250 = arith.addf %246, %249 : vector<48x48xf32>
    %251 = arith.truncf %250 : vector<48x48xf32> to vector<48x48xbf16>
    %c0_176 = arith.constant 0 : index
    %252 = arith.index_cast %c4_i32 : i32 to index
    %c0_177 = arith.constant 0 : index
    %c0_178 = arith.constant 0 : index
    %253 = vector.load %arg5[%c0_176, %252, %c0_177, %c0_178] : memref<1x8x48x48xbf16, #tpu.memory_space<vmem>>, vector<1x1x48x48xbf16>
    %254 = vector.shape_cast %253 : vector<1x1x48x48xbf16> to vector<48x48xbf16>
    %255 = vector.shape_cast %251 : vector<48x48xbf16> to vector<1x1x48x48xbf16>
    tpu.vector_store %arg5[%c0_176, %252, %c0_177, %c0_178], %255 {strides = array<i32>} : memref<1x8x48x48xbf16, #tpu.memory_space<vmem>>, vector<1x1x48x48xbf16>,
    %c5_i32 = arith.constant 5 : i32
    %256 = arith.index_cast %c5_i32 : i32 to index
    %c0_179 = arith.constant 0 : index
    %c0_180 = arith.constant 0 : index
    %257 = vector.load %arg6[%256, %c0_179, %c0_180] : memref<8x60x48xbf16, #tpu.memory_space<vmem>>, vector<1x60x48xbf16>
    %258 = vector.shape_cast %257 : vector<1x60x48xbf16> to vector<60x48xbf16>
    %cst_181 = arith.constant dense<0.000000e+00> : vector<48x48xf32>
    %259 = tpu.matmul %190, %258, %cst_181 {dimension_numbers = #tpu.dot_dimension_numbers<[1], [0], [0], [1], [0, 0, 1, 1], [], []>} : vector<48x60xbf16>, vector<60x48xbf16>, vector<48x48xf32> -> vector<48x48xf32>
    %260 = arith.index_cast %c5_i32 : i32 to index
    %261 = memref.load %arg4[%260] : memref<8xf32, #tpu.memory_space<smem>>
    %262 = vector.broadcast %261 : f32 to vector<48x48xf32>
    %263 = arith.addf %259, %262 : vector<48x48xf32>
    %264 = arith.truncf %263 : vector<48x48xf32> to vector<48x48xbf16>
    %c0_182 = arith.constant 0 : index
    %265 = arith.index_cast %c5_i32 : i32 to index
    %c0_183 = arith.constant 0 : index
    %c0_184 = arith.constant 0 : index
    %266 = vector.load %arg5[%c0_182, %265, %c0_183, %c0_184] : memref<1x8x48x48xbf16, #tpu.memory_space<vmem>>, vector<1x1x48x48xbf16>
    %267 = vector.shape_cast %266 : vector<1x1x48x48xbf16> to vector<48x48xbf16>
    %268 = vector.shape_cast %264 : vector<48x48xbf16> to vector<1x1x48x48xbf16>
    tpu.vector_store %arg5[%c0_182, %265, %c0_183, %c0_184], %268 {strides = array<i32>} : memref<1x8x48x48xbf16, #tpu.memory_space<vmem>>, vector<1x1x48x48xbf16>,
    %c6_i32 = arith.constant 6 : i32
    %269 = arith.index_cast %c6_i32 : i32 to index
    %c0_185 = arith.constant 0 : index
    %c0_186 = arith.constant 0 : index
    %270 = vector.load %arg6[%269, %c0_185, %c0_186] : memref<8x60x48xbf16, #tpu.memory_space<vmem>>, vector<1x60x48xbf16>
    %271 = vector.shape_cast %270 : vector<1x60x48xbf16> to vector<60x48xbf16>
    %cst_187 = arith.constant dense<0.000000e+00> : vector<48x48xf32>
    %272 = tpu.matmul %190, %271, %cst_187 {dimension_numbers = #tpu.dot_dimension_numbers<[1], [0], [0], [1], [0, 0, 1, 1], [], []>} : vector<48x60xbf16>, vector<60x48xbf16>, vector<48x48xf32> -> vector<48x48xf32>
    %273 = arith.index_cast %c6_i32 : i32 to index
    %274 = memref.load %arg4[%273] : memref<8xf32, #tpu.memory_space<smem>>
    %275 = vector.broadcast %274 : f32 to vector<48x48xf32>
    %276 = arith.addf %272, %275 : vector<48x48xf32>
    %277 = arith.truncf %276 : vector<48x48xf32> to vector<48x48xbf16>
    %c0_188 = arith.constant 0 : index
    %278 = arith.index_cast %c6_i32 : i32 to index
    %c0_189 = arith.constant 0 : index
    %c0_190 = arith.constant 0 : index
    %279 = vector.load %arg5[%c0_188, %278, %c0_189, %c0_190] : memref<1x8x48x48xbf16, #tpu.memory_space<vmem>>, vector<1x1x48x48xbf16>
    %280 = vector.shape_cast %279 : vector<1x1x48x48xbf16> to vector<48x48xbf16>
    %281 = vector.shape_cast %277 : vector<48x48xbf16> to vector<1x1x48x48xbf16>
    tpu.vector_store %arg5[%c0_188, %278, %c0_189, %c0_190], %281 {strides = array<i32>} : memref<1x8x48x48xbf16, #tpu.memory_space<vmem>>, vector<1x1x48x48xbf16>,
    %c7_i32 = arith.constant 7 : i32
    %282 = arith.index_cast %c7_i32 : i32 to index
    %c0_191 = arith.constant 0 : index
    %c0_192 = arith.constant 0 : index
    %283 = vector.load %arg6[%282, %c0_191, %c0_192] : memref<8x60x48xbf16, #tpu.memory_space<vmem>>, vector<1x60x48xbf16>
    %284 = vector.shape_cast %283 : vector<1x60x48xbf16> to vector<60x48xbf16>
    %cst_193 = arith.constant dense<0.000000e+00> : vector<48x48xf32>
    %285 = tpu.matmul %190, %284, %cst_193 {dimension_numbers = #tpu.dot_dimension_numbers<[1], [0], [0], [1], [0, 0, 1, 1], [], []>} : vector<48x60xbf16>, vector<60x48xbf16>, vector<48x48xf32> -> vector<48x48xf32>
    %286 = arith.index_cast %c7_i32 : i32 to index
    %287 = memref.load %arg4[%286] : memref<8xf32, #tpu.memory_space<smem>>
    %288 = vector.broadcast %287 : f32 to vector<48x48xf32>
    %289 = arith.addf %285, %288 : vector<48x48xf32>
    %290 = arith.truncf %289 : vector<48x48xf32> to vector<48x48xbf16>
    %c0_194 = arith.constant 0 : index
    %291 = arith.index_cast %c7_i32 : i32 to index
    %c0_195 = arith.constant 0 : index
    %c0_196 = arith.constant 0 : index
    %292 = vector.load %arg5[%c0_194, %291, %c0_195, %c0_196] : memref<1x8x48x48xbf16, #tpu.memory_space<vmem>>, vector<1x1x48x48xbf16>
    %293 = vector.shape_cast %292 : vector<1x1x48x48xbf16> to vector<48x48xbf16>
    %294 = vector.shape_cast %290 : vector<48x48xbf16> to vector<1x1x48x48xbf16>
    tpu.vector_store %arg5[%c0_194, %291, %c0_195, %c0_196], %294 {strides = array<i32>} : memref<1x8x48x48xbf16, #tpu.memory_space<vmem>>, vector<1x1x48x48xbf16>,
    %c8_i32 = arith.constant 8 : i32
    return
  }
  func.func @transform_0(%arg0: i32) -> (i32, i32, i32, i32) {
    %c0_i32 = arith.constant 0 : i32
    %c0_i32_0 = arith.constant 0 : i32
    %c0_i32_1 = arith.constant 0 : i32
    %c0_i32_2 = arith.constant 0 : i32
    return %arg0, %c0_i32, %c0_i32_0, %c0_i32_1 : i32, i32, i32, i32
  }
  func.func @transform_1(%arg0: i32) -> (i32, i32) {
    %c0_i32 = arith.constant 0 : i32
    %c0_i32_0 = arith.constant 0 : i32
    %c0_i32_1 = arith.constant 0 : i32
    return %c0_i32, %c0_i32_0 : i32, i32
  }
  func.func @transform_2(%arg0: i32) -> (i32, i32, i32) {
    %c0_i32 = arith.constant 0 : i32
    %c0_i32_0 = arith.constant 0 : i32
    %c0_i32_1 = arith.constant 0 : i32
    %c0_i32_2 = arith.constant 0 : i32
    return %c0_i32, %c0_i32_0, %c0_i32_1 : i32, i32, i32
  }
  func.func @transform_3(%arg0: i32) -> i32 {
    %c0_i32 = arith.constant 0 : i32
    %c0_i32_0 = arith.constant 0 : i32
    return %c0_i32 : i32
  }
  func.func @transform_4(%arg0: i32) -> (i32, i32, i32, i32) {
    %c0_i32 = arith.constant 0 : i32
    %c0_i32_0 = arith.constant 0 : i32
    %c0_i32_1 = arith.constant 0 : i32
    %c0_i32_2 = arith.constant 0 : i32
    return %arg0, %c0_i32, %c0_i32_0, %c0_i32_1 : i32, i32, i32, i32
  }
}

module attributes {stable_mosaic.version = 11 : i64} {
  func.func @_seg_conv3x3_kernel(%arg0: i32, %arg1: memref<1x8x2304xbf16, #tpu.memory_space<vmem>>, %arg2: memref<9x4x8xbf16, #tpu.memory_space<vmem>>, %arg3: memref<2x2304xbf16, #tpu.memory_space<vmem>>, %arg4: memref<4x1xf32, #tpu.memory_space<vmem>>, %arg5: memref<1x4x2304xf32, #tpu.memory_space<vmem>>, %arg6: memref<8x2560xbf16, #tpu.memory_space<vmem>>, %arg7: memref<8x2560xbf16, #tpu.memory_space<vmem>>, %arg8: memref<8x2560xbf16, #tpu.memory_space<vmem>>) attributes {dimension_semantics = [#tpu.dimension_semantics<parallel>], iteration_bounds = array<i64: 2>, scalar_prefetch = 0 : i64, scratch_operands = 3 : i64, tpu.core_type = #tpu.core_type<tc>, window_params = [{transform_indices = @transform_0, window_bounds = array<i64: 1, 8, 2304>}, {pipeline_mode = #tpu.pipeline_mode<synchronous>, transform_indices = @transform_1, window_bounds = array<i64: 9, 4, 8>}, {pipeline_mode = #tpu.pipeline_mode<synchronous>, transform_indices = @transform_2, window_bounds = array<i64: 2, 2304>}, {pipeline_mode = #tpu.pipeline_mode<synchronous>, transform_indices = @transform_3, window_bounds = array<i64: 4, 1>}, {transform_indices = @transform_4, window_bounds = array<i64: 1, 4, 2304>}]} {
    %cst = arith.constant 0.000000e+00 : bf16
    %0 = vector.broadcast %cst : bf16 to vector<8x128xbf16>
    %c0 = arith.constant 0 : index
    %c0_0 = arith.constant 0 : index
    %1 = vector.load %arg6[%c0, %c0_0] : memref<8x2560xbf16, #tpu.memory_space<vmem>>, vector<8x128xbf16>
    tpu.vector_store %arg6[%c0, %c0_0], %0 {strides = array<i32>} : memref<8x2560xbf16, #tpu.memory_space<vmem>>, vector<8x128xbf16>,
    %c0_1 = arith.constant 0 : index
    %c2432 = arith.constant 2432 : index
    %2 = vector.load %arg6[%c0_1, %c2432] : memref<8x2560xbf16, #tpu.memory_space<vmem>>, vector<8x128xbf16>
    tpu.vector_store %arg6[%c0_1, %c2432], %0 {strides = array<i32>} : memref<8x2560xbf16, #tpu.memory_space<vmem>>, vector<8x128xbf16>,
    %c0_2 = arith.constant 0 : index
    %c0_3 = arith.constant 0 : index
    %3 = vector.load %arg7[%c0_2, %c0_3] : memref<8x2560xbf16, #tpu.memory_space<vmem>>, vector<8x128xbf16>
    tpu.vector_store %arg7[%c0_2, %c0_3], %0 {strides = array<i32>} : memref<8x2560xbf16, #tpu.memory_space<vmem>>, vector<8x128xbf16>,
    %c0_4 = arith.constant 0 : index
    %c2432_5 = arith.constant 2432 : index
    %4 = vector.load %arg7[%c0_4, %c2432_5] : memref<8x2560xbf16, #tpu.memory_space<vmem>>, vector<8x128xbf16>
    tpu.vector_store %arg7[%c0_4, %c2432_5], %0 {strides = array<i32>} : memref<8x2560xbf16, #tpu.memory_space<vmem>>, vector<8x128xbf16>,
    %c0_6 = arith.constant 0 : index
    %c0_7 = arith.constant 0 : index
    %5 = vector.load %arg8[%c0_6, %c0_7] : memref<8x2560xbf16, #tpu.memory_space<vmem>>, vector<8x128xbf16>
    tpu.vector_store %arg8[%c0_6, %c0_7], %0 {strides = array<i32>} : memref<8x2560xbf16, #tpu.memory_space<vmem>>, vector<8x128xbf16>,
    %c0_8 = arith.constant 0 : index
    %c2432_9 = arith.constant 2432 : index
    %6 = vector.load %arg8[%c0_8, %c2432_9] : memref<8x2560xbf16, #tpu.memory_space<vmem>>, vector<8x128xbf16>
    tpu.vector_store %arg8[%c0_8, %c2432_9], %0 {strides = array<i32>} : memref<8x2560xbf16, #tpu.memory_space<vmem>>, vector<8x128xbf16>,
    %c0_10 = arith.constant 0 : index
    %c0_11 = arith.constant 0 : index
    %c0_12 = arith.constant 0 : index
    %7 = vector.load %arg1[%c0_10, %c0_11, %c0_12] : memref<1x8x2304xbf16, #tpu.memory_space<vmem>>, vector<1x8x2304xbf16>
    %8 = vector.shape_cast %7 : vector<1x8x2304xbf16> to vector<8x2304xbf16>
    %c0_13 = arith.constant 0 : index
    %c128 = arith.constant 128 : index
    %9 = vector.load %arg6[%c0_13, %c128] : memref<8x2560xbf16, #tpu.memory_space<vmem>>, vector<8x2304xbf16>
    tpu.vector_store %arg6[%c0_13, %c128], %8 {strides = array<i32>} : memref<8x2560xbf16, #tpu.memory_space<vmem>>, vector<8x2304xbf16>,
    %c0_14 = arith.constant 0 : index
    %c0_15 = arith.constant 0 : index
    %10 = vector.load %arg3[%c0_14, %c0_15] : memref<2x2304xbf16, #tpu.memory_space<vmem>>, vector<1x2304xbf16>
    %11 = vector.broadcast %10 : vector<1x2304xbf16> to vector<8x2304xbf16>
    %12 = arith.mulf %8, %11 : vector<8x2304xbf16>
    %c0_16 = arith.constant 0 : index
    %c128_17 = arith.constant 128 : index
    %13 = vector.load %arg7[%c0_16, %c128_17] : memref<8x2560xbf16, #tpu.memory_space<vmem>>, vector<8x2304xbf16>
    tpu.vector_store %arg7[%c0_16, %c128_17], %12 {strides = array<i32>} : memref<8x2560xbf16, #tpu.memory_space<vmem>>, vector<8x2304xbf16>,
    %c1 = arith.constant 1 : index
    %c0_18 = arith.constant 0 : index
    %14 = vector.load %arg3[%c1, %c0_18] : memref<2x2304xbf16, #tpu.memory_space<vmem>>, vector<1x2304xbf16>
    %15 = vector.broadcast %14 : vector<1x2304xbf16> to vector<8x2304xbf16>
    %16 = arith.mulf %8, %15 : vector<8x2304xbf16>
    %c0_19 = arith.constant 0 : index
    %c128_20 = arith.constant 128 : index
    %17 = vector.load %arg8[%c0_19, %c128_20] : memref<8x2560xbf16, #tpu.memory_space<vmem>>, vector<8x2304xbf16>
    tpu.vector_store %arg8[%c0_19, %c128_20], %16 {strides = array<i32>} : memref<8x2560xbf16, #tpu.memory_space<vmem>>, vector<8x2304xbf16>,
    %c0_21 = arith.constant 0 : index
    %c79 = arith.constant 79 : index
    %18 = vector.load %arg7[%c0_21, %c79] : memref<8x2560xbf16, #tpu.memory_space<vmem>>, vector<8x2304xbf16>
    %c0_22 = arith.constant 0 : index
    %c0_23 = arith.constant 0 : index
    %c0_24 = arith.constant 0 : index
    %19 = vector.load %arg2[%c0_22, %c0_23, %c0_24] : memref<9x4x8xbf16, #tpu.memory_space<vmem>>, vector<1x4x8xbf16>
    %20 = vector.shape_cast %19 : vector<1x4x8xbf16> to vector<4x8xbf16>
    %cst_25 = arith.constant dense<0.000000e+00> : vector<4x2304xf32>
    %21 = tpu.matmul %20, %18, %cst_25 {dimension_numbers = #tpu.dot_dimension_numbers<[1], [0], [0], [1], [0, 0, 1, 1], [], []>} : vector<4x8xbf16>, vector<8x2304xbf16>, vector<4x2304xf32> -> vector<4x2304xf32>
    %c0_26 = arith.constant 0 : index
    %c80 = arith.constant 80 : index
    %22 = vector.load %arg6[%c0_26, %c80] : memref<8x2560xbf16, #tpu.memory_space<vmem>>, vector<8x2304xbf16>
    %c1_27 = arith.constant 1 : index
    %c0_28 = arith.constant 0 : index
    %c0_29 = arith.constant 0 : index
    %23 = vector.load %arg2[%c1_27, %c0_28, %c0_29] : memref<9x4x8xbf16, #tpu.memory_space<vmem>>, vector<1x4x8xbf16>
    %24 = vector.shape_cast %23 : vector<1x4x8xbf16> to vector<4x8xbf16>
    %cst_30 = arith.constant dense<0.000000e+00> : vector<4x2304xf32>
    %25 = tpu.matmul %24, %22, %cst_30 {dimension_numbers = #tpu.dot_dimension_numbers<[1], [0], [0], [1], [0, 0, 1, 1], [], []>} : vector<4x8xbf16>, vector<8x2304xbf16>, vector<4x2304xf32> -> vector<4x2304xf32>
    %26 = arith.addf %21, %25 : vector<4x2304xf32>
    %c0_31 = arith.constant 0 : index
    %c81 = arith.constant 81 : index
    %27 = vector.load %arg8[%c0_31, %c81] : memref<8x2560xbf16, #tpu.memory_space<vmem>>, vector<8x2304xbf16>
    %c2 = arith.constant 2 : index
    %c0_32 = arith.constant 0 : index
    %c0_33 = arith.constant 0 : index
    %28 = vector.load %arg2[%c2, %c0_32, %c0_33] : memref<9x4x8xbf16, #tpu.memory_space<vmem>>, vector<1x4x8xbf16>
    %29 = vector.shape_cast %28 : vector<1x4x8xbf16> to vector<4x8xbf16>
    %cst_34 = arith.constant dense<0.000000e+00> : vector<4x2304xf32>
    %30 = tpu.matmul %29, %27, %cst_34 {dimension_numbers = #tpu.dot_dimension_numbers<[1], [0], [0], [1], [0, 0, 1, 1], [], []>} : vector<4x8xbf16>, vector<8x2304xbf16>, vector<4x2304xf32> -> vector<4x2304xf32>
    %31 = arith.addf %26, %30 : vector<4x2304xf32>
    %c0_35 = arith.constant 0 : index
    %c127 = arith.constant 127 : index
    %32 = vector.load %arg7[%c0_35, %c127] : memref<8x2560xbf16, #tpu.memory_space<vmem>>, vector<8x2304xbf16>
    %c3 = arith.constant 3 : index
    %c0_36 = arith.constant 0 : index
    %c0_37 = arith.constant 0 : index
    %33 = vector.load %arg2[%c3, %c0_36, %c0_37] : memref<9x4x8xbf16, #tpu.memory_space<vmem>>, vector<1x4x8xbf16>
    %34 = vector.shape_cast %33 : vector<1x4x8xbf16> to vector<4x8xbf16>
    %cst_38 = arith.constant dense<0.000000e+00> : vector<4x2304xf32>
    %35 = tpu.matmul %34, %32, %cst_38 {dimension_numbers = #tpu.dot_dimension_numbers<[1], [0], [0], [1], [0, 0, 1, 1], [], []>} : vector<4x8xbf16>, vector<8x2304xbf16>, vector<4x2304xf32> -> vector<4x2304xf32>
    %36 = arith.addf %31, %35 : vector<4x2304xf32>
    %c0_39 = arith.constant 0 : index
    %c128_40 = arith.constant 128 : index
    %37 = vector.load %arg6[%c0_39, %c128_40] : memref<8x2560xbf16, #tpu.memory_space<vmem>>, vector<8x2304xbf16>
    %c4 = arith.constant 4 : index
    %c0_41 = arith.constant 0 : index
    %c0_42 = arith.constant 0 : index
    %38 = vector.load %arg2[%c4, %c0_41, %c0_42] : memref<9x4x8xbf16, #tpu.memory_space<vmem>>, vector<1x4x8xbf16>
    %39 = vector.shape_cast %38 : vector<1x4x8xbf16> to vector<4x8xbf16>
    %cst_43 = arith.constant dense<0.000000e+00> : vector<4x2304xf32>
    %40 = tpu.matmul %39, %37, %cst_43 {dimension_numbers = #tpu.dot_dimension_numbers<[1], [0], [0], [1], [0, 0, 1, 1], [], []>} : vector<4x8xbf16>, vector<8x2304xbf16>, vector<4x2304xf32> -> vector<4x2304xf32>
    %41 = arith.addf %36, %40 : vector<4x2304xf32>
    %c0_44 = arith.constant 0 : index
    %c129 = arith.constant 129 : index
    %42 = vector.load %arg8[%c0_44, %c129] : memref<8x2560xbf16, #tpu.memory_space<vmem>>, vector<8x2304xbf16>
    %c5 = arith.constant 5 : index
    %c0_45 = arith.constant 0 : index
    %c0_46 = arith.constant 0 : index
    %43 = vector.load %arg2[%c5, %c0_45, %c0_46] : memref<9x4x8xbf16, #tpu.memory_space<vmem>>, vector<1x4x8xbf16>
    %44 = vector.shape_cast %43 : vector<1x4x8xbf16> to vector<4x8xbf16>
    %cst_47 = arith.constant dense<0.000000e+00> : vector<4x2304xf32>
    %45 = tpu.matmul %44, %42, %cst_47 {dimension_numbers = #tpu.dot_dimension_numbers<[1], [0], [0], [1], [0, 0, 1, 1], [], []>} : vector<4x8xbf16>, vector<8x2304xbf16>, vector<4x2304xf32> -> vector<4x2304xf32>
    %46 = arith.addf %41, %45 : vector<4x2304xf32>
    %c0_48 = arith.constant 0 : index
    %c175 = arith.constant 175 : index
    %47 = vector.load %arg7[%c0_48, %c175] : memref<8x2560xbf16, #tpu.memory_space<vmem>>, vector<8x2304xbf16>
    %c6 = arith.constant 6 : index
    %c0_49 = arith.constant 0 : index
    %c0_50 = arith.constant 0 : index
    %48 = vector.load %arg2[%c6, %c0_49, %c0_50] : memref<9x4x8xbf16, #tpu.memory_space<vmem>>, vector<1x4x8xbf16>
    %49 = vector.shape_cast %48 : vector<1x4x8xbf16> to vector<4x8xbf16>
    %cst_51 = arith.constant dense<0.000000e+00> : vector<4x2304xf32>
    %50 = tpu.matmul %49, %47, %cst_51 {dimension_numbers = #tpu.dot_dimension_numbers<[1], [0], [0], [1], [0, 0, 1, 1], [], []>} : vector<4x8xbf16>, vector<8x2304xbf16>, vector<4x2304xf32> -> vector<4x2304xf32>
    %51 = arith.addf %46, %50 : vector<4x2304xf32>
    %c0_52 = arith.constant 0 : index
    %c176 = arith.constant 176 : index
    %52 = vector.load %arg6[%c0_52, %c176] : memref<8x2560xbf16, #tpu.memory_space<vmem>>, vector<8x2304xbf16>
    %c7 = arith.constant 7 : index
    %c0_53 = arith.constant 0 : index
    %c0_54 = arith.constant 0 : index
    %53 = vector.load %arg2[%c7, %c0_53, %c0_54] : memref<9x4x8xbf16, #tpu.memory_space<vmem>>, vector<1x4x8xbf16>
    %54 = vector.shape_cast %53 : vector<1x4x8xbf16> to vector<4x8xbf16>
    %cst_55 = arith.constant dense<0.000000e+00> : vector<4x2304xf32>
    %55 = tpu.matmul %54, %52, %cst_55 {dimension_numbers = #tpu.dot_dimension_numbers<[1], [0], [0], [1], [0, 0, 1, 1], [], []>} : vector<4x8xbf16>, vector<8x2304xbf16>, vector<4x2304xf32> -> vector<4x2304xf32>
    %56 = arith.addf %51, %55 : vector<4x2304xf32>
    %c0_56 = arith.constant 0 : index
    %c177 = arith.constant 177 : index
    %57 = vector.load %arg8[%c0_56, %c177] : memref<8x2560xbf16, #tpu.memory_space<vmem>>, vector<8x2304xbf16>
    %c8 = arith.constant 8 : index
    %c0_57 = arith.constant 0 : index
    %c0_58 = arith.constant 0 : index
    %58 = vector.load %arg2[%c8, %c0_57, %c0_58] : memref<9x4x8xbf16, #tpu.memory_space<vmem>>, vector<1x4x8xbf16>
    %59 = vector.shape_cast %58 : vector<1x4x8xbf16> to vector<4x8xbf16>
    %cst_59 = arith.constant dense<0.000000e+00> : vector<4x2304xf32>
    %60 = tpu.matmul %59, %57, %cst_59 {dimension_numbers = #tpu.dot_dimension_numbers<[1], [0], [0], [1], [0, 0, 1, 1], [], []>} : vector<4x8xbf16>, vector<8x2304xbf16>, vector<4x2304xf32> -> vector<4x2304xf32>
    %61 = arith.addf %56, %60 : vector<4x2304xf32>
    %c0_60 = arith.constant 0 : index
    %c0_61 = arith.constant 0 : index
    %62 = vector.load %arg4[%c0_60, %c0_61] : memref<4x1xf32, #tpu.memory_space<vmem>>, vector<4x1xf32>
    %63 = vector.broadcast %62 : vector<4x1xf32> to vector<4x2304xf32>
    %64 = arith.addf %61, %63 : vector<4x2304xf32>
    %c0_62 = arith.constant 0 : index
    %c0_63 = arith.constant 0 : index
    %c0_64 = arith.constant 0 : index
    %65 = vector.load %arg5[%c0_62, %c0_63, %c0_64] : memref<1x4x2304xf32, #tpu.memory_space<vmem>>, vector<1x4x2304xf32>
    %66 = vector.shape_cast %65 : vector<1x4x2304xf32> to vector<4x2304xf32>
    %67 = vector.shape_cast %64 : vector<4x2304xf32> to vector<1x4x2304xf32>
    tpu.vector_store %arg5[%c0_62, %c0_63, %c0_64], %67 {strides = array<i32>} : memref<1x4x2304xf32, #tpu.memory_space<vmem>>, vector<1x4x2304xf32>,
    return
  }
  func.func @transform_0(%arg0: i32) -> (i32, i32, i32) {
    %c0_i32 = arith.constant 0 : i32
    %c0_i32_0 = arith.constant 0 : i32
    %c0_i32_1 = arith.constant 0 : i32
    return %arg0, %c0_i32, %c0_i32_0 : i32, i32, i32
  }
  func.func @transform_1(%arg0: i32) -> (i32, i32, i32) {
    %c0_i32 = arith.constant 0 : i32
    %c0_i32_0 = arith.constant 0 : i32
    %c0_i32_1 = arith.constant 0 : i32
    %c0_i32_2 = arith.constant 0 : i32
    return %c0_i32, %c0_i32_0, %c0_i32_1 : i32, i32, i32
  }
  func.func @transform_2(%arg0: i32) -> (i32, i32) {
    %c0_i32 = arith.constant 0 : i32
    %c0_i32_0 = arith.constant 0 : i32
    %c0_i32_1 = arith.constant 0 : i32
    return %c0_i32, %c0_i32_0 : i32, i32
  }
  func.func @transform_3(%arg0: i32) -> (i32, i32) {
    %c0_i32 = arith.constant 0 : i32
    %c0_i32_0 = arith.constant 0 : i32
    %c0_i32_1 = arith.constant 0 : i32
    return %c0_i32, %c0_i32_0 : i32, i32
  }
  func.func @transform_4(%arg0: i32) -> (i32, i32, i32) {
    %c0_i32 = arith.constant 0 : i32
    %c0_i32_0 = arith.constant 0 : i32
    %c0_i32_1 = arith.constant 0 : i32
    return %arg0, %c0_i32, %c0_i32_0 : i32, i32, i32
  }
}

</mosaic_0001>

<bundles_post_ra>
// kernel: yolo_sem_ppm_forward.3
= control target key start
LH: loop header
LB: loop body
LE: loop exit
PB: predicated region body
PF: predicated region fallthrough
CT: control target
= control target key end

     0   :  { %s401_s9 = smov 0   ;;  %s441_s0 = inlined_call_operand.vmem [shape: f32[2,16,144], index: 0, kind: input, shape index: {}]   ;;  %s442_s1 = inlined_call_operand.vmem [shape: bf16[40,16], index: 1, kind: input, shape index: {}]   ;;  %s443_s2 = inlined_call_operand.vmem [shape: bf16[2,40,144], index: 2, kind: output, shape index: {}]  }
   0x1 LB: > { %s335_s10 = sadd.s32 4294967295, %s383_s9   ;;  %p339_p0 = scmp.ge.s32.totalorder %s383_s9, 1  ;;  %s383_s9 = sphi %s401_s9, %s12_s9  }
   0x2   : > { %p112_p1 = scmp.lt.s32.totalorder %s383_s9, 3 }
   0x4   : > { %p113_p2 = pnand %p339_p0, %p112_p1 }
   0x5   : > { %p134_p3 = scmp.lt.s32.totalorder (!%p113_p2), %s335_s10, 1  ;;  %v385_v0 = vmov (!%p113_p2), 0   ;;  %v374_v7 = vld [vmem:[%s442_s1 + $0x8] sm:$0xff] (!%p113_p2)   ;;  %v375_v8 = vld [vmem:[%s442_s1] sm:$0xff] (!%p113_p2)   ;;  %vm169_vm0 = vcmask (!%p113_p2), 130048   ;;  %vm272_vm1 = vcmask (!%p113_p2), 1043456  }
   0x6   : > { %116 = sbr.rel (%p113_p2) target bundleno = 247 (0xf7), region = 28  ;;  %221 = vmatprep.mubr.bf16.mxu1 (!%p113_p2), %v385_v0  ;;  %211 = vmatprep.mubr.bf16.mxu0 (!%p113_p2), %v385_v0  ;;  %v376_v9 = vld [vmem:[%s442_s1 + $0x10] ss:$0 sps:$4 sm:$0xff] (!%p113_p2)   ;;  %vm273_vm2 = vcmask (!%p113_p2), 130052  }
   0x7   : > { %vm424_vm3 = vmor (!%p113_p2), %vm273_vm2, %vm272_vm1 }
   0xd   : > { %s447_s10 = smov (!%p134_p3, %s335_s10), 1 }
   0xe   : > { %s356_s11 = sshll.u32 %s447_s10, 5  ;;  %s364_s21 = smul.u32 40, %s447_s10 }
   0xf   : > { %s138_s14 = scalar_lea.vmem %s441_s0, %s356_s11 }
  0x10   : > { %v146_v1 = vld [vmem:[%s138_s14 + $0x8] sm:$0xff]  ;;  %v148_v2 = vld [vmem:[%s138_s14 + $0x18] sm:$0xff]  ;;  %v145_v3 = vld [vmem:[%s138_s14] sm:$0xff]  ;;  %s143_s24 = scalar_lea.vmem %s443_s2, %s364_s21 }
  0x11   : > { %v150_v4 = vpack.c.bf16 %v148_v2, %v146_v1  ;;  %v147_v5 = vld [vmem:[%s138_s14 + $0x10] sm:$0xff] }
  0x12   : > { %v149_v6 = vpack.c.bf16 %v147_v5, %v145_v3 }
  0x13   : > { %362 = vmatprep.subr.bf16.mxu1 %v150_v4  ;;  %179 = vmatprep.subr.bf16.mxu0 %v150_v4 }
  0x14   : > { %363 = vmatpush1.bf16.msra.mxu1 %v149_v6  ;;  %180 = vmatpush1.bf16.msra.mxu0 %v149_v6 }
  0x17   : > { %347 = vmatmul.mubr.msk.bf16.vlgmr.msra.gmra.mrb[0].mxu1 %vm169_vm0, %v374_v7  ;;  %346 = vmatmul.mubr.msk.bf16.vlgmr.msra.gmra.mrb[0].mxu0 %vm169_vm0, %v375_v8 }
  0x18   : > { %231 = vmatprep.mubr.bf16.mxu1 %v385_v0 }
  0x1f   : > { %348 = vmatmul.mubr.msk.bf16.gmra.mrb[4].mxu1 %vm169_vm0, %v376_v9 }
  0xea   : > { %v223_v10 = vpop.f32.mrb[0].mxu1  ;;  %v213_v11 = vpop.f32.mrb[0].mxu0 }
  0xeb   : > { %v225_v12 = vpop.f32.mrb[1].mxu1  ;;  %v215_v14 = vpop.f32.mrb[1].mxu0 }
  0xec   : > { %v359_v15 = vpack.c.bf16 %v225_v12, %v223_v10  ;;  %v227_v16 = vpop.f32.mrb[2].mxu1  ;;  %v357_v17 = vpack.c.bf16 %v215_v14, %v213_v11  ;;  %v217_v18 = vpop.f32.mrb[2].mxu0 }
  0xed   : > { %v229_v19 = vpop.f32.mrb[3].mxu1  ;;  %v219_v20 = vpop.f32.mrb[3].mxu0 }
  0xee   : > { %277 = vst.msk [vmem:[%s143_s24 + $0x10] sm:$0xff] %vm424_vm3, %v359_v15  ;;  %v360_v21 = vpack.c.bf16 %v229_v19, %v227_v16  ;;  %275 = vst.msk [vmem:[%s143_s24] sm:$0xff] %vm424_vm3, %v357_v17  ;;  %v358_v22 = vpack.c.bf16 %v219_v20, %v217_v18 }
  0xf0   : > { %278 = vst.msk [vmem:[%s143_s24 + $0x18] sm:$0xff] %vm424_vm3, %v360_v21  ;;  %276 = vst.msk [vmem:[%s143_s24 + $0x8] sm:$0xff] %vm424_vm3, %v358_v22 }
  0xf2   : > { %v233_v23 = vpop.f32.mrb[4].mxu1 }
  0xf3   : > { %v235_v24 = vpop.f32.mrb[5].mxu1 }
  0xf4   : > { %v361_v25 = vpack.c.bf16 %v235_v24, %v233_v23  ;;  %v237_v26 = vpop.f32.mrb[6].mxu1 }
  0xf5   : > { %v238_v27 = vpop.f32.mrb[7].mxu1 }
  0xf6   : > { %279 = vst.msk [vmem:[%s143_s24 + $0x20] sm:$0xff] %vm424_vm3, %v361_v25 }
  0xf7 PF: > { %s12_s9 = sadd.s32 1, %s383_s9  }
  0xf8   : > { %p9_p4 = scmp.ge.s32.totalorder %s12_s9, 4  }
  0xfa   :  { %11 = sbr.rel (!%p9_p4) target bundleno = 1 (0x1), region = 58 }

// kernel: yolo_sem_ppm_forward.4
= control target key start
LH: loop header
LB: loop body
LE: loop exit
PB: predicated region body
PF: predicated region fallthrough
CT: control target
= control target key end

     0   :  { %9 = vsyncpa [#allocation4], 0  ;;  %s3457_s15 = smov 0   ;;  %s3965_s0 = inlined_call_operand.vmem [shape: bf16[2,5,96,12], index: 0, kind: input, shape index: {}]   ;;  %s3966_s1 = inlined_call_operand.vmem [shape: bf16[48,60], index: 1, kind: input, shape index: {}]   ;;  %s3967_s2 = inlined_call_operand.vmem [shape: bf16[5,12,48], index: 2, kind: input, shape index: {}]   ;;  %s3968_s3 = inlined_call_operand.vmem [shape: f32[8], index: 3, kind: input, shape index: {}]   ;;  %s3969_s4 = inlined_call_operand.vmem [shape: bf16[2,8,48,48], index: 4, kind: output, shape index: {}]  }
   0x1 LB: > { %s3463_s16 = sadd.s32 4294967295, %s3427_s15   ;;  %p2514_p0 = scmp.ge.s32.totalorder %s3427_s15, 1  ;;  %s3427_s15 = sphi %s3457_s15, %s15_s15  }
   0x2   : > { %p135_p1 = scmp.lt.s32.totalorder %s3427_s15, 3  ;;  %s154_s19 = sshll.u32 %s3968_s3, 4  ;;  %s155_s19 = int_to_ptr.vmem [resolvable:$true] %s154_s19 }
   0x3   : > { %p3319_p3 = scmp.eq.s32.totalorder %s3463_s16, 0  ;;  %s3402_s21 = scalar_lea.vmem %s155_s19, 16 }
   0x4   : > { %p3470_p2 = pnand %p2514_p0, %p135_p1  ;;  %p3403_p6 = scmp.ne.s32.totalorder %s155_s19, %s3402_s21 }
   0x5   : > { %p3410_p10 = scmp.lt.s32.totalorder %s155_s19, %s155_s19  ;;  %p3411_p11 = scmp.lt.s32.totalorder %s3402_s21, %s3402_s21 }
   0x6   : > { %p3315_p4 = pneg %p3470_p2 }
   0x7   : > { %p3412_p12 = por %p3411_p11, %p3410_p10 }
   0x8   : > { %p3316_p5 = pnand %p3319_p3, %p3315_p4 }
   0xa   : > { %p3404_p7 = pneg %p3316_p5 }
   0xc   : > { %p3405_p8 = pnand %p3404_p7, %p3403_p6 }
   0xe   : > { %p3406_p9 = pneg %p3405_p8 }
  0x10   : > { %p3413_p13 = pnand %p3412_p12, %p3406_p9 }
  0x12   : > { %3416 = shalt.err (!%p3413_p13)
}
  0x13   : > { %s3429_s22 = smov [#allocation3]   ;;  %175 = sbr.rel (%p3470_p2) target bundleno = 619 (0x26b), region = 36 }
  0x14   : > { %3318 = dma.vmem_to_smem (!%p3316_p5), %s155_s19, 16, %s3429_s22, [#allocation4]  }
  0x1a   : > { %3422 = dma.done.wait (%p3319_p3), [#allocation4], 16  }
  0x1b   : > { %3424 = vsyncadd (%p3319_p3), [#allocation4], 4294967280 }
  0x1c   : > { %181 = sfence }
  0x1d   : > { %v3332_v0 = vld [vmem:[%s3967_s2] sm:$0x3f]   ;;  %vm281_vm0 = vcmask 1045504   ;;  %p202_p0 = scmp.lt.s32.totalorder %s3463_s16, 1  ;;  %v3337_v2 = vld [vmem:[%s3967_s2 + $0x8] sm:$0x3f]  }
  0x1e   : > { %3304 = vmatprep.subr.msk.bf16.mxu1 %vm281_vm0, %v3332_v0  ;;  %v283_v1 = vsel %vm281_vm0, %v3332_v0, 0  ;;  %3303 = vmatprep.subr.msk.bf16.mxu0 %vm281_vm0, %v3332_v0  ;;  %v3338_v3 = vld [vmem:[%s3967_s2 + $0x10] sm:$0x3f]   ;;  %vm262_vm1 = vcmask 97280   ;;  %v3347_v4 = vld [vmem:[%s3967_s2 + $0x18] sm:$0x3f]  }
  0x1f   : > { %3302 = vmatpush3.bf16.msra.mxu1 %v283_v1  ;;  %3072 = vmatpush3.bf16.msra.mxu0 %v283_v1  ;;  %s3974_s16 = smov (!%p202_p0, %s3463_s16), 1  ;;  %v536_v7 = vsel %vm281_vm0, %v3337_v2, 0  ;;  %v3349_v8 = vld [vmem:[%s3967_s2 + $0x20] sm:$0x3f]   ;;  %v774_v11 = vsel %vm281_vm0, %v3338_v3, 0  ;;  %v1015_v22 = vsel %vm281_vm0, %v3347_v4, 0 }
  0x20   : > { %3305 = vmatprep.subr.msk.bf16.mxu1 %vm281_vm0, %v3337_v2  ;;  %s3309_s29 = smul.u32 240, %s3974_s16  ;;  %3306 = vmatprep.subr.msk.bf16.mxu0 %vm281_vm0, %v3338_v3  ;;  %v1252_v18 = vsel %vm281_vm0, %v3349_v8, 0  ;;  %v3430_v40 = vmov 0.0   ;;  %vm3431_vm2 = vmmov 0   ;;  %vm379_vm3 = vcmask 388096   ;;  %s2730_s19 = sld [smem:[#allocation3 + $0x1]] }
  0x21   : > { %vm381_vm4 = vcmask 386048   ;;  %vm386_vm5 = vcmask 1041408   ;;  %vm387_vm6 = vcmask 1045508   ;;  %vm636_vm8 = vcmask 388098   ;;  %s1437_s20 = sld [smem:[#allocation3]]  ;;  %s3310_s21 = smul.u32 192, %s3974_s16 }
  0x22   : > { %s3507_s6 = scalar_lea.vmem %s3965_s0, %s3309_s29  ;;  %vm3590_vm7 = vmor %vm386_vm5, %vm387_vm6  ;;  %vm1477_vm9 = vcmask 490496   ;;  %s2770_s16 = sld [smem:[#allocation3 + $0x3]] }
  0x23   : > { %v3333_v5 = vld [vmem:[%s3507_s6 + $0x10] sm:$0xff]   ;;  %v3334_v6 = vld [vmem:[%s3507_s6 + $0x18] sm:$0xff]   ;;  %v3335_v9 = vld [vmem:[%s3507_s6] sm:$0xff]   ;;  %s3864_s24 = scalar_lea.vmem %s3969_s4, %s3310_s21  ;;  %s2750_s25 = sld [smem:[#allocation3 + $0x2]] }
  0x24   : > { %3077 = vmatprep.mubr.msk.bf16.mxu1 %vm262_vm1, %v3333_v5  ;;  %v3336_v10 = vld [vmem:[%s3507_s6 + $0x8] sm:$0xff]   ;;  %3073 = vmatprep.mubr.msk.bf16.mxu0 %vm262_vm1, %v3335_v9  ;;  %v3339_v12 = vld [vmem:[%s3507_s6 + $0x20] sm:$0xff]   ;;  %v3343_v15 = vld [vmem:[%s3507_s6 + $0x30] sm:$0xff]   ;;  %s2810_s26 = sld [smem:[#allocation3 + $0x5]]  ;;  %s2790_s27 = sld [smem:[#allocation3 + $0x4]] }
  0x25   : > { %3078 = vmatmul.mubr.msk.bf16.vlgmr.msra.gmra.mrb[0].mxu1 %vm262_vm1, %v3334_v6  ;;  %3074 = vmatmul.mubr.msk.bf16.vlgmr.msra.gmra.mrb[0].mxu0 %vm262_vm1, %v3336_v10  ;;  %v3341_v13 = vld [vmem:[%s3507_s6 + $0x60] sm:$0xff]   ;;  %v3340_v14 = vld [vmem:[%s3507_s6 + $0x28] sm:$0xff]   ;;  %v3345_v17 = vld [vmem:[%s3507_s6 + $0x70] sm:$0xff]   ;;  %s2850_s28 = sld [smem:[#allocation3 + $0x7]]  ;;  %s2830_s29 = sld [smem:[#allocation3 + $0x6]] }
  0x26   : > { %3086 = vmatpush3.bf16.msra.mxu1 %v536_v7  ;;  %3081 = vmatprep.mubr.msk.bf16.mxu1 %vm262_vm1, %v3339_v12  ;;  %v3342_v16 = vld [vmem:[%s3507_s6 + $0x68] sm:$0xff]   ;;  %v3344_v19 = vld [vmem:[%s3507_s6 + $0x38] sm:$0xff]   ;;  %v3348_v20 = vld [vmem:[%s3507_s6 + $0x40] sm:$0xff]  }
  0x27   : > { %3307 = vmatprep.subr.msk.bf16.mxu1 %vm281_vm0, %v3347_v4  ;;  %3100 = vmatpush3.bf16.msra.mxu0 %v774_v11  ;;  %v3346_v21 = vld [vmem:[%s3507_s6 + $0x78] sm:$0xff]   ;;  %v3351_v23 = vld [vmem:[%s3507_s6 + $0x80] sm:$0xff]   ;;  %v3350_v24 = vld [vmem:[%s3507_s6 + $0x48] sm:$0xff]  }
  0x28   : > { %3308 = vmatprep.subr.msk.bf16.mxu0 %vm281_vm0, %v3349_v8  ;;  %3101 = vmatprep.mubr.msk.bf16.mxu0 %vm262_vm1, %v3341_v13  ;;  %v3353_v25 = vld [vmem:[%s3507_s6 + $0x50] sm:$0xff]   ;;  %v3352_v26 = vld [vmem:[%s3507_s6 + $0x88] sm:$0xff]   ;;  %v3355_v27 = vld [vmem:[%s3507_s6 + $0xc0] sm:$0xff]  }
  0x29   : > { %v3354_v28 = vld [vmem:[%s3507_s6 + $0x58] sm:$0xff]   ;;  %v3357_v29 = vld [vmem:[%s3507_s6 + $0x90] sm:$0xff]   ;;  %v3356_v30 = vld [vmem:[%s3507_s6 + $0xc8] sm:$0xff]  }
  0x2a   : > { %v3359_v31 = vld [vmem:[%s3507_s6 + $0xd0] sm:$0xff]   ;;  %v3358_v32 = vld [vmem:[%s3507_s6 + $0x98] sm:$0xff]   ;;  %v3361_v33 = vld [vmem:[%s3507_s6 + $0xa0] sm:$0xff]  }
  0x2b   : > { %v3360_v34 = vld [vmem:[%s3507_s6 + $0xd8] sm:$0xff]   ;;  %v3365_v35 = vld [vmem:[%s3507_s6 + $0xe0] sm:$0xff]   ;;  %v3362_v36 = vld [vmem:[%s3507_s6 + $0xa8] sm:$0xff]  }
  0x2c   : > { %v3363_v37 = vld [vmem:[%s3507_s6 + $0xb0] sm:$0xff]   ;;  %v3366_v38 = vld [vmem:[%s3507_s6 + $0xe8] sm:$0xff]   ;;  %v3364_v39 = vld [vmem:[%s3507_s6 + $0xb8] sm:$0xff]  }
  0x2d   : > { %3082 = vmatmul.mubr.msk.bf16.gmra.mrb[4].mxu1 %vm262_vm1, %v3340_v14  ;;  %3102 = vmatmul.mubr.msk.bf16.vlgmr.msra.gmra.mrb[4].mxu0 %vm262_vm1, %v3342_v16 }
  0x2e   : > { %3087 = vmatprep.mubr.msk.bf16.mxu1 %vm262_vm1, %v3343_v15  ;;  %3105 = vmatprep.mubr.msk.bf16.mxu0 %vm262_vm1, %v3345_v17 }
  0x2f   : > { %3128 = vmatpush3.bf16.msra.mxu0 %v1252_v18 }
  0x30   : > { %3161 = vmatprep.subr.bf16.mxu0 %v3430_v40 }
  0x35   : > { %3088 = vmatmul.mubr.msk.bf16.vlgmr.msra.gmra.mrb[8].mxu1 %vm262_vm1, %v3344_v19  ;;  %3106 = vmatmul.mubr.msk.bf16.gmra.mrb[8].mxu0 %vm262_vm1, %v3346_v21 }
  0x36   : > { %3114 = vmatpush3.bf16.msra.mxu1 %v1015_v22  ;;  %3091 = vmatprep.mubr.msk.bf16.mxu1 %vm262_vm1, %v3348_v20 }
  0x37   : > { %3109 = vmatprep.mubr.msk.bf16.mxu0 %vm262_vm1, %v3351_v23  ;;  %3141 = vmatprep.subr.bf16.mxu1 %v3430_v40 }
  0x3d   : > { %3092 = vmatmul.mubr.msk.bf16.gmra.mrb[12].mxu1 %vm262_vm1, %v3350_v24  ;;  %3110 = vmatmul.mubr.msk.bf16.gmra.mrb[12].mxu0 %vm262_vm1, %v3352_v26 }
  0x3e   : > { %3095 = vmatprep.mubr.msk.bf16.mxu1 %vm262_vm1, %v3353_v25  ;;  %3129 = vmatprep.mubr.msk.bf16.mxu0 %vm262_vm1, %v3355_v27 }
  0x45   : > { %3096 = vmatmul.mubr.msk.bf16.gmra.mrb[16].mxu1 %vm262_vm1, %v3354_v28  ;;  %3130 = vmatmul.mubr.msk.bf16.vlgmr.msra.gmra.mrb[16].mxu0 %vm262_vm1, %v3356_v30 }
  0x46   : > { %3115 = vmatprep.mubr.msk.bf16.mxu1 %vm262_vm1, %v3357_v29  ;;  %3133 = vmatprep.mubr.msk.bf16.mxu0 %vm262_vm1, %v3359_v31 }
  0x4d   : > { %3116 = vmatmul.mubr.msk.bf16.vlgmr.msra.gmra.mrb[20].mxu1 %vm262_vm1, %v3358_v32  ;;  %3134 = vmatmul.mubr.msk.bf16.gmra.mrb[20].mxu0 %vm262_vm1, %v3360_v34 }
  0x4e   : > { %3119 = vmatprep.mubr.msk.bf16.mxu1 %vm262_vm1, %v3361_v33  ;;  %3137 = vmatprep.mubr.msk.bf16.mxu0 %vm262_vm1, %v3365_v35 }
  0x55   : > { %3120 = vmatmul.mubr.msk.bf16.gmra.mrb[24].mxu1 %vm262_vm1, %v3362_v36  ;;  %3138 = vmatmul.mubr.msk.bf16.gmra.mrb[24].mxu0 %vm262_vm1, %v3366_v38 }
  0x56   : > { %3123 = vmatprep.mubr.msk.bf16.mxu1 %vm262_vm1, %v3363_v37  ;;  %3169 = vmatprep.mubr.msk.bf16.mxu0 %vm3431_vm2, %v3430_v40 }
  0x5d   : > { %3124 = vmatmul.mubr.msk.bf16.gmra.mrb[28].mxu1 %vm262_vm1, %v3364_v39 }
  0x5e   : > { %3149 = vmatprep.mubr.msk.bf16.mxu1 %vm3431_vm2, %v3430_v40 }
  0xf8   : > { %v3079_v41 = vpop.f32.mrb[0].mxu1  ;;  %v3075_v46 = vpop.f32.mrb[0].mxu0 }
  0xf9   : > { %v2878_v42 = vpack.c.bf16 %v3079_v41, %v3079_v41  ;;  %v335_v43 = vpop.f32.mrb[1].mxu1  ;;  %v2874_v49 = vpack.c.bf16 %v3075_v46, %v3075_v46  ;;  %v319_v50 = vpop.f32.mrb[1].mxu0 }
  0xfa   : > { %v2876_v44 = vpack.c.bf16 %v335_v43, %v335_v43  ;;  %v3080_v45 = vpop.f32.mrb[2].mxu1  ;;  %v2872_v52 = vpack.c.bf16 %v319_v50, %v319_v50  ;;  %v3076_v53 = vpop.f32.mrb[2].mxu0 }
  0xfb   : > { %429 = vst.msk [vmem:[#allocation2 + $0x80] sm:$0xf] %vm379_vm3, %v2878_v42  ;;  %v2879_v47 = vpack.c.bf16 %v3080_v45, %v3080_v45  ;;  %v338_v48 = vpop.f32.mrb[3].mxu1  ;;  %v391_v55 = vrot.slane %v2874_v49, 6  ;;  %v2875_v56 = vpack.c.bf16 %v3076_v53, %v3076_v53  ;;  %v322_v57 = vpop.f32.mrb[3].mxu0 }
  0xfc   : > { %408 = vst.msk [vmem:[#allocation2 + $0x44] sm:$0x3] %vm381_vm4, %v2876_v44  ;;  %v2877_v51 = vpack.c.bf16 %v338_v48, %v338_v48  ;;  %v2541_v58 = vrot.slane %v2876_v44, 10  ;;  %v2873_v60 = vpack.c.bf16 %v322_v57, %v322_v57 }
  0xfd   : > { %430 = vst.msk [vmem:[#allocation2 + $0x84] sm:$0x3] %vm381_vm4, %v2879_v47  ;;  %v393_v61 = vrot.slane %v391_v55, 4  ;;  %v2545_v12 = vrot.slane %v2879_v47, 10 }
  0xfe   : > { %v413_v59 = vrot.slane %v2877_v51, 6  ;;  %380 = vst.msk [vmem:[#allocation2] sm:$0xf] %vm379_vm3, %v2872_v52  ;;  %407 = vst.msk [vmem:[#allocation2 + $0x40] sm:$0xf] %vm379_vm3, %v2875_v56  ;;  %v2537_v1 = vrot.slane %v2873_v60, 10 }
  0xff   : > { %382 = vst.msk [vmem:[#allocation2 + $0x4] sm:$0x3] %vm381_vm4, %v2873_v60  ;;  %398 = vst.msk [vmem:[#allocation2 + $0x24] sm:$0x3] %vm381_vm4, %v393_v61 }
 0x100   : > { %v414_v62 = vsel %vm3590_vm7, %v2541_v58, %v413_v59  ;;  %v415_v63 = vrot.slane %v413_v59, 4  ;;  %v3083_v0 = vpop.f32.mrb[4].mxu1  ;;  %v392_v4 = vsel %vm3590_vm7, %v2537_v1, %v391_v55  ;;  %v3103_v7 = vpop.f32.mrb[4].mxu0 }
 0x101   : > { %419 = vst.msk [vmem:[#allocation2 + $0x60] sm:$0xf] %vm379_vm3, %v414_v62  ;;  %v2882_v2 = vpack.c.bf16 %v3083_v0, %v3083_v0  ;;  %v351_v3 = vpop.f32.mrb[5].mxu1  ;;  %397 = vst.msk [vmem:[#allocation2 + $0x20] sm:$0xf] %vm379_vm3, %v392_v4  ;;  %v2898_v9 = vpack.c.bf16 %v3103_v7, %v3103_v7  ;;  %v810_v11 = vpop.f32.mrb[5].mxu0 }
 0x102   : > { %420 = vst.msk [vmem:[#allocation2 + $0x64] sm:$0x3] %vm381_vm4, %v415_v63  ;;  %v2880_v5 = vpack.c.bf16 %v351_v3, %v351_v3  ;;  %v3084_v6 = vpop.f32.mrb[6].mxu1  ;;  %v2896_v15 = vpack.c.bf16 %v810_v11, %v810_v11  ;;  %v3104_v16 = vpop.f32.mrb[6].mxu0 }
 0x103   : > { %453 = vst.msk [vmem:[#allocation2 + $0xc4] sm:$0x3] %vm381_vm4, %v2882_v2  ;;  %v2883_v8 = vpack.c.bf16 %v3084_v6, %v3084_v6  ;;  %v354_v10 = vpop.f32.mrb[7].mxu1  ;;  %v2549_v17 = vrot.slane %v2882_v2, 10  ;;  %v877_v19 = vrot.slane %v2898_v9, 6  ;;  %v2899_v20 = vpack.c.bf16 %v3104_v16, %v3104_v16  ;;  %v813_v21 = vpop.f32.mrb[7].mxu0 }
 0x104   : > { %v436_v13 = vrot.slane %v2880_v5, 6  ;;  %v2881_v14 = vpack.c.bf16 %v354_v10, %v354_v10  ;;  %870 = vst.msk [vmem:[#allocation2 + $0xc] sm:$0xf] %vm379_vm3, %v2896_v15  ;;  %v2897_v24 = vpack.c.bf16 %v813_v21, %v813_v21 }
 0x105   : > { %v458_v18 = vrot.slane %v2883_v8, 6  ;;  %v879_v27 = vrot.slane %v877_v19, 4  ;;  %891 = vst.msk [vmem:[#allocation2 + $0x4c] sm:$0xf] %vm379_vm3, %v2899_v20 }
 0x106   : > { %v437_v22 = vsel %vm3590_vm7, %v2545_v12, %v436_v13  ;;  %v438_v23 = vrot.slane %v436_v13, 4  ;;  %452 = vst.msk [vmem:[#allocation2 + $0xc0] sm:$0xf] %vm379_vm3, %v2881_v14  ;;  %v2619_v28 = vrot.slane %v2897_v24, 10 }
 0x107   : > { %442 = vst.msk [vmem:[#allocation2 + $0xa0] sm:$0xf] %vm379_vm3, %v437_v22  ;;  %v459_v25 = vsel %vm3590_vm7, %v2549_v17, %v458_v18  ;;  %v460_v26 = vrot.slane %v458_v18, 4 }
 0x108   : > { %443 = vst.msk [vmem:[#allocation2 + $0xa4] sm:$0x3] %vm381_vm4, %v438_v23  ;;  %871 = vst.msk [vmem:[#allocation2 + $0x10] sm:$0x3] %vm381_vm4, %v2897_v24  ;;  %v3089_v29 = vpop.f32.mrb[8].mxu1  ;;  %v878_v32 = vsel %vm3590_vm7, %v2619_v28, %v877_v19  ;;  %v3107_v35 = vpop.f32.mrb[8].mxu0 }
 0x109   : > { %464 = vst.msk [vmem:[#allocation2 + $0xe0] sm:$0xf] %vm379_vm3, %v459_v25  ;;  %v2886_v30 = vpack.c.bf16 %v3089_v29, %v3089_v29  ;;  %v572_v31 = vpop.f32.mrb[9].mxu1  ;;  %882 = vst.msk [vmem:[#allocation2 + $0x2c] sm:$0xf] %vm379_vm3, %v878_v32  ;;  %v2902_v38 = vpack.c.bf16 %v3107_v35, %v3107_v35  ;;  %v826_v39 = vpop.f32.mrb[9].mxu0 }
 0x10a   : > { %465 = vst.msk [vmem:[#allocation2 + $0xe4] sm:$0x3] %vm381_vm4, %v460_v26  ;;  %883 = vst.msk [vmem:[#allocation2 + $0x30] sm:$0x3] %vm381_vm4, %v879_v27  ;;  %v2884_v33 = vpack.c.bf16 %v572_v31, %v572_v31  ;;  %v3090_v34 = vpop.f32.mrb[10].mxu1  ;;  %v2900_v43 = vpack.c.bf16 %v826_v39, %v826_v39  ;;  %v3108_v44 = vpop.f32.mrb[10].mxu0 }
 0x10b   : > { %645 = vst.msk [vmem:[#allocation2 + $0x28] sm:$0xf] %vm379_vm3, %v2886_v30  ;;  %v2887_v36 = vpack.c.bf16 %v3090_v34, %v3090_v34  ;;  %v575_v37 = vpop.f32.mrb[11].mxu1  ;;  %911 = vst.msk [vmem:[#allocation2 + $0x8c] sm:$0xf] %vm379_vm3, %v2902_v38  ;;  %v2903_v46 = vpack.c.bf16 %v3108_v44, %v3108_v44  ;;  %v829_v47 = vpop.f32.mrb[11].mxu0 }
 0x10c   : > { %v630_v41 = vrot.slane %v2884_v33, 6  ;;  %v2885_v42 = vpack.c.bf16 %v575_v37, %v575_v37  ;;  %892 = vst.msk [vmem:[#allocation2 + $0x50] sm:$0x3] %vm381_vm4, %v2900_v43  ;;  %v2623_v50 = vrot.slane %v2900_v43, 10  ;;  %v2901_v51 = vpack.c.bf16 %v829_v47, %v829_v47 }
 0x10d   : > { %v651_v45 = vrot.slane %v2887_v36, 6  ;;  %912 = vst.msk [vmem:[#allocation2 + $0x90] sm:$0x3] %vm381_vm4, %v2903_v46  ;;  %v2627_v5 = vrot.slane %v2903_v46, 10 }
 0x10e   : > { %v631_v48 = vrot.slane %v630_v41, 4  ;;  %637 = vst.msk [vmem:[#allocation2 + $0x4] sm:$0xc] %vm636_vm8, %v630_v41  ;;  %v632_v49 = vrot.slane %v2885_v42, 6  ;;  %644 = vst.msk [vmem:[#allocation2 + $0x24] sm:$0xc] %vm636_vm8, %v2885_v42 }
 0x10f   : > { %657 = vst.msk [vmem:[#allocation2 + $0x44] sm:$0xc] %vm636_vm8, %v651_v45  ;;  %v897_v55 = vrot.slane %v2901_v51, 6  ;;  %v652_v63 = vrot.slane %v651_v45, 4 }
 0x110   : > { %v633_v52 = vsel %vm3590_vm7, %v631_v48, %v632_v49  ;;  %v3093_v53 = vpop.f32.mrb[12].mxu1  ;;  %v3111_v62 = vpop.f32.mrb[12].mxu0 }
 0x111   : > { %638 = vst.msk [vmem:[#allocation2 + $0x8] sm:$0xf] %vm379_vm3, %v633_v52  ;;  %v2890_v56 = vpack.c.bf16 %v3093_v53, %v3093_v53  ;;  %v588_v57 = vpop.f32.mrb[13].mxu1  ;;  %v898_v58 = vsel %vm3590_vm7, %v2623_v50, %v897_v55  ;;  %v899_v59 = vrot.slane %v897_v55, 4  ;;  %v2906_v3 = vpack.c.bf16 %v3111_v62, %v3111_v62  ;;  %v842_v4 = vpop.f32.mrb[13].mxu0 }
 0x112   : > { %v2888_v60 = vpack.c.bf16 %v588_v57, %v588_v57  ;;  %v3094_v61 = vpop.f32.mrb[14].mxu1  ;;  %902 = vst.msk [vmem:[#allocation2 + $0x6c] sm:$0xf] %vm379_vm3, %v898_v58  ;;  %v2904_v8 = vpack.c.bf16 %v842_v4, %v842_v4  ;;  %v3112_v9 = vpop.f32.mrb[14].mxu0  ;;  %v3370_v32 = vld [vmem:[#allocation2 + $0x28] sm:$0xff]  }
 0x113   : > { %v670_v0 = vrot.slane %v2890_v56, 6  ;;  %v2891_v1 = vpack.c.bf16 %v3094_v61, %v3094_v61  ;;  %v591_v2 = vpop.f32.mrb[15].mxu1  ;;  %903 = vst.msk [vmem:[#allocation2 + $0x70] sm:$0x3] %vm381_vm4, %v899_v59  ;;  %933 = vst.msk [vmem:[#allocation2 + $0xd0] sm:$0x3] %vm381_vm4, %v2906_v3  ;;  %v2907_v13 = vpack.c.bf16 %v3112_v9, %v3112_v9 }
 0x114   : > { %v653_v6 = vrot.slane %v2888_v60, 6  ;;  %663 = vst.msk [vmem:[#allocation2 + $0x64] sm:$0xc] %vm636_vm8, %v2888_v60  ;;  %v2889_v7 = vpack.c.bf16 %v591_v2, %v591_v2  ;;  %v2631_v12 = vrot.slane %v2906_v3, 10  ;;  %v918_v16 = vrot.slane %v2904_v8, 6  ;;  %v845_v18 = vpop.f32.mrb[15].mxu0 }
 0x115   : > { %v671_v10 = vrot.slane %v670_v0, 4  ;;  %676 = vst.msk [vmem:[#allocation2 + $0x84] sm:$0xc] %vm636_vm8, %v670_v0  ;;  %v672_v11 = vrot.slane %v2891_v1, 6  ;;  %683 = vst.msk [vmem:[#allocation2 + $0xa4] sm:$0xc] %vm636_vm8, %v2891_v1  ;;  %v2905_v21 = vpack.c.bf16 %v845_v18, %v845_v18 }
 0x116   : > { %v3367_v14 = vld [vmem:[#allocation2] sm:$0xff]   ;;  %v654_v15 = vsel %vm3590_vm7, %v652_v63, %v653_v6  ;;  %664 = vst.msk [vmem:[#allocation2 + $0x68] sm:$0xf] %vm379_vm3, %v2889_v7  ;;  %v938_v20 = vrot.slane %v2907_v13, 6  ;;  %v919_v22 = vsel %vm3590_vm7, %v2627_v5, %v918_v16  ;;  %v920_v23 = vrot.slane %v918_v16, 4 }
 0x117   : > { %v3368_v17 = vld [vmem:[#allocation2 + $0x20] sm:$0xff]   ;;  %658 = vst.msk [vmem:[#allocation2 + $0x48] sm:$0xf] %vm379_vm3, %v654_v15  ;;  %v673_v19 = vsel %vm3590_vm7, %v671_v10, %v672_v11  ;;  %3142 = vmatpush3.bf16.msra.mxu1 %v3367_v14  ;;  %923 = vst.msk [vmem:[#allocation2 + $0xac] sm:$0xf] %vm379_vm3, %v919_v22 }
 0x118   : > { %677 = vst.msk [vmem:[#allocation2 + $0x88] sm:$0xf] %vm379_vm3, %v673_v19  ;;  %v3097_v24 = vpop.f32.mrb[16].mxu1  ;;  %3162 = vmatpush3.bf16.msra.mxu0 %v3368_v17  ;;  %3143 = vmatprep.subr.bf16.mxu1 %v3430_v40  ;;  %v3369_v25 = vld [vmem:[#allocation2 + $0x8] sm:$0xff]   ;;  %v939_v26 = vsel %vm3590_vm7, %v2631_v12, %v938_v20  ;;  %v940_v27 = vrot.slane %v938_v20, 4  ;;  %v3131_v33 = vpop.f32.mrb[16].mxu0 }
 0x119   : > { %v2894_v28 = vpack.c.bf16 %v3097_v24, %v3097_v24  ;;  %v604_v29 = vpop.f32.mrb[17].mxu1  ;;  %3163 = vmatprep.subr.bf16.mxu0 %v3430_v40  ;;  %932 = vst.msk [vmem:[#allocation2 + $0xcc] sm:$0xf] %vm379_vm3, %v2905_v21  ;;  %943 = vst.msk [vmem:[#allocation2 + $0xec] sm:$0xf] %vm379_vm3, %v939_v26  ;;  %v2922_v36 = vpack.c.bf16 %v3131_v33, %v3131_v33  ;;  %v1288_v37 = vpop.f32.mrb[17].mxu0 }
 0x11a   : > { %924 = vst.msk [vmem:[#allocation2 + $0xb0] sm:$0x3] %vm381_vm4, %v920_v23  ;;  %v2892_v30 = vpack.c.bf16 %v604_v29, %v604_v29  ;;  %v3098_v31 = vpop.f32.mrb[18].mxu1  ;;  %944 = vst.msk [vmem:[#allocation2 + $0xf0] sm:$0x3] %vm381_vm4, %v940_v27  ;;  %v2920_v39 = vpack.c.bf16 %v1288_v37, %v1288_v37  ;;  %v3132_v41 = vpop.f32.mrb[18].mxu0 }
 0x11b   : > { %702 = vst.msk [vmem:[#allocation2 + $0xe4] sm:$0xc] %vm636_vm8, %v2894_v28  ;;  %v2895_v34 = vpack.c.bf16 %v3098_v31, %v3098_v31  ;;  %v607_v35 = vpop.f32.mrb[19].mxu1  ;;  %3144 = vmatpush3.bf16.msra.mxu1 %v3369_v25  ;;  %v1355_v42 = vrot.slane %v2922_v36, 6  ;;  %v2923_v43 = vpack.c.bf16 %v3132_v41, %v3132_v41  ;;  %v1291_v44 = vpop.f32.mrb[19].mxu0  ;;  %v692_v48 = vrot.slane %v2894_v28, 6 }
 0x11c   : > { %684 = vst.msk [vmem:[#allocation2 + $0xa8] sm:$0xf] %vm379_vm3, %v2892_v30  ;;  %v2893_v38 = vpack.c.bf16 %v607_v35, %v607_v35  ;;  %3164 = vmatpush3.bf16.msra.mxu0 %v3370_v32  ;;  %3145 = vmatprep.subr.bf16.mxu1 %v3430_v40  ;;  %1348 = vst.msk [vmem:[#allocation2 + $0x18] sm:$0xf] %vm379_vm3, %v2920_v39  ;;  %v2921_v46 = vpack.c.bf16 %v1291_v44, %v1291_v44 }
 0x11d   : > { %703 = vst.msk [vmem:[#allocation2 + $0xe8] sm:$0xf] %vm379_vm3, %v2895_v34  ;;  %3165 = vmatprep.subr.bf16.mxu0 %v3430_v40  ;;  %v1357_v47 = vrot.slane %v1355_v42, 4  ;;  %1369 = vst.msk [vmem:[#allocation2 + $0x58] sm:$0xf] %vm379_vm3, %v2923_v43 }
 0x11e   : > { %v690_v45 = vrot.slane %v2893_v38, 6  ;;  %1349 = vst.msk [vmem:[#allocation2 + $0x1c] sm:$0x3] %vm381_vm4, %v2921_v46  ;;  %v2701_v51 = vrot.slane %v2921_v46, 10 }
 0x11f   : > { %1361 = vst.msk [vmem:[#allocation2 + $0x3c] sm:$0x3] %vm381_vm4, %v1357_v47 }
 0x120   : > { %v691_v49 = vrot.slane %v690_v45, 4  ;;  %696 = vst.msk [vmem:[#allocation2 + $0xc4] sm:$0xc] %vm636_vm8, %v690_v45  ;;  %v3117_v50 = vpop.f32.mrb[20].mxu1  ;;  %v1356_v58 = vsel %vm3590_vm7, %v2701_v51, %v1355_v42  ;;  %v3135_v59 = vpop.f32.mrb[20].mxu0 }
 0x121   : > { %v2910_v52 = vpack.c.bf16 %v3117_v50, %v3117_v50  ;;  %v1051_v53 = vpop.f32.mrb[21].mxu1  ;;  %1360 = vst.msk [vmem:[#allocation2 + $0x38] sm:$0xf] %vm379_vm3, %v1356_v58  ;;  %v2926_v62 = vpack.c.bf16 %v3135_v59, %v3135_v59  ;;  %v1304_v63 = vpop.f32.mrb[21].mxu0 }
 0x122   : > { %v693_v55 = vsel %vm3590_vm7, %v691_v49, %v692_v48  ;;  %v2908_v56 = vpack.c.bf16 %v1051_v53, %v1051_v53  ;;  %v3118_v57 = vpop.f32.mrb[22].mxu1  ;;  %v2924_v2 = vpack.c.bf16 %v1304_v63, %v1304_v63  ;;  %v3136_v3 = vpop.f32.mrb[22].mxu0  ;;  %v3376_v63 = vld [vmem:[#allocation2 + $0x60] sm:$0xff]  }
 0x123   : > { %697 = vst.msk [vmem:[#allocation2 + $0xc8] sm:$0xf] %vm379_vm3, %v693_v55  ;;  %1123 = vst.msk [vmem:[#allocation2 + $0x34] sm:$0xf] %vm379_vm3, %v2910_v52  ;;  %v2911_v60 = vpack.c.bf16 %v3118_v57, %v3118_v57  ;;  %v1054_v61 = vpop.f32.mrb[23].mxu1  ;;  %v3676_v5 = vpack.c.bf16 %v3136_v3, %v3136_v3  ;;  %v1307_v6 = vpop.f32.mrb[23].mxu0 }
 0x124   : > { %v1109_v0 = vrot.slane %v2908_v56, 6  ;;  %v2909_v1 = vpack.c.bf16 %v1054_v61, %v1054_v61  ;;  %1389 = vst.msk [vmem:[#allocation2 + $0x98] sm:$0xf] %vm379_vm3, %v2926_v62  ;;  %v2705_v9 = vrot.slane %v2924_v2, 10  ;;  %v2925_v10 = vpack.c.bf16 %v1307_v6, %v1307_v6  ;;  %v3710_v55 = vld [vmem:[%s3966_s1] sm:$0xff]   ;;  %v3739_v6 = vld [vmem:[%s3966_s1 + $0x8] sm:$0xff]  }
 0x125   : > { %v1129_v4 = vrot.slane %v2911_v60, 6  ;;  %1370 = vst.msk [vmem:[#allocation2 + $0x5c] sm:$0x3] %vm381_vm4, %v2924_v2  ;;  %1390 = vst.msk [vmem:[#allocation2 + $0x9c] sm:$0x3] %vm381_vm4, %v3676_v5  ;;  %v2709_v33 = vrot.slane %v3676_v5, 10 }
 0x126   : > { %v1110_v7 = vrot.slane %v1109_v0, 4  ;;  %1115 = vst.msk [vmem:[#allocation2 + $0x10] sm:$0xc] %vm636_vm8, %v1109_v0  ;;  %v1111_v8 = vrot.slane %v2909_v1, 6  ;;  %1122 = vst.msk [vmem:[#allocation2 + $0x30] sm:$0xc] %vm636_vm8, %v2909_v1 }
 0x127   : > { %1135 = vst.msk [vmem:[#allocation2 + $0x50] sm:$0xc] %vm636_vm8, %v1129_v4  ;;  %v1375_v13 = vrot.slane %v2925_v10, 6  ;;  %v1130_v20 = vrot.slane %v1129_v4, 4  ;;  %v3374_v49 = vld [vmem:[#allocation2 + $0x18] sm:$0x3f]  }
 0x128   : > { %v1112_v11 = vsel %vm3590_vm7, %v1110_v7, %v1111_v8  ;;  %v3121_v12 = vpop.f32.mrb[24].mxu1  ;;  %v3373_v24 = vld [vmem:[#allocation2 + $0x38] sm:$0x3f]   ;;  %v3139_v25 = vpop.f32.mrb[24].mxu0  ;;  %v1488_v62 = vsel %vm281_vm0, %v3374_v49, 0  ;;  %v3377_v3 = vld [vmem:[#allocation2 + $0x40] sm:$0xff]  }
 0x129   : > { %1116 = vst.msk [vmem:[#allocation2 + $0x14] sm:$0xf] %vm379_vm3, %v1112_v11  ;;  %v2914_v14 = vpack.c.bf16 %v3121_v12, %v3121_v12  ;;  %v1067_v15 = vpop.f32.mrb[25].mxu1  ;;  %v1376_v18 = vsel %vm3590_vm7, %v2705_v9, %v1375_v13  ;;  %v1377_v19 = vrot.slane %v1375_v13, 4  ;;  %v2930_v28 = vpack.c.bf16 %v3139_v25, %v3139_v25  ;;  %v1320_v29 = vpop.f32.mrb[25].mxu0  ;;  %v3378_v4 = vld [vmem:[#allocation2 + $0x68] sm:$0xff]  }
 0x12a   : > { %v2912_v16 = vpack.c.bf16 %v1067_v15, %v1067_v15  ;;  %v3122_v17 = vpop.f32.mrb[26].mxu1  ;;  %1380 = vst.msk [vmem:[#allocation2 + $0x78] sm:$0xf] %vm379_vm3, %v1376_v18  ;;  %v2928_v34 = vpack.c.bf16 %v1320_v29, %v1320_v29  ;;  %v1611_v36 = vsel %vm281_vm0, %v3373_v24, 0  ;;  %v3140_v37 = vpop.f32.mrb[26].mxu0  ;;  %v3380_v7 = vld [vmem:[#allocation2 + $0x48] sm:$0xff]  }
 0x12b   : > { %v1148_v21 = vrot.slane %v2914_v14, 6  ;;  %v2915_v22 = vpack.c.bf16 %v3122_v17, %v3122_v17  ;;  %v1070_v23 = vpop.f32.mrb[27].mxu1  ;;  %1381 = vst.msk [vmem:[#allocation2 + $0x7c] sm:$0x3] %vm381_vm4, %v1377_v19  ;;  %1411 = vst.msk [vmem:[#allocation2 + $0xdc] sm:$0x3] %vm381_vm4, %v2930_v28  ;;  %v2931_v42 = vpack.c.bf16 %v3140_v37, %v3140_v37 }
 0x12c   : > { %v1131_v26 = vrot.slane %v2912_v16, 6  ;;  %1141 = vst.msk [vmem:[#allocation2 + $0x70] sm:$0xc] %vm636_vm8, %v2912_v16  ;;  %v2913_v27 = vpack.c.bf16 %v1070_v23, %v1070_v23  ;;  %v2713_v39 = vrot.slane %v2930_v28, 10  ;;  %v1396_v41 = vrot.slane %v2928_v34, 6  ;;  %v1323_v43 = vpop.f32.mrb[27].mxu0 }
 0x12d   : > { %v1149_v30 = vrot.slane %v1148_v21, 4  ;;  %1154 = vst.msk [vmem:[#allocation2 + $0x90] sm:$0xc] %vm636_vm8, %v1148_v21  ;;  %v1150_v31 = vrot.slane %v2915_v22, 6  ;;  %1161 = vst.msk [vmem:[#allocation2 + $0xb0] sm:$0xc] %vm636_vm8, %v2915_v22  ;;  %v2929_v46 = vpack.c.bf16 %v1323_v43, %v1323_v43  ;;  %v1586_v34 = vstv %s2730_s19 }
 0x12e   : > { %v3371_v32 = vld [vmem:[#allocation2 + $0x30] sm:$0xff]   ;;  %v1132_v35 = vsel %vm3590_vm7, %v1130_v20, %v1131_v26  ;;  %1142 = vst.msk [vmem:[#allocation2 + $0x74] sm:$0xf] %vm379_vm3, %v2913_v27  ;;  %v1397_v50 = vsel %vm3590_vm7, %v2709_v33, %v1396_v41  ;;  %v1398_v51 = vrot.slane %v1396_v41, 4  ;;  %v1416_v56 = vrot.slane %v2931_v42, 6  ;;  %v3386_v14 = vld [vmem:[#allocation2 + $0xa0] sm:$0xff]  }
 0x12f   : > { %1136 = vst.msk [vmem:[#allocation2 + $0x54] sm:$0xf] %vm379_vm3, %v1132_v35  ;;  %v1151_v38 = vsel %vm3590_vm7, %v1149_v30, %v1150_v31  ;;  %3166 = vmatpush3.bf16.msra.mxu0 %v3371_v32  ;;  %1401 = vst.msk [vmem:[#allocation2 + $0xb8] sm:$0xf] %vm379_vm3, %v1397_v50  ;;  %v3384_v11 = vld [vmem:[#allocation2 + $0x58] sm:$0x3f]  }
 0x130   : > { %1155 = vst.msk [vmem:[#allocation2 + $0x94] sm:$0xf] %vm379_vm3, %v1151_v38  ;;  %v3125_v44 = vpop.f32.mrb[28].mxu1  ;;  %v3372_v45 = vld [vmem:[#allocation2 + $0x10] sm:$0xff]   ;;  %3167 = vmatprep.subr.bf16.mxu0 %v3430_v40  ;;  %1410 = vst.msk [vmem:[#allocation2 + $0xd8] sm:$0xf] %vm379_vm3, %v2929_v46  ;;  %v1417_v60 = vsel %vm3590_vm7, %v2713_v39, %v1416_v56 }
 0x131   : > { %v2918_v47 = vpack.c.bf16 %v3125_v44, %v3125_v44  ;;  %v1083_v48 = vpop.f32.mrb[29].mxu1  ;;  %3146 = vmatpush3.bf16.msra.mxu1 %v3372_v45  ;;  %1402 = vst.msk [vmem:[#allocation2 + $0xbc] sm:$0x3] %vm381_vm4, %v1398_v51  ;;  %v1418_v61 = vrot.slane %v1416_v56, 4  ;;  %v3758_v12 = vld [vmem:[%s3966_s1 + $0x10] sm:$0xff]   ;;  %v1735_v13 = vsel %vm281_vm0, %v3384_v11, 0 }
 0x132   : > { %v2916_v52 = vpack.c.bf16 %v1083_v48, %v1083_v48  ;;  %v3126_v53 = vpop.f32.mrb[30].mxu1  ;;  %3147 = vmatprep.subr.bf16.mxu1 %v3430_v40  ;;  %1421 = vst.msk [vmem:[#allocation2 + $0xf8] sm:$0xf] %vm379_vm3, %v1417_v60  ;;  %v3385_v8 = vld [vmem:[#allocation2 + $0x78] sm:$0x3f]   ;;  %v3387_v15 = vld [vmem:[#allocation2 + $0x80] sm:$0xff]  }
 0x133   : > { %1180 = vst.msk [vmem:[#allocation2 + $0xf0] sm:$0xc] %vm636_vm8, %v2918_v47  ;;  %v2919_v57 = vpack.c.bf16 %v3126_v53, %v3126_v53  ;;  %v1086_v58 = vpop.f32.mrb[31].mxu1  ;;  %3168 = vmatpush3.bf16.msra.mxu0 %v1611_v36  ;;  %v1170_v0 = vrot.slane %v2918_v47, 6  ;;  %v1859_v10 = vsel %vm281_vm0, %v3385_v8, 0  ;;  %v3388_v16 = vld [vmem:[#allocation2 + $0xa8] sm:$0xff]   ;;  %v1438_v36 = vstv %s1437_s20 }
 0x134   : > { %1162 = vst.msk [vmem:[#allocation2 + $0xb4] sm:$0xf] %vm379_vm3, %v2916_v52  ;;  %v2917_v59 = vpack.c.bf16 %v1086_v58, %v1086_v58  ;;  %3201 = vmatprep.subr.bf16.mxu0 %v3430_v40  ;;  %v3389_v17 = vld [vmem:[#allocation2 + $0x88] sm:$0xff]   ;;  %v3393_v21 = vld [vmem:[#allocation2 + $0x98] sm:$0x3f]   ;;  %v3394_v24 = vld [vmem:[#allocation2 + $0xe0] sm:$0xff]  }
 0x135   : > { %1181 = vst.msk [vmem:[#allocation2 + $0xf4] sm:$0xf] %vm379_vm3, %v2919_v57  ;;  %3148 = vmatpush3.bf16.msra.mxu1 %v1488_v62  ;;  %v3381_v54 = vld [vmem:[#allocation2 + $0x70] sm:$0xff]   ;;  %v1983_v23 = vsel %vm281_vm0, %v3393_v21, 0  ;;  %v3395_v25 = vld [vmem:[#allocation2 + $0xc0] sm:$0xff]   ;;  %v3396_v26 = vld [vmem:[#allocation2 + $0xe8] sm:$0xff]  }
 0x136   : > { %v1168_v1 = vrot.slane %v2917_v59, 6  ;;  %3170 = vmatmul.mubr.msk.bf16.vlgmr.msra.gmra.mrb[28].mxu0 %vm1477_vm9, %v3710_v55  ;;  %1422 = vst.msk [vmem:[#allocation2 + $0xfc] sm:$0x3] %vm381_vm4, %v1418_v61  ;;  %3181 = vmatprep.subr.bf16.mxu1 %v3430_v40  ;;  %v3382_v9 = vld [vmem:[#allocation2 + $0x50] sm:$0xff]   ;;  %v3397_v27 = vld [vmem:[#allocation2 + $0xc8] sm:$0xff]  }
 0x137   : > { %3202 = vmatpush3.bf16.msra.mxu0 %v3376_v63  ;;  %3173 = vmatprep.mubr.msk.bf16.mxu0 %vm3431_vm2, %v3430_v40  ;;  %v3391_v20 = vld [vmem:[#allocation2 + $0x90] sm:$0xff]   ;;  %v3401_v31 = vld [vmem:[#allocation2 + $0xd8] sm:$0x3f]  }
 0x138   : > { %v1169_v2 = vrot.slane %v1168_v1, 4  ;;  %1174 = vst.msk [vmem:[#allocation2 + $0xd0] sm:$0xc] %vm636_vm8, %v1168_v1  ;;  %3203 = vmatprep.subr.bf16.mxu0 %v3430_v40  ;;  %3150 = vmatmul.mubr.msk.bf16.vlgmr.msra.gmra.mrb[32].mxu1 %vm1477_vm9, %v3710_v55  ;;  %v3392_v19 = vld [vmem:[#allocation2 + $0xb8] sm:$0x3f]   ;;  %v2231_v33 = vsel %vm281_vm0, %v3401_v31, 0 }
 0x139   : > { %3182 = vmatpush3.bf16.msra.mxu1 %v3377_v3  ;;  %3153 = vmatprep.mubr.msk.bf16.mxu1 %vm3431_vm2, %v3430_v40  ;;  %v2107_v22 = vsel %vm281_vm0, %v3392_v19, 0  ;;  %v1834_v19 = vstv %s2770_s16 }
 0x13a   : > { %v1171_v5 = vsel %vm3590_vm7, %v1169_v2, %v1170_v0  ;;  %3183 = vmatprep.subr.bf16.mxu1 %v3430_v40 }
 0x13b   : > { %1175 = vst.msk [vmem:[#allocation2 + $0xd4] sm:$0xf] %vm379_vm3, %v1171_v5  ;;  %3204 = vmatpush3.bf16.msra.mxu0 %v3378_v4  ;;  %v3390_v18 = vld [vmem:[#allocation2 + $0xb0] sm:$0xff]  }
 0x13c   : > { %3205 = vmatprep.subr.bf16.mxu0 %v3430_v40  ;;  %v3398_v28 = vld [vmem:[#allocation2 + $0xf0] sm:$0xff]  }
 0x13d   : > { %3184 = vmatpush3.bf16.msra.mxu1 %v3380_v7  ;;  %v3400_v29 = vld [vmem:[#allocation2 + $0xf8] sm:$0x3f]  }
 0x13e   : > { %3174 = vmatmul.mubr.msk.bf16.gmra.mrb[32].mxu0 %vm1477_vm9, %v3739_v6  ;;  %3185 = vmatprep.subr.bf16.mxu1 %v3430_v40  ;;  %v2355_v32 = vsel %vm281_vm0, %v3400_v29, 0 }
 0x13f   : > { %3206 = vmatpush3.bf16.msra.mxu0 %v3381_v54  ;;  %3177 = vmatprep.mubr.msk.bf16.mxu0 %vm3431_vm2, %v3430_v40 }
 0x140   : > { %3207 = vmatprep.subr.bf16.mxu0 %v3430_v40  ;;  %3154 = vmatmul.mubr.msk.bf16.gmra.mrb[36].mxu1 %vm1477_vm9, %v3739_v6 }
 0x141   : > { %3186 = vmatpush3.bf16.msra.mxu1 %v3382_v9  ;;  %3157 = vmatprep.mubr.msk.bf16.mxu1 %vm3431_vm2, %v3430_v40 }
 0x142   : > { %3187 = vmatprep.subr.bf16.mxu1 %v3430_v40  ;;  %v3399_v30 = vld [vmem:[#allocation2 + $0xd0] sm:$0xff]  }
 0x143   : > { %3208 = vmatpush3.bf16.msra.mxu0 %v1859_v10 }
 0x144   : > { %3241 = vmatprep.subr.bf16.mxu0 %v3430_v40 }
 0x145   : > { %3188 = vmatpush3.bf16.msra.mxu1 %v1735_v13 }
 0x146   : > { %3178 = vmatmul.mubr.msk.bf16.gmra.mrb[36].mxu0 %vm1477_vm9, %v3758_v12  ;;  %3221 = vmatprep.subr.bf16.mxu1 %v3430_v40 }
 0x147   : > { %3209 = vmatprep.mubr.msk.bf16.mxu0 %vm3431_vm2, %v3430_v40 }
 0x148   : > { %3158 = vmatmul.mubr.msk.bf16.gmra.mrb[40].mxu1 %vm1477_vm9, %v3758_v12 }
 0x149   : > { %3189 = vmatprep.mubr.msk.bf16.mxu1 %vm3431_vm2, %v3430_v40 }
 0x14e   : > { %3210 = vmatmul.mubr.msk.bf16.vlgmr.msra.gmra.mrb[40].mxu0 %vm1477_vm9, %v3710_v55 }
 0x14f   : > { %3242 = vmatpush3.bf16.msra.mxu0 %v3386_v14  ;;  %3213 = vmatprep.mubr.msk.bf16.mxu0 %vm3431_vm2, %v3430_v40 }
 0x150   : > { %3243 = vmatprep.subr.bf16.mxu0 %v3430_v40  ;;  %3190 = vmatmul.mubr.msk.bf16.vlgmr.msra.gmra.mrb[44].mxu1 %vm1477_vm9, %v3710_v55 }
 0x151   : > { %3222 = vmatpush3.bf16.msra.mxu1 %v3387_v15  ;;  %3193 = vmatprep.mubr.msk.bf16.mxu1 %vm3431_vm2, %v3430_v40 }
 0x152   : > { %3223 = vmatprep.subr.bf16.mxu1 %v3430_v40 }
 0x153   : > { %3244 = vmatpush3.bf16.msra.mxu0 %v3388_v16 }
 0x154   : > { %3245 = vmatprep.subr.bf16.mxu0 %v3430_v40 }
 0x155   : > { %3224 = vmatpush3.bf16.msra.mxu1 %v3389_v17 }
 0x156   : > { %3214 = vmatmul.mubr.msk.bf16.gmra.mrb[44].mxu0 %vm1477_vm9, %v3739_v6  ;;  %3225 = vmatprep.subr.bf16.mxu1 %v3430_v40 }
 0x157   : > { %3246 = vmatpush3.bf16.msra.mxu0 %v3390_v18  ;;  %3217 = vmatprep.mubr.msk.bf16.mxu0 %vm3431_vm2, %v3430_v40 }
 0x158   : > { %3247 = vmatprep.subr.bf16.mxu0 %v3430_v40  ;;  %3194 = vmatmul.mubr.msk.bf16.gmra.mrb[48].mxu1 %vm1477_vm9, %v3739_v6 }
 0x159   : > { %3226 = vmatpush3.bf16.msra.mxu1 %v3391_v20  ;;  %3197 = vmatprep.mubr.msk.bf16.mxu1 %vm3431_vm2, %v3430_v40 }
 0x15a   : > { %3227 = vmatprep.subr.bf16.mxu1 %v3430_v40 }
 0x15b   : > { %3248 = vmatpush3.bf16.msra.mxu0 %v2107_v22  ;;  %v1710_v22 = vstv %s2750_s25 }
 0x15c   : > { %3281 = vmatprep.subr.bf16.mxu0 %v3430_v40 }
 0x15d   : > { %3228 = vmatpush3.bf16.msra.mxu1 %v1983_v23 }
 0x15e   : > { %3218 = vmatmul.mubr.msk.bf16.gmra.mrb[48].mxu0 %vm1477_vm9, %v3758_v12  ;;  %3261 = vmatprep.subr.bf16.mxu1 %v3430_v40 }
 0x15f   : > { %3249 = vmatprep.mubr.msk.bf16.mxu0 %vm3431_vm2, %v3430_v40 }
 0x160   : > { %3198 = vmatmul.mubr.msk.bf16.gmra.mrb[52].mxu1 %vm1477_vm9, %v3758_v12 }
 0x161   : > { %3229 = vmatprep.mubr.msk.bf16.mxu1 %vm3431_vm2, %v3430_v40 }
 0x166   : > { %3250 = vmatmul.mubr.msk.bf16.vlgmr.msra.gmra.mrb[52].mxu0 %vm1477_vm9, %v3710_v55 }
 0x167   : > { %3282 = vmatpush3.bf16.msra.mxu0 %v3394_v24  ;;  %3253 = vmatprep.mubr.msk.bf16.mxu0 %vm3431_vm2, %v3430_v40 }
 0x168   : > { %3283 = vmatprep.subr.bf16.mxu0 %v3430_v40  ;;  %3230 = vmatmul.mubr.msk.bf16.vlgmr.msra.gmra.mrb[56].mxu1 %vm1477_vm9, %v3710_v55 }
 0x169   : > { %3262 = vmatpush3.bf16.msra.mxu1 %v3395_v25  ;;  %3233 = vmatprep.mubr.msk.bf16.mxu1 %vm3431_vm2, %v3430_v40 }
 0x16a   : > { %3263 = vmatprep.subr.bf16.mxu1 %v3430_v40 }
 0x16b   : > { %3284 = vmatpush3.bf16.msra.mxu0 %v3396_v26 }
 0x16c   : > { %3285 = vmatprep.subr.bf16.mxu0 %v3430_v40 }
 0x16d   : > { %3264 = vmatpush3.bf16.msra.mxu1 %v3397_v27 }
 0x16e   : > { %3254 = vmatmul.mubr.msk.bf16.gmra.mrb[56].mxu0 %vm1477_vm9, %v3739_v6  ;;  %3265 = vmatprep.subr.bf16.mxu1 %v3430_v40 }
 0x16f   : > { %3286 = vmatpush3.bf16.msra.mxu0 %v3398_v28  ;;  %3257 = vmatprep.mubr.msk.bf16.mxu0 %vm3431_vm2, %v3430_v40 }
 0x170   : > { %3287 = vmatprep.subr.bf16.mxu0 %v3430_v40  ;;  %3234 = vmatmul.mubr.msk.bf16.gmra.mrb[60].mxu1 %vm1477_vm9, %v3739_v6 }
 0x171   : > { %3266 = vmatpush3.bf16.msra.mxu1 %v3399_v30  ;;  %3237 = vmatprep.mubr.msk.bf16.mxu1 %vm3431_vm2, %v3430_v40 }
 0x172   : > { %3267 = vmatprep.subr.bf16.mxu1 %v3430_v40 }
 0x173   : > { %3288 = vmatpush3.bf16.msra.mxu0 %v2355_v32 }
 0x175   : > { %3268 = vmatpush3.bf16.msra.mxu1 %v2231_v33 }
 0x176   : > { %3258 = vmatmul.mubr.msk.bf16.gmra.mrb[60].mxu0 %vm1477_vm9, %v3758_v12 }
 0x177   : > { %3289 = vmatprep.mubr.msk.bf16.mxu0 %vm3431_vm2, %v3430_v40 }
 0x178   : > { %3238 = vmatmul.mubr.msk.bf16.gmra.mrb[64].mxu1 %vm1477_vm9, %v3758_v12 }
 0x179   : > { %3269 = vmatprep.mubr.msk.bf16.mxu1 %vm3431_vm2, %v3430_v40 }
 0x17e   : > { %3290 = vmatmul.mubr.msk.bf16.vlgmr.msra.gmra.mrb[64].mxu0 %vm1477_vm9, %v3710_v55 }
 0x17f   : > { %3293 = vmatprep.mubr.msk.bf16.mxu0 %vm3431_vm2, %v3430_v40 }
 0x180   : > { %3270 = vmatmul.mubr.msk.bf16.vlgmr.msra.gmra.mrb[68].mxu1 %vm1477_vm9, %v3710_v55 }
 0x181   : > { %3273 = vmatprep.mubr.msk.bf16.mxu1 %vm3431_vm2, %v3430_v40 }
 0x186   : > { %3294 = vmatmul.mubr.msk.bf16.gmra.mrb[68].mxu0 %vm1477_vm9, %v3739_v6 }
 0x187   : > { %3297 = vmatprep.mubr.msk.bf16.mxu0 %vm3431_vm2, %v3430_v40 }
 0x188   : > { %3274 = vmatmul.mubr.msk.bf16.gmra.mrb[72].mxu1 %vm1477_vm9, %v3739_v6 }
 0x189   : > { %3277 = vmatprep.mubr.msk.bf16.mxu1 %vm3431_vm2, %v3430_v40 }
 0x18e   : > { %3298 = vmatmul.mubr.msk.bf16.gmra.mrb[72].mxu0 %vm1477_vm9, %v3758_v12 }
 0x190   : > { %3278 = vmatmul.mubr.msk.bf16.gmra.mrb[76].mxu1 %vm1477_vm9, %v3758_v12 }
 0x209   : > { %v1647_v35 = vpop.f32.mrb[28].mxu0 }
 0x20a   : > { %v1648_v37 = vadd.f32 %v1647_v35, %v1586_v34  ;;  %v3171_v38 = vpop.f32.mrb[29].mxu0 }
 0x20b   : > { %v1650_v40 = vpop.f32.mrb[30].mxu0  ;;  %v1524_v39 = vpop.f32.mrb[32].mxu1 }
 0x20c   : > { %v2938_v41 = vpack.c.bf16 %v1648_v37, %v1648_v37  ;;  %v1651_v42 = vadd.f32 %v1650_v40, %v1586_v34  ;;  %v3172_v43 = vpop.f32.mrb[31].mxu0  ;;  %v1525_v44 = vadd.f32 %v1524_v39, %v1438_v36  ;;  %v3151_v45 = vpop.f32.mrb[33].mxu1 }
 0x20d   : > { %v1527_v46 = vpop.f32.mrb[34].mxu1 }
 0x20e   : > { %2744 = vst.msk [vmem:[%s3864_s24 + $0x18] sm:$0xf] %vm379_vm3, %v2938_v41  ;;  %v2939_v47 = vpack.c.bf16 %v1651_v42, %v1651_v42  ;;  %v2932_v48 = vpack.c.bf16 %v1525_v44, %v1525_v44  ;;  %v1528_v49 = vadd.f32 %v1527_v46, %v1438_v36  ;;  %v3152_v50 = vpop.f32.mrb[35].mxu1 }
 0x210   : > { %2745 = vst.msk [vmem:[%s3864_s24 + $0x1c] sm:$0xf] %vm379_vm3, %v2939_v47  ;;  %1571 = vst.msk [vmem:[%s3864_s24] sm:$0xf] %vm379_vm3, %v2932_v48  ;;  %v2933_v51 = vpack.c.bf16 %v1528_v49, %v1528_v49 }
 0x211   : > { %v1655_v52 = vpop.f32.mrb[32].mxu0 }
 0x212   : > { %v1656_v53 = vadd.f32 %v1655_v52, %v1586_v34  ;;  %v3175_v55 = vpop.f32.mrb[33].mxu0  ;;  %1572 = vst.msk [vmem:[%s3864_s24 + $0x4] sm:$0xf] %vm379_vm3, %v2933_v51 }
 0x213   : > { %v1658_v56 = vpop.f32.mrb[34].mxu0  ;;  %v1532_v57 = vpop.f32.mrb[36].mxu1 }
 0x214   : > { %v2940_v58 = vpack.c.bf16 %v1656_v53, %v1656_v53  ;;  %v1659_v59 = vadd.f32 %v1658_v56, %v1586_v34  ;;  %v3176_v60 = vpop.f32.mrb[35].mxu0  ;;  %v1533_v61 = vadd.f32 %v1532_v57, %v1438_v36  ;;  %v3155_v62 = vpop.f32.mrb[37].mxu1 }
 0x215   : > { %v1535_v63 = vpop.f32.mrb[38].mxu1 }
 0x216   : > { %2746 = vst.msk [vmem:[%s3864_s24 + $0x20] sm:$0xf] %vm379_vm3, %v2940_v58  ;;  %v2941_v0 = vpack.c.bf16 %v1659_v59, %v1659_v59  ;;  %v2934_v1 = vpack.c.bf16 %v1533_v61, %v1533_v61  ;;  %v1536_v2 = vadd.f32 %v1535_v63, %v1438_v36  ;;  %v3156_v3 = vpop.f32.mrb[39].mxu1 }
 0x218   : > { %2747 = vst.msk [vmem:[%s3864_s24 + $0x24] sm:$0xf] %vm379_vm3, %v2941_v0  ;;  %1573 = vst.msk [vmem:[%s3864_s24 + $0x8] sm:$0xf] %vm379_vm3, %v2934_v1  ;;  %v2935_v4 = vpack.c.bf16 %v1536_v2, %v1536_v2 }
 0x219   : > { %v1663_v5 = vpop.f32.mrb[36].mxu0 }
 0x21a   : > { %v1664_v6 = vadd.f32 %v1663_v5, %v1586_v34  ;;  %v3179_v7 = vpop.f32.mrb[37].mxu0  ;;  %1574 = vst.msk [vmem:[%s3864_s24 + $0xc] sm:$0xf] %vm379_vm3, %v2935_v4 }
 0x21b   : > { %v1666_v8 = vpop.f32.mrb[38].mxu0  ;;  %v1540_v54 = vpop.f32.mrb[40].mxu1 }
 0x21c   : > { %v2942_v9 = vpack.c.bf16 %v1664_v6, %v1664_v6  ;;  %v1667_v10 = vadd.f32 %v1666_v8, %v1586_v34  ;;  %v3180_v11 = vpop.f32.mrb[39].mxu0  ;;  %v1541_v12 = vadd.f32 %v1540_v54, %v1438_v36  ;;  %v3159_v13 = vpop.f32.mrb[41].mxu1  ;;  %v2082_v6 = vstv %s2810_s26 }
 0x21d   : > { %v1543_v14 = vpop.f32.mrb[42].mxu1  ;;  %v1958_v54 = vstv %s2790_s27 }
 0x21e   : > { %2748 = vst.msk [vmem:[%s3864_s24 + $0x28] sm:$0xf] %vm379_vm3, %v2942_v9  ;;  %v2943_v15 = vpack.c.bf16 %v1667_v10, %v1667_v10  ;;  %v2936_v16 = vpack.c.bf16 %v1541_v12, %v1541_v12  ;;  %v1544_v17 = vadd.f32 %v1543_v14, %v1438_v36  ;;  %v3160_v18 = vpop.f32.mrb[43].mxu1 }
 0x220   : > { %2749 = vst.msk [vmem:[%s3864_s24 + $0x2c] sm:$0xf] %vm379_vm3, %v2943_v15  ;;  %1575 = vst.msk [vmem:[%s3864_s24 + $0x10] sm:$0xf] %vm379_vm3, %v2936_v16  ;;  %v2937_v20 = vpack.c.bf16 %v1544_v17, %v1544_v17 }
 0x221   : > { %v1895_v21 = vpop.f32.mrb[40].mxu0 }
 0x222   : > { %v1896_v23 = vadd.f32 %v1895_v21, %v1834_v19  ;;  %v3211_v24 = vpop.f32.mrb[41].mxu0  ;;  %1576 = vst.msk [vmem:[%s3864_s24 + $0x14] sm:$0xf] %vm379_vm3, %v2937_v20 }
 0x223   : > { %v1898_v25 = vpop.f32.mrb[42].mxu0  ;;  %v1771_v26 = vpop.f32.mrb[44].mxu1 }
 0x224   : > { %v2950_v27 = vpack.c.bf16 %v1896_v23, %v1896_v23  ;;  %v1899_v28 = vadd.f32 %v1898_v25, %v1834_v19  ;;  %v3212_v29 = vpop.f32.mrb[43].mxu0  ;;  %v1772_v30 = vadd.f32 %v1771_v26, %v1710_v22  ;;  %v3191_v31 = vpop.f32.mrb[45].mxu1 }
 0x225   : > { %v1774_v32 = vpop.f32.mrb[46].mxu1 }
 0x226   : > { %2784 = vst.msk [vmem:[%s3864_s24 + $0x48] sm:$0xf] %vm379_vm3, %v2950_v27  ;;  %v2951_v33 = vpack.c.bf16 %v1899_v28, %v1899_v28  ;;  %v2944_v34 = vpack.c.bf16 %v1772_v30, %v1772_v30  ;;  %v1775_v35 = vadd.f32 %v1774_v32, %v1710_v22  ;;  %v3192_v36 = vpop.f32.mrb[47].mxu1 }
 0x228   : > { %2785 = vst.msk [vmem:[%s3864_s24 + $0x4c] sm:$0xf] %vm379_vm3, %v2951_v33  ;;  %2764 = vst.msk [vmem:[%s3864_s24 + $0x30] sm:$0xf] %vm379_vm3, %v2944_v34  ;;  %v2945_v37 = vpack.c.bf16 %v1775_v35, %v1775_v35 }
 0x229   : > { %v1903_v38 = vpop.f32.mrb[44].mxu0 }
 0x22a   : > { %v1904_v40 = vadd.f32 %v1903_v38, %v1834_v19  ;;  %v3215_v39 = vpop.f32.mrb[45].mxu0  ;;  %2765 = vst.msk [vmem:[%s3864_s24 + $0x34] sm:$0xf] %vm379_vm3, %v2945_v37 }
 0x22b   : > { %v1906_v41 = vpop.f32.mrb[46].mxu0  ;;  %v1779_v42 = vpop.f32.mrb[48].mxu1 }
 0x22c   : > { %v2952_v43 = vpack.c.bf16 %v1904_v40, %v1904_v40  ;;  %v1907_v44 = vadd.f32 %v1906_v41, %v1834_v19  ;;  %v3216_v45 = vpop.f32.mrb[47].mxu0  ;;  %v1780_v46 = vadd.f32 %v1779_v42, %v1710_v22  ;;  %v3195_v47 = vpop.f32.mrb[49].mxu1 }
 0x22d   : > { %v1782_v48 = vpop.f32.mrb[50].mxu1 }
 0x22e   : > { %2786 = vst.msk [vmem:[%s3864_s24 + $0x50] sm:$0xf] %vm379_vm3, %v2952_v43  ;;  %v2953_v49 = vpack.c.bf16 %v1907_v44, %v1907_v44  ;;  %v2946_v50 = vpack.c.bf16 %v1780_v46, %v1780_v46  ;;  %v1783_v51 = vadd.f32 %v1782_v48, %v1710_v22  ;;  %v3196_v52 = vpop.f32.mrb[51].mxu1 }
 0x230   : > { %2787 = vst.msk [vmem:[%s3864_s24 + $0x54] sm:$0xf] %vm379_vm3, %v2953_v49  ;;  %2766 = vst.msk [vmem:[%s3864_s24 + $0x38] sm:$0xf] %vm379_vm3, %v2946_v50  ;;  %v2947_v53 = vpack.c.bf16 %v1783_v51, %v1783_v51 }
 0x231   : > { %v1911_v55 = vpop.f32.mrb[48].mxu0 }
 0x232   : > { %v1912_v56 = vadd.f32 %v1911_v55, %v1834_v19  ;;  %v3219_v57 = vpop.f32.mrb[49].mxu0  ;;  %2767 = vst.msk [vmem:[%s3864_s24 + $0x3c] sm:$0xf] %vm379_vm3, %v2947_v53 }
 0x233   : > { %v1914_v58 = vpop.f32.mrb[50].mxu0  ;;  %v1787_v59 = vpop.f32.mrb[52].mxu1 }
 0x234   : > { %v2954_v60 = vpack.c.bf16 %v1912_v56, %v1912_v56  ;;  %v1915_v61 = vadd.f32 %v1914_v58, %v1834_v19  ;;  %v3220_v62 = vpop.f32.mrb[51].mxu0  ;;  %v1788_v63 = vadd.f32 %v1787_v59, %v1710_v22  ;;  %v3199_v0 = vpop.f32.mrb[53].mxu1  ;;  %v2330_v56 = vstv %s2850_s28 }
 0x235   : > { %v1790_v1 = vpop.f32.mrb[54].mxu1  ;;  %v2206_v59 = vstv %s2830_s29 }
 0x236   : > { %2788 = vst.msk [vmem:[%s3864_s24 + $0x58] sm:$0xf] %vm379_vm3, %v2954_v60  ;;  %v2955_v2 = vpack.c.bf16 %v1915_v61, %v1915_v61  ;;  %v2948_v3 = vpack.c.bf16 %v1788_v63, %v1788_v63  ;;  %v1791_v4 = vadd.f32 %v1790_v1, %v1710_v22  ;;  %v3200_v5 = vpop.f32.mrb[55].mxu1 }
 0x238   : > { %2789 = vst.msk [vmem:[%s3864_s24 + $0x5c] sm:$0xf] %vm379_vm3, %v2955_v2  ;;  %2768 = vst.msk [vmem:[%s3864_s24 + $0x40] sm:$0xf] %vm379_vm3, %v2948_v3  ;;  %v2949_v7 = vpack.c.bf16 %v1791_v4, %v1791_v4 }
 0x239   : > { %v2143_v8 = vpop.f32.mrb[52].mxu0 }
 0x23a   : > { %v2144_v9 = vadd.f32 %v2143_v8, %v2082_v6  ;;  %v3251_v10 = vpop.f32.mrb[53].mxu0  ;;  %2769 = vst.msk [vmem:[%s3864_s24 + $0x44] sm:$0xf] %vm379_vm3, %v2949_v7 }
 0x23b   : > { %v2146_v11 = vpop.f32.mrb[54].mxu0  ;;  %v2019_v12 = vpop.f32.mrb[56].mxu1 }
 0x23c   : > { %v2962_v13 = vpack.c.bf16 %v2144_v9, %v2144_v9  ;;  %v2147_v14 = vadd.f32 %v2146_v11, %v2082_v6  ;;  %v3252_v15 = vpop.f32.mrb[55].mxu0  ;;  %v2020_v16 = vadd.f32 %v2019_v12, %v1958_v54  ;;  %v3231_v17 = vpop.f32.mrb[57].mxu1 }
 0x23d   : > { %v2022_v18 = vpop.f32.mrb[58].mxu1 }
 0x23e   : > { %2824 = vst.msk [vmem:[%s3864_s24 + $0x78] sm:$0xf] %vm379_vm3, %v2962_v13  ;;  %v2963_v19 = vpack.c.bf16 %v2147_v14, %v2147_v14  ;;  %v2956_v20 = vpack.c.bf16 %v2020_v16, %v2020_v16  ;;  %v2023_v21 = vadd.f32 %v2022_v18, %v1958_v54  ;;  %v3232_v22 = vpop.f32.mrb[59].mxu1 }
 0x240   : > { %2825 = vst.msk [vmem:[%s3864_s24 + $0x7c] sm:$0xf] %vm379_vm3, %v2963_v19  ;;  %2804 = vst.msk [vmem:[%s3864_s24 + $0x60] sm:$0xf] %vm379_vm3, %v2956_v20  ;;  %v2957_v23 = vpack.c.bf16 %v2023_v21, %v2023_v21 }
 0x241   : > { %v2151_v24 = vpop.f32.mrb[56].mxu0 }
 0x242   : > { %v2152_v25 = vadd.f32 %v2151_v24, %v2082_v6  ;;  %v3255_v26 = vpop.f32.mrb[57].mxu0  ;;  %2805 = vst.msk [vmem:[%s3864_s24 + $0x64] sm:$0xf] %vm379_vm3, %v2957_v23 }
 0x243   : > { %v2154_v27 = vpop.f32.mrb[58].mxu0  ;;  %v2027_v28 = vpop.f32.mrb[60].mxu1 }
 0x244   : > { %v2964_v29 = vpack.c.bf16 %v2152_v25, %v2152_v25  ;;  %v2155_v30 = vadd.f32 %v2154_v27, %v2082_v6  ;;  %v3256_v31 = vpop.f32.mrb[59].mxu0  ;;  %v2028_v32 = vadd.f32 %v2027_v28, %v1958_v54  ;;  %v3235_v33 = vpop.f32.mrb[61].mxu1 }
 0x245   : > { %v2030_v34 = vpop.f32.mrb[62].mxu1 }
 0x246   : > { %2826 = vst.msk [vmem:[%s3864_s24 + $0x80] sm:$0xf] %vm379_vm3, %v2964_v29  ;;  %v2965_v35 = vpack.c.bf16 %v2155_v30, %v2155_v30  ;;  %v2958_v36 = vpack.c.bf16 %v2028_v32, %v2028_v32  ;;  %v2031_v37 = vadd.f32 %v2030_v34, %v1958_v54  ;;  %v3236_v38 = vpop.f32.mrb[63].mxu1 }
 0x248   : > { %2827 = vst.msk [vmem:[%s3864_s24 + $0x84] sm:$0xf] %vm379_vm3, %v2965_v35  ;;  %2806 = vst.msk [vmem:[%s3864_s24 + $0x68] sm:$0xf] %vm379_vm3, %v2958_v36  ;;  %v2959_v40 = vpack.c.bf16 %v2031_v37, %v2031_v37 }
 0x249   : > { %v2159_v39 = vpop.f32.mrb[60].mxu0 }
 0x24a   : > { %v2160_v41 = vadd.f32 %v2159_v39, %v2082_v6  ;;  %v3259_v42 = vpop.f32.mrb[61].mxu0  ;;  %2807 = vst.msk [vmem:[%s3864_s24 + $0x6c] sm:$0xf] %vm379_vm3, %v2959_v40 }
 0x24b   : > { %v2162_v43 = vpop.f32.mrb[62].mxu0  ;;  %v2035_v44 = vpop.f32.mrb[64].mxu1 }
 0x24c   : > { %v2966_v45 = vpack.c.bf16 %v2160_v41, %v2160_v41  ;;  %v2163_v46 = vadd.f32 %v2162_v43, %v2082_v6  ;;  %v3260_v47 = vpop.f32.mrb[63].mxu0  ;;  %v2036_v48 = vadd.f32 %v2035_v44, %v1958_v54  ;;  %v3239_v49 = vpop.f32.mrb[65].mxu1 }
 0x24d   : > { %v2038_v50 = vpop.f32.mrb[66].mxu1 }
 0x24e   : > { %2828 = vst.msk [vmem:[%s3864_s24 + $0x88] sm:$0xf] %vm379_vm3, %v2966_v45  ;;  %v2967_v51 = vpack.c.bf16 %v2163_v46, %v2163_v46  ;;  %v2960_v52 = vpack.c.bf16 %v2036_v48, %v2036_v48  ;;  %v2039_v53 = vadd.f32 %v2038_v50, %v1958_v54  ;;  %v3240_v55 = vpop.f32.mrb[67].mxu1 }
 0x250   : > { %2829 = vst.msk [vmem:[%s3864_s24 + $0x8c] sm:$0xf] %vm379_vm3, %v2967_v51  ;;  %2808 = vst.msk [vmem:[%s3864_s24 + $0x70] sm:$0xf] %vm379_vm3, %v2960_v52  ;;  %v2961_v57 = vpack.c.bf16 %v2039_v53, %v2039_v53 }
 0x251   : > { %v2391_v58 = vpop.f32.mrb[64].mxu0 }
 0x252   : > { %v2392_v60 = vadd.f32 %v2391_v58, %v2330_v56  ;;  %v3291_v61 = vpop.f32.mrb[65].mxu0  ;;  %2809 = vst.msk [vmem:[%s3864_s24 + $0x74] sm:$0xf] %vm379_vm3, %v2961_v57 }
 0x253   : > { %v2394_v62 = vpop.f32.mrb[66].mxu0  ;;  %v2267_v63 = vpop.f32.mrb[68].mxu1 }
 0x254   : > { %v2974_v0 = vpack.c.bf16 %v2392_v60, %v2392_v60  ;;  %v2395_v1 = vadd.f32 %v2394_v62, %v2330_v56  ;;  %v3292_v2 = vpop.f32.mrb[67].mxu0  ;;  %v2268_v3 = vadd.f32 %v2267_v63, %v2206_v59  ;;  %v3271_v4 = vpop.f32.mrb[69].mxu1 }
 0x255   : > { %v2270_v5 = vpop.f32.mrb[70].mxu1 }
 0x256   : > { %2864 = vst.msk [vmem:[%s3864_s24 + $0xa8] sm:$0xf] %vm379_vm3, %v2974_v0  ;;  %v2975_v6 = vpack.c.bf16 %v2395_v1, %v2395_v1  ;;  %v2968_v7 = vpack.c.bf16 %v2268_v3, %v2268_v3  ;;  %v2271_v8 = vadd.f32 %v2270_v5, %v2206_v59  ;;  %v3272_v54 = vpop.f32.mrb[71].mxu1 }
 0x258   : > { %2865 = vst.msk [vmem:[%s3864_s24 + $0xac] sm:$0xf] %vm379_vm3, %v2975_v6  ;;  %2844 = vst.msk [vmem:[%s3864_s24 + $0x90] sm:$0xf] %vm379_vm3, %v2968_v7  ;;  %v2969_v9 = vpack.c.bf16 %v2271_v8, %v2271_v8 }
 0x259   : > { %v2399_v10 = vpop.f32.mrb[68].mxu0 }
 0x25a   : > { %v2400_v11 = vadd.f32 %v2399_v10, %v2330_v56  ;;  %v3295_v12 = vpop.f32.mrb[69].mxu0  ;;  %2845 = vst.msk [vmem:[%s3864_s24 + $0x94] sm:$0xf] %vm379_vm3, %v2969_v9 }
 0x25b   : > { %v2402_v13 = vpop.f32.mrb[70].mxu0  ;;  %v2275_v14 = vpop.f32.mrb[72].mxu1 }
 0x25c   : > { %v2976_v15 = vpack.c.bf16 %v2400_v11, %v2400_v11  ;;  %v2403_v16 = vadd.f32 %v2402_v13, %v2330_v56  ;;  %v3296_v17 = vpop.f32.mrb[71].mxu0  ;;  %v2276_v18 = vadd.f32 %v2275_v14, %v2206_v59  ;;  %v3275_v19 = vpop.f32.mrb[73].mxu1 }
 0x25d   : > { %v2278_v20 = vpop.f32.mrb[74].mxu1 }
 0x25e   : > { %2866 = vst.msk [vmem:[%s3864_s24 + $0xb0] sm:$0xf] %vm379_vm3, %v2976_v15  ;;  %v2977_v21 = vpack.c.bf16 %v2403_v16, %v2403_v16  ;;  %v2970_v22 = vpack.c.bf16 %v2276_v18, %v2276_v18  ;;  %v2279_v23 = vadd.f32 %v2278_v20, %v2206_v59  ;;  %v3276_v24 = vpop.f32.mrb[75].mxu1 }
 0x260   : > { %2867 = vst.msk [vmem:[%s3864_s24 + $0xb4] sm:$0xf] %vm379_vm3, %v2977_v21  ;;  %2846 = vst.msk [vmem:[%s3864_s24 + $0x98] sm:$0xf] %vm379_vm3, %v2970_v22  ;;  %v2971_v25 = vpack.c.bf16 %v2279_v23, %v2279_v23 }
 0x261   : > { %v2407_v26 = vpop.f32.mrb[72].mxu0 }
 0x262   : > { %v2408_v27 = vadd.f32 %v2407_v26, %v2330_v56  ;;  %v3299_v28 = vpop.f32.mrb[73].mxu0  ;;  %2847 = vst.msk [vmem:[%s3864_s24 + $0x9c] sm:$0xf] %vm379_vm3, %v2971_v25 }
 0x263   : > { %v2410_v29 = vpop.f32.mrb[74].mxu0  ;;  %v2283_v30 = vpop.f32.mrb[76].mxu1 }
 0x264   : > { %v2978_v31 = vpack.c.bf16 %v2408_v27, %v2408_v27  ;;  %v2411_v32 = vadd.f32 %v2410_v29, %v2330_v56  ;;  %v3300_v33 = vpop.f32.mrb[75].mxu0  ;;  %v2284_v34 = vadd.f32 %v2283_v30, %v2206_v59  ;;  %v3279_v35 = vpop.f32.mrb[77].mxu1 }
 0x265   : > { %v2286_v36 = vpop.f32.mrb[78].mxu1 }
 0x266   : > { %2868 = vst.msk [vmem:[%s3864_s24 + $0xb8] sm:$0xf] %vm379_vm3, %v2978_v31  ;;  %v2979_v37 = vpack.c.bf16 %v2411_v32, %v2411_v32  ;;  %v2972_v38 = vpack.c.bf16 %v2284_v34, %v2284_v34  ;;  %v2287_v40 = vadd.f32 %v2286_v36, %v2206_v59  ;;  %v3280_v39 = vpop.f32.mrb[79].mxu1 }
 0x268   : > { %2869 = vst.msk [vmem:[%s3864_s24 + $0xbc] sm:$0xf] %vm379_vm3, %v2979_v37  ;;  %2848 = vst.msk [vmem:[%s3864_s24 + $0xa0] sm:$0xf] %vm379_vm3, %v2972_v38  ;;  %v2973_v41 = vpack.c.bf16 %v2287_v40, %v2287_v40 }
 0x26a   : > { %2849 = vst.msk [vmem:[%s3864_s24 + $0xa4] sm:$0xf] %vm379_vm3, %v2973_v41 }
 0x26b PF: > { %s15_s15 = sadd.s32 1, %s3427_s15  }
 0x26c   : > { %p12_p1 = scmp.ge.s32.totalorder %s15_s15, 4  }
 0x26e   :  { %14 = sbr.rel (!%p12_p1) target bundleno = 1 (0x1), region = 93 }
 0x275   :  { %2466 = vsyncpa [#allocation4], 1 }
 0x276   :  { %2468 = vsyncpa [#allocation4 + $0x1], 1 }

// kernel: yolo_sem_ppm_forward.5
= control target key start
LH: loop header
LB: loop body
LE: loop exit
PB: predicated region body
PF: predicated region fallthrough
CT: control target
= control target key end

     0   :  { %s6342_s15 = smov 0   ;;  %s8091_s0 = inlined_call_operand.vmem [shape: bf16[2,8,2304], index: 0, kind: input, shape index: {}]   ;;  %s8092_s1 = inlined_call_operand.vmem [shape: bf16[9,4,8], index: 1, kind: input, shape index: {}]   ;;  %s8093_s2 = inlined_call_operand.vmem [shape: bf16[2,2304], index: 2, kind: input, shape index: {}]   ;;  %s8094_s3 = inlined_call_operand.vmem [shape: f32[4,1], index: 3, kind: input, shape index: {}]   ;;  %s8095_s4 = inlined_call_operand.vmem [shape: f32[2,4,2304], index: 4, kind: output, shape index: {}]  }
   0x1 LB: > { %s5850_s16 = sadd.s32 4294967295, %s6305_s15   ;;  %p5854_p0 = scmp.ge.s32.totalorder %s6305_s15, 1  ;;  %s6305_s15 = sphi %s6342_s15, %s14_s15  }
   0x2   : > { %p162_p1 = scmp.lt.s32.totalorder %s6305_s15, 3 }
   0x4   : > { %p163_p2 = pnand %p5854_p0, %p162_p1 }
   0x5   : > { %p188_p3 = scmp.lt.s32.totalorder (!%p163_p2), %s5850_s16, 1  ;;  %v233_v0 = vlaneseq (!%p163_p2)  ;;  %v6307_v1 = vmov (!%p163_p2), 0   ;;  %v6308_v2 = vmov (!%p163_p2), 1966171168   ;;  %v223_v4 = vld [vmem:[%s8093_s2] sm:$0xff] (!%p163_p2)  ;;  %v224_v8 = vld [vmem:[%s8093_s2 + $0x8] sm:$0xff] (!%p163_p2) }
   0x6   : > { %166 = sbr.rel (%p163_p2) target bundleno = 696 (0x2b8), region = 36  ;;  %199 = vst [vmem:[#allocation2] sm:$0xf] (!%p163_p2), %v6307_v1  ;;  %200 = vst [vmem:[#allocation2 + $0x4c] sm:$0xf] (!%p163_p2), %v6307_v1  ;;  %v231_v3 = vunpack.c.l.s4 (!%p163_p2), %v6308_v2  ;;  %1108 = vmatprep.mubr.bf16.mxu0 (!%p163_p2), %v6307_v1  ;;  %1149 = vmatprep.mubr.bf16.mxu1 (!%p163_p2), %v6307_v1  ;;  %v229_v7 = vcombine.high (!%p163_p2), %v223_v4, %v223_v4  ;;  %v278_v10 = vcombine.high (!%p163_p2), %v224_v8, %v224_v8  ;;  %s6309_s27 = smov (!%p163_p2), 48  }
   0x7   : > { %201 = vst [vmem:[#allocation3] sm:$0xf] (!%p163_p2), %v6307_v1  ;;  %202 = vst [vmem:[#allocation3 + $0x4c] sm:$0xf] (!%p163_p2), %v6307_v1  ;;  %v234_v5 = vshrl.u32 (!%p163_p2), %v233_v0, 7  ;;  %6200 = vset.pattern.permute.xlu0 (!%p163_p2), %v6307_v1  ;;  %s6310_s28 = smov (!%p163_p2), 49  }
   0x8   : > { %203 = vst [vmem:[#allocation4] sm:$0xf] (!%p163_p2), %v6307_v1  ;;  %204 = vst [vmem:[#allocation4 + $0x4c] sm:$0xf] (!%p163_p2), %v6307_v1  ;;  %v232_v6 = vunpack.c.0.s8 (!%p163_p2), %v231_v3  ;;  %s6311_s29 = smov (!%p163_p2), 47   ;;  %s6312_s30 = smov (!%p163_p2), 1  }
   0x9   : > { %v5857_v11 = vld.sshfl [vmem:[%s8093_s2 + $0x10] sm:$0x11 pattern:$0x75316420] (!%p163_p2)  ;;  %v6396_v21 = vsub.s32 (!%p163_p2), 0, %v234_v5  ;;  %vm998_vm0 = vcmask (!%p163_p2), 392192  }
   0xa   : > { %v6368_v9 = vsub.s32 (!%p163_p2), %v232_v6, %v234_v5  ;;  %v334_v31 = vcombine.high (!%p163_p2), %v5857_v11, %v5857_v11  ;;  %vm1021_vm1 = vcmask (!%p163_p2), 1043456   ;;  %vm1017_vm2 = vcmask (!%p163_p2), 64512   ;;  %s6313_s7 = smov (!%p163_p2), 127   ;;  %s6314_s10 = smov (!%p163_p2), 81  }
   0xb   : > { %vm1531_vm3 = vcmask (!%p163_p2), 400384   ;;  %vm2074_vm4 = vcmask (!%p163_p2), 384000   ;;  %vm2577_vm5 = vcmask (!%p163_p2), 7168   ;;  %s6315_s13 = smov (!%p163_p2), 80   ;;  %s6316_s18 = smov (!%p163_p2), 79   ;;  %vm3638_vm6 = vcmask (!%p163_p2), 1039360  }
   0xc   : > { %v236_v15 = vrot.slane (!%p163_p2), %v223_v4, %v6368_v9  ;;  %v243_v16 = vrot.slane (!%p163_p2), %v229_v7, %v6368_v9  ;;  %v285_v17 = vrot.slane (!%p163_p2), %v224_v8, %v6368_v9  ;;  %v6420_v30 = vrot.slane (!%p163_p2), %v278_v10, %v6368_v9 }
   0xd   : > { %s8097_s16 = smov (!%p188_p3, %s5850_s16), 1  ;;  %v6453_v44 = vrot.slane %v5857_v11, %v6368_v9  ;;  %v6456_v45 = vrot.slane %v334_v31, %v6368_v9  ;;  %vm4199_vm7 = vcmask 662528   ;;  %vm4760_vm8 = vcmask 654336  }
   0xe   : > { %s6181_s19 = smul.u32 72, %s8097_s16  ;;  %v244_v25 = vcombine.high %v236_v15, %v236_v15  ;;  %v6408_v26 = vrot.slane %v236_v15, %v6368_v9  ;;  %v245_v27 = vcombine.high %v243_v16, %v243_v16  ;;  %v6411_v28 = vrot.slane %v243_v16, %v6368_v9 }
   0xf   : > { %v6417_v29 = vrot.slane %v285_v17, %v6368_v9  ;;  %v293_v35 = vcombine.high %v285_v17, %v285_v17  ;;  %v294_v43 = vcombine.high %v6420_v30, %v6420_v30  ;;  %v6465_v51 = vrot.slane %v6420_v30, %v6368_v9 }
  0x10   : > { %s192_s24 = scalar_lea.vmem %s8091_s0, %s6181_s19  ;;  %v6423_v32 = vrot.slane %v244_v25, %v6368_v9  ;;  %v350_v33 = vpack.i.b16 %v6408_v26, %v6408_v26  ;;  %v6429_v34 = vcombine.high %v6408_v26, %v6408_v26  ;;  %v6432_v36 = vrot.slane %v245_v27, %v6368_v9  ;;  %s8048_s8 = scalar_lea.vmem %s8095_s4, %s6181_s19 }
  0x11   : > { %v6378_v12 = vld [vmem:[%s192_s24] sm:$0xff]  ;;  %v6380_v13 = vld [vmem:[%s192_s24 + $0x8] sm:$0xff]  ;;  %v6382_v14 = vld [vmem:[%s192_s24 + $0x10] sm:$0xff]  ;;  %v378_v37 = vpack.i.b16 %v6411_v28, %v6411_v28  ;;  %v6446_v41 = vcombine.high %v6411_v28, %v6411_v28  ;;  %v406_v42 = vpack.i.b16 %v6417_v29, %v6417_v29  ;;  %v6461_v50 = vrot.slane %v293_v35, %v6368_v9 }
  0x12   : > { %214 = vst [vmem:[#allocation2 + $0x4] sm:$0xff] %v6378_v12  ;;  %215 = vst [vmem:[#allocation2 + $0xc] sm:$0xff] %v6380_v13  ;;  %v6390_v18 = vld [vmem:[%s192_s24 + $0x18] sm:$0xff]  ;;  %v6392_v19 = vld [vmem:[%s192_s24 + $0x20] sm:$0xff]  ;;  %v357_v38 = vpack.i.b16 %v6423_v32, %v6423_v32  ;;  %v6440_v39 = vcombine.high %v6423_v32, %v6423_v32  ;;  %v364_v40 = vpack.i.b16 %v6429_v34, %v6429_v34  ;;  %v674_v11 = vshrl.u32 %v6408_v26, 16 }
  0x13   : > { %216 = vst [vmem:[#allocation2 + $0x14] sm:$0xff] %v6382_v14  ;;  %v6394_v20 = vld [vmem:[%s192_s24 + $0x28] sm:$0xff]  ;;  %217 = vst [vmem:[#allocation2 + $0x1c] sm:$0xff] %v6390_v18  ;;  %v6401_v22 = vld [vmem:[%s192_s24 + $0x30] sm:$0xff]  ;;  %v355_v48 = vrot.slane %v350_v33, %v6396_v21  ;;  %v383_v49 = vrot.slane %v378_v37, %v6396_v21  ;;  %v385_v57 = vpack.i.b16 %v6432_v36, %v6432_v36  ;;  %v682_v31 = vshrl.u32 %v6423_v32, 16 }
  0x14   : > { %218 = vst [vmem:[#allocation2 + $0x24] sm:$0xff] %v6392_v19  ;;  %219 = vst [vmem:[#allocation2 + $0x2c] sm:$0xff] %v6394_v20  ;;  %v6403_v23 = vld [vmem:[%s192_s24 + $0x38] sm:$0xff]  ;;  %v6405_v24 = vld [vmem:[%s192_s24 + $0x40] sm:$0xff]  ;;  %v362_v56 = vrot.slane %v357_v38, %v6396_v21  ;;  %v369_v59 = vrot.slane %v364_v40, %v6396_v21  ;;  %v371_v60 = vpack.i.b16 %v6440_v39, %v6440_v39  ;;  %vm5263_vm9 = vcmask 646144  }
  0x15   : > { %220 = vst [vmem:[#allocation2 + $0x34] sm:$0xff] %v6401_v22  ;;  %221 = vst [vmem:[#allocation2 + $0x3c] sm:$0xff] %v6403_v23  ;;  %v6479_v61 = vcombine.high %v6432_v36, %v6432_v36  ;;  %v392_v62 = vpack.i.b16 %v6446_v41, %v6446_v41  ;;  %v411_v2 = vrot.slane %v406_v42, %v6396_v21 }
  0x16   : > { %222 = vst [vmem:[#allocation2 + $0x44] sm:$0xff] %v6405_v24  ;;  %v5858_v10 = vcombine.low %v355_v48, %v362_v56  ;;  %v376_v15 = vrot.slane %v371_v60, %v6396_v21  ;;  %v390_v16 = vrot.slane %v385_v57, %v6396_v21  ;;  %v413_v30 = vpack.i.b16 %v6461_v50, %v6461_v50 }
  0x17   : > { %v397_v17 = vrot.slane %v392_v62, %v6396_v21  ;;  %v399_v25 = vpack.i.b16 %v6479_v61, %v6479_v61  ;;  %v6507_v26 = vcombine.high %v6417_v29, %v6417_v29  ;;  %v6513_v38 = vcombine.high %v6461_v50, %v6461_v50 }
  0x18   : > { %v529_v27 = vmul.bf16 %v5858_v10, %v6378_v12  ;;  %v5859_v33 = vcombine.low %v369_v59, %v376_v15  ;;  %v5860_v35 = vcombine.low %v383_v49, %v390_v16  ;;  %v418_v40 = vrot.slane %v413_v30, %v6396_v21 }
  0x19   : > { %v901_v46 = vld [vmem:[#allocation2 + $0x8] sm:$0xff]  ;;  %v900_v47 = vld [vmem:[#allocation2] sm:$0xff]  ;;  %v404_v37 = vrot.slane %v399_v25, %v6396_v21  ;;  %v420_v42 = vpack.i.b16 %v6507_v26, %v6507_v26  ;;  %v434_v32 = vpack.i.b16 %v6465_v51, %v6465_v51  ;;  %v6538_v59 = vcombine.high %v6465_v51, %v6465_v51 }
  0x1a   : > { %v5880_v52 = vcombine.low %v901_v46, %v901_v46  ;;  %v5878_v53 = vcombine.low %v900_v47, %v900_v47  ;;  %v902_v54 = vld [vmem:[#allocation2 + $0x10] sm:$0xff]  ;;  %v6467_v55 = vld [vmem:[#allocation2 + $0x18] sm:$0xff]  ;;  %v5881_v63 = vcombine.high %v901_v46, %v901_v46  ;;  %v5879_v0 = vcombine.high %v900_v47, %v900_v47  ;;  %538 = vst [vmem:[#allocation3 + $0x4] sm:$0xff] %v529_v27 }
  0x1b   : > { %v6472_v58 = vld [vmem:[#allocation2 + $0x20] sm:$0xff]  ;;  %v5883_v3 = vcombine.high %v902_v54, %v902_v54  ;;  %v5882_v4 = vcombine.low %v902_v54, %v902_v54  ;;  %v5885_v5 = vcombine.high %v6467_v55, %v6467_v55  ;;  %v5884_v6 = vcombine.low %v6467_v55, %v6467_v55  ;;  %v905_v60 = vld [vmem:[#allocation2 + $0x28] sm:$0xff] }
  0x1c   : > { %964 = vrot.lane.b32.xlu1 %v5880_v52, %s6309_s27  ;;  %960 = vrot.lane.b32.xlu0 %v5878_v53, %s6309_s27  ;;  %v5887_v7 = vcombine.high %v6472_v58, %v6472_v58  ;;  %v5886_v8 = vcombine.low %v6472_v58, %v6472_v58  ;;  %v6519_v46 = vrot.slane %v294_v43, %v6368_v9  ;;  %v690_v43 = vshrl.u32 %v6429_v34, 16 }
  0x1d   : > { %v530_v47 = vmul.bf16 %v5859_v33, %v6380_v13  ;;  %v531_v48 = vmul.bf16 %v5860_v35, %v6382_v14  ;;  %v5861_v49 = vcombine.low %v397_v17, %v404_v37  ;;  %v427_v52 = vpack.i.b16 %v6513_v38, %v6513_v38 }
  0x1e   : > { %v5862_v53 = vcombine.low %v411_v2, %v418_v40  ;;  %v425_v54 = vrot.slane %v420_v42, %v6396_v21  ;;  %v439_v9 = vrot.slane %v434_v32, %v6396_v21  ;;  %v441_v57 = vpack.i.b16 %v6519_v46, %v6519_v46 }
  0x1f   : > { %539 = vst [vmem:[#allocation3 + $0xc] sm:$0xff] %v530_v47  ;;  %540 = vst [vmem:[#allocation3 + $0x14] sm:$0xff] %v531_v48  ;;  %v532_v55 = vmul.bf16 %v5861_v49, %v6390_v18  ;;  %v432_v56 = vrot.slane %v427_v52, %v6396_v21  ;;  %v462_v34 = vpack.i.b16 %v6453_v44, %v6453_v44  ;;  %v698_v25 = vshrl.u32 %v6440_v39, 16 }
  0x20   : > { %966 = vrot.lane.b32.xlu1 %v5881_v63, %s6309_s27  ;;  %962 = vrot.lane.b32.xlu0 %v5879_v0, %s6309_s27  ;;  %v533_v62 = vmul.bf16 %v5862_v53, %v6392_v19  ;;  %v6543_v63 = vcombine.high %v6519_v46, %v6519_v46  ;;  %v469_v0 = vpack.i.b16 %v6456_v45, %v6456_v45  ;;  %v706_v49 = vshrl.u32 %v6411_v28, 16 }
  0x21   : > { %541 = vst [vmem:[#allocation3 + $0x1c] sm:$0xff] %v532_v55  ;;  %v5863_v2 = vcombine.low %v425_v54, %v432_v56  ;;  %v675_v10 = vpack.i.b16 %v674_v11, %v674_v11  ;;  %v467_v16 = vrot.slane %v462_v34, %v6396_v21  ;;  %v5889_v27 = vcombine.high %v905_v60, %v905_v60 }
  0x22   : > { %542 = vst [vmem:[#allocation3 + $0x24] sm:$0xff] %v533_v62  ;;  %v455_v15 = vpack.i.b16 %v6543_v63, %v6543_v63  ;;  %v474_v17 = vrot.slane %v469_v0, %v6396_v21  ;;  %v5888_v35 = vcombine.low %v905_v60, %v905_v60  ;;  %v683_v42 = vpack.i.b16 %v682_v31, %v682_v31  ;;  %v906_v31 = vld [vmem:[#allocation2 + $0x30] sm:$0xff] }
  0x23   : > { %v534_v30 = vmul.bf16 %v5863_v2, %v6394_v20  ;;  %v680_v37 = vrot.slane %v675_v10, %v6396_v21  ;;  %v691_v32 = vpack.i.b16 %v690_v43, %v690_v43  ;;  %v699_v47 = vpack.i.b16 %v698_v25, %v698_v25  ;;  %v908_v25 = vld [vmem:[#allocation2 + $0x40] sm:$0xff] }
  0x24   : > { %970 = vrot.lane.b32.xlu1 %v5883_v3, %s6309_s27  ;;  %968 = vrot.lane.b32.xlu0 %v5882_v4, %s6309_s27  ;;  %v446_v3 = vrot.slane %v441_v57, %v6396_v21  ;;  %v448_v4 = vpack.i.b16 %v6538_v59, %v6538_v59  ;;  %v714_v52 = vshrl.u32 %v6432_v36, 16  ;;  %v688_v54 = vrot.slane %v683_v42, %v6396_v21  ;;  %v907_v36 = vld [vmem:[#allocation2 + $0x38] sm:$0xff]  ;;  %v889_v42 = vld [vmem:[#allocation3] sm:$0xff] }
  0x25   : > { %543 = vst [vmem:[#allocation3 + $0x2c] sm:$0xff] %v534_v30  ;;  %v707_v58 = vpack.i.b16 %v706_v49, %v706_v49  ;;  %v5891_v28 = vcombine.high %v906_v31, %v906_v31  ;;  %v5890_v43 = vcombine.low %v906_v31, %v906_v31  ;;  %v722_v56 = vshrl.u32 %v6446_v41, 16 }
  0x26   : > { %v5864_v33 = vcombine.low %v439_v9, %v446_v3  ;;  %v453_v11 = vrot.slane %v448_v4, %v6396_v21  ;;  %v704_v9 = vrot.slane %v699_v47, %v6396_v21  ;;  %v5868_v55 = vcombine.low %v680_v37, %v688_v54  ;;  %v890_v54 = vld [vmem:[#allocation3 + $0x8] sm:$0xff] }
  0x27   : > { %v712_v60 = vrot.slane %v707_v58, %v6396_v21  ;;  %v730_v34 = vshrl.u32 %v6479_v61, 16  ;;  %v723_v2 = vpack.i.b16 %v722_v56, %v722_v56  ;;  %v738_v3 = vshrl.u32 %v6417_v29, 16 }
  0x28   : > { %974 = vrot.lane.b32.xlu1 %v5885_v5, %s6309_s27  ;;  %972 = vrot.lane.b32.xlu0 %v5884_v6, %s6309_s27  ;;  %v460_v5 = vrot.slane %v455_v15, %v6396_v21  ;;  %v5866_v6 = vcombine.low %v467_v16, %v474_v17  ;;  %v535_v40 = vmul.bf16 %v5864_v33, %v6401_v22  ;;  %v746_v4 = vshrl.u32 %v6461_v50, 16 }
  0x29   : > { %v6586_v0 = vmul.bf16 %v5868_v55, %v6378_v12  ;;  %v5893_v10 = vcombine.high %v907_v36, %v907_v36  ;;  %v5892_v16 = vcombine.low %v907_v36, %v907_v36  ;;  %v731_v61 = vpack.i.b16 %v730_v34, %v730_v34 }
  0x2a   : > { %v5865_v39 = vcombine.low %v453_v11, %v460_v5  ;;  %v537_v48 = vmul.bf16 %v5866_v6, %v6405_v24  ;;  %544 = vst [vmem:[#allocation3 + $0x34] sm:$0xff] %v535_v40  ;;  %v739_v12 = vpack.i.b16 %v738_v3, %v738_v3  ;;  %v754_v17 = vshrl.u32 %v6507_v26, 16 }
  0x2b   : > { %880 = vst [vmem:[#allocation4 + $0x4] sm:$0xff] %v6586_v0  ;;  %v747_v50 = vpack.i.b16 %v746_v4, %v746_v4  ;;  %v762_v11 = vshrl.u32 %v6513_v38, 16  ;;  %v778_v5 = vshrl.u32 %v6519_v46, 16  ;;  %v5895_v6 = vcombine.high %v908_v25, %v908_v25 }
  0x2c   : > { %978 = vrot.lane.b32.xlu1 %v5887_v7, %s6309_s27  ;;  %976 = vrot.lane.b32.xlu0 %v5886_v8, %s6309_s27  ;;  %v536_v53 = vmul.bf16 %v5865_v39, %v6403_v23  ;;  %546 = vst [vmem:[#allocation3 + $0x44] sm:$0xff] %v537_v48  ;;  %v696_v7 = vrot.slane %v691_v32, %v6396_v21  ;;  %v794_v40 = vshrl.u32 %v6543_v63, 16  ;;  %v802_v31 = vshrl.u32 %v6453_v44, 16 }
  0x2d   : > { %v715_v8 = vpack.i.b16 %v714_v52, %v714_v52  ;;  %v744_v30 = vrot.slane %v739_v12, %v6396_v21  ;;  %v755_v33 = vpack.i.b16 %v754_v17, %v754_v17  ;;  %v752_v26 = vrot.slane %v747_v50, %v6396_v21  ;;  %v894_v12 = vld [vmem:[#allocation3 + $0x28] sm:$0xff] }
  0x2e   : > { %545 = vst [vmem:[#allocation3 + $0x3c] sm:$0xff] %v536_v53  ;;  %v5869_v57 = vcombine.low %v696_v7, %v704_v9  ;;  %v5894_v37 = vcombine.low %v908_v25, %v908_v25  ;;  %v763_v39 = vpack.i.b16 %v762_v11, %v762_v11  ;;  %v795_v52 = vpack.i.b16 %v794_v40, %v794_v40  ;;  %v6220_v53 = vld [vmem:[#allocation2 + $0x48] ss:$0 sps:$4 sm:$0xff]  }
  0x2f   : > { %v720_v62 = vrot.slane %v715_v8, %v6396_v21  ;;  %v5872_v32 = vcombine.low %v744_v30, %v752_v26  ;;  %v760_v47 = vrot.slane %v755_v33, %v6396_v21  ;;  %v6623_v63 = vcombine.low %v889_v42, %v889_v42 }
  0x30   : > { %982 = vrot.lane.b32.xlu1 %v5889_v27, %s6309_s27  ;;  %980 = vrot.lane.b32.xlu0 %v5888_v35, %s6309_s27  ;;  %v6591_v15 = vmul.bf16 %v5869_v57, %v6380_v13  ;;  %v728_v13 = vrot.slane %v723_v2, %v6396_v21  ;;  %v736_v27 = vrot.slane %v731_v61, %v6396_v21  ;;  %v770_v35 = vshrl.u32 %v6465_v51, 16 }
  0x31   : > { %v5870_v41 = vcombine.low %v712_v60, %v720_v62  ;;  %v779_v51 = vpack.i.b16 %v778_v5, %v778_v5  ;;  %v768_v7 = vrot.slane %v763_v39, %v6396_v21  ;;  %v810_v9 = vshrl.u32 %v6456_v45, 16  ;;  %v891_v62 = vld [vmem:[#allocation3 + $0x10] sm:$0xff] }
  0x32   : > { %881 = vst [vmem:[#allocation4 + $0xc] sm:$0xff] %v6591_v15  ;;  %v5871_v38 = vcombine.low %v728_v13, %v736_v27  ;;  %v771_v48 = vpack.i.b16 %v770_v35, %v770_v35  ;;  %v800_v8 = vrot.slane %v795_v52, %v6396_v21  ;;  %v6635_v36 = vcombine.high %v889_v42, %v889_v42  ;;  %v895_v13 = vld [vmem:[#allocation3 + $0x30] sm:$0xff] }
  0x33   : > { %v6599_v29 = vmul.bf16 %v5870_v41, %v6382_v14  ;;  %v786_v14 = vshrl.u32 %v6538_v59, 16  ;;  %v6618_v59 = vmul.bf16 %v5872_v32, %v6392_v19  ;;  %v784_v19 = vrot.slane %v779_v51, %v6396_v21 }
  0x34   : > { %986 = vrot.lane.b32.xlu1 %v5891_v28, %s6309_s27  ;;  %984 = vrot.lane.b32.xlu0 %v5890_v43, %s6309_s27  ;;  %v6615_v46 = vmul.bf16 %v5871_v38, %v6390_v18  ;;  %v776_v18 = vrot.slane %v771_v48, %v6396_v21  ;;  %v5873_v44 = vcombine.low %v760_v47, %v768_v7 }
  0x35   : > { %882 = vst [vmem:[#allocation4 + $0x14] sm:$0xff] %v6599_v29  ;;  %v787_v49 = vpack.i.b16 %v786_v14, %v786_v14  ;;  %884 = vst [vmem:[#allocation4 + $0x24] sm:$0xff] %v6618_v59  ;;  %v803_v28 = vpack.i.b16 %v802_v31, %v802_v31  ;;  %v6633_v43 = vcombine.low %v890_v54, %v890_v54  ;;  %v896_v30 = vld [vmem:[#allocation3 + $0x38] sm:$0xff]  ;;  %v897_v26 = vld [vmem:[#allocation3 + $0x40] sm:$0xff] }
  0x36   : > { %883 = vst [vmem:[#allocation4 + $0x1c] sm:$0xff] %v6615_v46  ;;  %v5874_v55 = vcombine.low %v776_v18, %v784_v19  ;;  %v811_v45 = vpack.i.b16 %v810_v9, %v810_v9  ;;  %v6641_v56 = vmul.bf16 %v5873_v44, %v6394_v20  ;;  %v6657_v20 = vcombine.low %v891_v62, %v891_v62  ;;  %v6718_v14 = vld [vmem:[#allocation3 + $0x48] ss:$0 sps:$4 sm:$0xff]  }
  0x37   : > { %v792_v58 = vrot.slane %v787_v49, %v6396_v21  ;;  %v808_v60 = vrot.slane %v803_v28, %v6396_v21  ;;  %v6671_v41 = vcombine.high %v891_v62, %v891_v62  ;;  %v6686_v17 = vcombine.low %v894_v12, %v894_v12 }
  0x38   : > { %990 = vrot.lane.b32.xlu1 %v5893_v10, %s6309_s27  ;;  %988 = vrot.lane.b32.xlu0 %v5892_v16, %s6309_s27  ;;  %v6645_v34 = vmul.bf16 %v5874_v55, %v6401_v22  ;;  %v816_v2 = vrot.slane %v811_v45, %v6396_v21  ;;  %885 = vst [vmem:[#allocation4 + $0x2c] sm:$0xff] %v6641_v56  ;;  %v892_v21 = vld [vmem:[#allocation3 + $0x18] sm:$0xff]  ;;  %v893_v16 = vld [vmem:[#allocation3 + $0x20] sm:$0xff] }
  0x39   : > { %v5875_v57 = vcombine.low %v792_v58, %v800_v8  ;;  %v6659_v22 = vcombine.high %v890_v54, %v890_v54  ;;  %v6680_v61 = vcombine.high %v892_v21, %v892_v21  ;;  %v6688_v25 = vcombine.high %v893_v16, %v893_v16  ;;  %v1977_v38 = vld [vmem:[#allocation4 + $0x8] sm:$0xff] }
  0x3a   : > { %886 = vst [vmem:[#allocation4 + $0x34] sm:$0xff] %v6645_v34  ;;  %v5876_v4 = vcombine.low %v808_v60, %v816_v2  ;;  %v6694_v50 = vcombine.low %v895_v13, %v895_v13  ;;  %v6696_v27 = vcombine.high %v894_v12, %v894_v12  ;;  %v6702_v33 = vcombine.low %v896_v30, %v896_v30 }
  0x3b   : > { %v6650_v3 = vmul.bf16 %v5875_v57, %v6403_v23  ;;  %v6669_v23 = vcombine.low %v892_v21, %v892_v21  ;;  %v6704_v11 = vcombine.high %v895_v13, %v895_v13  ;;  %v6710_v35 = vcombine.low %v897_v26, %v897_v26 }
  0x3c   : > { %994 = vrot.lane.b32.xlu1 %v5895_v6, %s6309_s27  ;;  %992 = vrot.lane.b32.xlu0 %v5894_v37, %s6309_s27  ;;  %v6663_v10 = vmul.bf16 %v5876_v4, %v6405_v24  ;;  %v6678_v24 = vcombine.low %v893_v16, %v893_v16  ;;  %v6712_v5 = vcombine.high %v896_v30, %v896_v30  ;;  %v1976_v37 = vld [vmem:[#allocation4] sm:$0xff]  ;;  %v1978_v39 = vld [vmem:[#allocation4 + $0x10] sm:$0xff] }
  0x3d   : > { %887 = vst [vmem:[#allocation4 + $0x3c] sm:$0xff] %v6650_v3  ;;  %v6720_v6 = vcombine.high %v897_v26, %v897_v26  ;;  %v5954_v40 = vcombine.high %v1976_v37, %v1976_v37  ;;  %v5953_v42 = vcombine.low %v1976_v37, %v1976_v37  ;;  %v5956_v32 = vcombine.high %v1977_v38, %v1977_v38  ;;  %v1979_v49 = vld [vmem:[#allocation4 + $0x18] sm:$0xff]  ;;  %v6762_v26 = vld [vmem:[%s8092_s1 + $0x2] sm:$0x3] }
  0x3e   : > { %888 = vst [vmem:[#allocation4 + $0x44] sm:$0xff] %v6663_v10  ;;  %v5955_v47 = vcombine.low %v1977_v38, %v1977_v38  ;;  %v5958_v48 = vcombine.high %v1978_v39, %v1978_v39  ;;  %v5957_v51 = vcombine.low %v1978_v39, %v1978_v39  ;;  %v5960_v52 = vcombine.high %v1979_v49, %v1979_v49 }
  0x3f   : > { %v5959_v31 = vcombine.low %v1979_v49, %v1979_v49  ;;  %v1981_v9 = vld [vmem:[#allocation4 + $0x28] sm:$0xff] }
  0x40   : > { %1493 = vrot.lane.b32.xlu1 %v6623_v63, %s6310_s28  ;;  %996 = vrot.lane.b32.xlu0 %v6220_v53, %s6309_s27  ;;  %v1980_v53 = vld [vmem:[#allocation4 + $0x20] sm:$0xff]  ;;  %v5964_v18 = vcombine.high %v1981_v9, %v1981_v9  ;;  %v5963_v19 = vcombine.low %v1981_v9, %v1981_v9 }
  0x41   : > { %v5962_v54 = vcombine.high %v1980_v53, %v1980_v53  ;;  %v5961_v7 = vcombine.low %v1980_v53, %v1980_v53  ;;  %v1982_v44 = vld [vmem:[#allocation4 + $0x30] sm:$0xff] }
  0x42   : > { %v5966_v58 = vcombine.high %v1982_v44, %v1982_v44  ;;  %v5965_v8 = vcombine.low %v1982_v44, %v1982_v44 }
  0x44   : > { %1497 = vrot.lane.b32.xlu1 %v6633_v43, %s6310_s28  ;;  %1495 = vrot.lane.b32.xlu0 %v6635_v36, %s6310_s28  ;;  %v1983_v28 = vld [vmem:[#allocation4 + $0x38] sm:$0xff] }
  0x45   : > { %v5968_v55 = vcombine.high %v1983_v28, %v1983_v28  ;;  %v5967_v45 = vcombine.low %v1983_v28, %v1983_v28  ;;  %v1984_v57 = vld [vmem:[#allocation4 + $0x40] sm:$0xff]  ;;  %v6259_v2 = vld [vmem:[#allocation4 + $0x48] ss:$0 sps:$4 sm:$0xff]  }
  0x46   : > { %v5970_v60 = vcombine.high %v1984_v57, %v1984_v57  ;;  %v5969_v62 = vcombine.low %v1984_v57, %v1984_v57  ;;  %v6857_v57 = vcombine.high %v6591_v15, %v6591_v15 }
  0x48   : > { %1501 = vrot.lane.b32.xlu1 %v6657_v20, %s6310_s28  ;;  %1499 = vrot.lane.b32.xlu0 %v6659_v22, %s6310_s28 }
  0x4c   : > { %1505 = vrot.lane.b32.xlu1 %v6669_v23, %s6310_s28  ;;  %1503 = vrot.lane.b32.xlu0 %v6671_v41, %s6310_s28 }
  0x50   : > { %1509 = vrot.lane.b32.xlu1 %v6678_v24, %s6310_s28  ;;  %1507 = vrot.lane.b32.xlu0 %v6680_v61, %s6310_s28 }
  0x54   : > { %1513 = vrot.lane.b32.xlu1 %v6686_v17, %s6310_s28  ;;  %1511 = vrot.lane.b32.xlu0 %v6688_v25, %s6310_s28 }
  0x58   : > { %1517 = vrot.lane.b32.xlu1 %v6694_v50, %s6310_s28  ;;  %1515 = vrot.lane.b32.xlu0 %v6696_v27, %s6310_s28 }
  0x5c   : > { %1521 = vrot.lane.b32.xlu1 %v6702_v33, %s6310_s28  ;;  %1519 = vrot.lane.b32.xlu0 %v6704_v11, %s6310_s28 }
  0x60   : > { %1525 = vrot.lane.b32.xlu1 %v6710_v35, %s6310_s28  ;;  %1523 = vrot.lane.b32.xlu0 %v6712_v5, %s6310_s28 }
  0x64   : > { %1529 = vrot.lane.b32.xlu1 %v6718_v14, %s6310_s28  ;;  %1527 = vrot.lane.b32.xlu0 %v6720_v6, %s6310_s28 }
  0x68   : > { %2038 = vrot.lane.b32.xlu1 %v5954_v40, %s6311_s29  ;;  %2036 = vrot.lane.b32.xlu0 %v5953_v42, %s6311_s29 }
  0x6c   : > { %2042 = vrot.lane.b32.xlu1 %v5956_v32, %s6311_s29  ;;  %2040 = vrot.lane.b32.xlu0 %v5955_v47, %s6311_s29 }
  0x70   : > { %2046 = vrot.lane.b32.xlu1 %v5958_v48, %s6311_s29  ;;  %2044 = vrot.lane.b32.xlu0 %v5957_v51, %s6311_s29 }
  0x74   : > { %2050 = vrot.lane.b32.xlu1 %v5960_v52, %s6311_s29  ;;  %2048 = vrot.lane.b32.xlu0 %v5959_v31, %s6311_s29 }
  0x78   : > { %2054 = vrot.lane.b32.xlu1 %v5962_v54, %s6311_s29  ;;  %2052 = vrot.lane.b32.xlu0 %v5961_v7, %s6311_s29 }
  0x7c   : > { %2058 = vrot.lane.b32.xlu1 %v5964_v18, %s6311_s29  ;;  %2056 = vrot.lane.b32.xlu0 %v5963_v19, %s6311_s29 }
  0x80   : > { %2062 = vrot.lane.b32.xlu1 %v5966_v58, %s6311_s29  ;;  %2060 = vrot.lane.b32.xlu0 %v5965_v8, %s6311_s29 }
  0x84   : > { %2066 = vrot.lane.b32.xlu1 %v5968_v55, %s6311_s29  ;;  %2064 = vrot.lane.b32.xlu0 %v5967_v45, %s6311_s29 }
  0x88   : > { %2070 = vrot.lane.b32.xlu1 %v5970_v60, %s6311_s29  ;;  %2068 = vrot.lane.b32.xlu0 %v5969_v62, %s6311_s29  ;;  %v6866_v62 = vcombine.low %v6591_v15, %v6591_v15 }
  0x8c   : > { %2539 = vrot.lane.b32.xlu1 %v6623_v63, %s6312_s30  ;;  %2072 = vrot.lane.b32.xlu0 %v6259_v2, %s6311_s29 }
  0x8e   : > { %v965_v4 = vpop.permute.xlu1 %964  ;;  %v961_v21 = vpop.permute.xlu0 %960 }
  0x90   : > { %2543 = vrot.lane.b32.xlu1 %v6633_v43, %s6312_s30  ;;  %2541 = vrot.lane.b32.xlu0 %v6635_v36, %s6312_s30 }
  0x92   : > { %v967_v16 = vpop.permute.xlu1 %966  ;;  %v963_v12 = vpop.permute.xlu0 %962 }
  0x93   : > { %v1000_v13 = vsel %vm998_vm0, %v963_v12, %v965_v4  ;;  %v999_v30 = vsel %vm998_vm0, %v961_v21, %v963_v12  ;;  %v1001_v37 = vsel %vm998_vm0, %v965_v4, %v967_v16 }
  0x94   : > { %2547 = vrot.lane.b32.xlu1 %v6657_v20, %s6312_s30  ;;  %2545 = vrot.lane.b32.xlu0 %v6659_v22, %s6312_s30  ;;  %v1023_v63 = vsel %vm1021_vm1, %v999_v30, 0  ;;  %v1029_v22 = vsel %vm1021_vm1, %v1001_v37, 0  ;;  %v6890_v30 = vcombine.low %v6599_v29, %v6599_v29 }
  0x95   : > { %5897 = vmatprep.subr.msk.bf16.mxu0 %vm1021_vm1, %v1000_v13  ;;  %v6883_v13 = vld [vmem:[%s8092_s1] sm:$0x3] }
  0x96   : > { %1077 = vmatpush1.bf16.msra.mxu0 %v1023_v63  ;;  %v971_v43 = vpop.permute.xlu1 %970  ;;  %v969_v36 = vpop.permute.xlu0 %968 }
  0x97   : > { %v1002_v20 = vsel %vm998_vm0, %v967_v16, %v969_v36  ;;  %v1003_v40 = vsel %vm998_vm0, %v969_v36, %v971_v43  ;;  %v6876_v16 = vcombine.high %v6599_v29, %v6599_v29 }
  0x98   : > { %2551 = vrot.lane.b32.xlu1 %v6669_v23, %s6312_s30  ;;  %2549 = vrot.lane.b32.xlu0 %v6671_v41, %s6312_s30  ;;  %v1035_v23 = vsel %vm1021_vm1, %v1003_v40, 0 }
  0x99   : > { %5898 = vmatmul.mubr.msk.bf16.vlgmr.msra.gmra.mrb[0].mxu0 %vm1017_vm2, %v6762_v26  ;;  %5899 = vmatprep.subr.msk.bf16.mxu1 %vm1021_vm1, %v1002_v20  ;;  %v6909_v20 = vcombine.low %v6615_v46, %v6615_v46 }
  0x9a   : > { %1118 = vmatpush1.bf16.msra.mxu1 %v1029_v22  ;;  %v975_v42 = vpop.permute.xlu1 %974  ;;  %v973_v38 = vpop.permute.xlu0 %972  ;;  %1190 = vmatprep.mubr.bf16.mxu0 %v6307_v1 }
  0x9b   : > { %v1004_v32 = vsel %vm998_vm0, %v971_v43, %v973_v38  ;;  %v1005_v41 = vsel %vm998_vm0, %v973_v38, %v975_v42  ;;  %v6919_v38 = vcombine.high %v6618_v59, %v6618_v59 }
  0x9c   : > { %2555 = vrot.lane.b32.xlu1 %v6678_v24, %s6312_s30  ;;  %2553 = vrot.lane.b32.xlu0 %v6680_v61, %s6312_s30  ;;  %v1041_v24 = vsel %vm1021_vm1, %v1005_v41, 0 }
  0x9d   : > { %5900 = vmatmul.mubr.msk.bf16.vlgmr.msra.gmra.mrb[0].mxu1 %vm1017_vm2, %v6762_v26  ;;  %5901 = vmatprep.subr.msk.bf16.mxu0 %vm1021_vm1, %v1004_v32 }
  0x9e   : > { %1159 = vmatpush1.bf16.msra.mxu0 %v1035_v23  ;;  %v979_v47 = vpop.permute.xlu1 %978  ;;  %v977_v39 = vpop.permute.xlu0 %976  ;;  %1231 = vmatprep.mubr.bf16.mxu1 %v6307_v1  ;;  %v6928_v23 = vcombine.low %v6618_v59, %v6618_v59 }
  0x9f   : > { %v1006_v48 = vsel %vm998_vm0, %v975_v42, %v977_v39  ;;  %v1007_v61 = vsel %vm998_vm0, %v977_v39, %v979_v47 }
  0xa0   : > { %2559 = vrot.lane.b32.xlu1 %v6686_v17, %s6312_s30  ;;  %2557 = vrot.lane.b32.xlu0 %v6688_v25, %s6312_s30  ;;  %v1047_v17 = vsel %vm1021_vm1, %v1007_v61, 0  ;;  %v6947_v61 = vcombine.low %v6641_v56, %v6641_v56 }
  0xa1   : > { %5902 = vmatmul.mubr.msk.bf16.vlgmr.msra.gmra.mrb[4].mxu0 %vm1017_vm2, %v6762_v26  ;;  %5903 = vmatprep.subr.msk.bf16.mxu1 %vm1021_vm1, %v1006_v48  ;;  %v6938_v48 = vcombine.high %v6641_v56, %v6641_v56 }
  0xa2   : > { %1200 = vmatpush1.bf16.msra.mxu1 %v1041_v24  ;;  %v983_v51 = vpop.permute.xlu1 %982  ;;  %v981_v49 = vpop.permute.xlu0 %980  ;;  %1272 = vmatprep.mubr.bf16.mxu0 %v6307_v1 }
  0xa3   : > { %v1008_v52 = vsel %vm998_vm0, %v979_v47, %v981_v49  ;;  %v1009_v25 = vsel %vm998_vm0, %v981_v49, %v983_v51 }
  0xa4   : > { %2563 = vrot.lane.b32.xlu1 %v6694_v50, %s6312_s30  ;;  %2561 = vrot.lane.b32.xlu0 %v6696_v27, %s6312_s30  ;;  %v1053_v50 = vsel %vm1021_vm1, %v1009_v25, 0 }
  0xa5   : > { %5904 = vmatmul.mubr.msk.bf16.vlgmr.msra.gmra.mrb[4].mxu1 %vm1017_vm2, %v6762_v26  ;;  %5905 = vmatprep.subr.msk.bf16.mxu0 %vm1021_vm1, %v1008_v52 }
  0xa6   : > { %1241 = vmatpush1.bf16.msra.mxu0 %v1047_v17  ;;  %v987_v31 = vpop.permute.xlu1 %986  ;;  %v985_v53 = vpop.permute.xlu0 %984  ;;  %1313 = vmatprep.mubr.bf16.mxu1 %v6307_v1  ;;  %v6957_v17 = vcombine.high %v6645_v34, %v6645_v34 }
  0xa7   : > { %v1010_v54 = vsel %vm998_vm0, %v983_v51, %v985_v53  ;;  %v1011_v27 = vsel %vm998_vm0, %v985_v53, %v987_v31 }
  0xa8   : > { %2567 = vrot.lane.b32.xlu1 %v6702_v33, %s6312_s30  ;;  %2565 = vrot.lane.b32.xlu0 %v6704_v11, %s6312_s30  ;;  %v1059_v33 = vsel %vm1021_vm1, %v1011_v27, 0  ;;  %v6976_v27 = vcombine.high %v6650_v3, %v6650_v3 }
  0xa9   : > { %5906 = vmatmul.mubr.msk.bf16.vlgmr.msra.gmra.mrb[8].mxu0 %vm1017_vm2, %v6762_v26  ;;  %5907 = vmatprep.subr.msk.bf16.mxu1 %vm1021_vm1, %v1010_v54 }
  0xaa   : > { %1282 = vmatpush1.bf16.msra.mxu1 %v1053_v50  ;;  %v991_v7 = vpop.permute.xlu1 %990  ;;  %v989_v9 = vpop.permute.xlu0 %988  ;;  %1354 = vmatprep.mubr.bf16.mxu0 %v6307_v1 }
  0xab   : > { %v1012_v18 = vsel %vm998_vm0, %v987_v31, %v989_v9  ;;  %v1013_v11 = vsel %vm998_vm0, %v989_v9, %v991_v7  ;;  %v6966_v31 = vcombine.low %v6645_v34, %v6645_v34  ;;  %v6985_v9 = vcombine.low %v6650_v3, %v6650_v3  ;;  %v4101_v3 = vld [vmem:[#allocation3 + $0x4] sm:$0xff] }
  0xac   : > { %2571 = vrot.lane.b32.xlu1 %v6710_v35, %s6312_s30  ;;  %2569 = vrot.lane.b32.xlu0 %v6712_v5, %s6312_s30  ;;  %v6838_v35 = vcombine.high %v6586_v0, %v6586_v0  ;;  %v1065_v8 = vsel %vm1021_vm1, %v1013_v11, 0 }
  0xad   : > { %5908 = vmatmul.mubr.msk.bf16.vlgmr.msra.gmra.mrb[8].mxu1 %vm1017_vm2, %v6762_v26  ;;  %5909 = vmatprep.subr.msk.bf16.mxu0 %vm1021_vm1, %v1012_v18 }
  0xae   : > { %1323 = vmatpush1.bf16.msra.mxu0 %v1059_v33  ;;  %v995_v19 = vpop.permute.xlu1 %994  ;;  %v993_v44 = vpop.permute.xlu0 %992  ;;  %1395 = vmatprep.mubr.bf16.mxu1 %v6307_v1 }
  0xaf   : > { %v1014_v58 = vsel %vm998_vm0, %v991_v7, %v993_v44  ;;  %v1015_v5 = vsel %vm998_vm0, %v993_v44, %v995_v19 }
  0xb0   : > { %2575 = vrot.lane.b32.xlu1 %v6718_v14, %s6312_s30  ;;  %2573 = vrot.lane.b32.xlu0 %v6720_v6, %s6312_s30  ;;  %v6848_v14 = vcombine.low %v6586_v0, %v6586_v0  ;;  %v1071_v45 = vsel %vm1021_vm1, %v1015_v5, 0  ;;  %v7004_v5 = vcombine.low %v6663_v10, %v6663_v10 }
  0xb1   : > { %5910 = vmatmul.mubr.msk.bf16.vlgmr.msra.gmra.mrb[12].mxu0 %vm1017_vm2, %v6762_v26  ;;  %5911 = vmatprep.subr.msk.bf16.mxu1 %vm1021_vm1, %v1014_v58 }
  0xb2   : > { %1364 = vmatpush1.bf16.msra.mxu1 %v1065_v8  ;;  %v1494_v28 = vpop.permute.xlu1 %1493  ;;  %v997_v55 = vpop.permute.xlu0 %996  ;;  %1436 = vmatprep.mubr.bf16.mxu0 %v6307_v1 }
  0xb3   : > { %v1016_v6 = vsel %vm998_vm0, %v995_v19, %v997_v55  ;;  %v6995_v19 = vcombine.high %v6663_v10, %v6663_v10 }
  0xb4   : > { %5913 = vmatprep.subr.msk.bf16.mxu0 %vm1021_vm1, %v1016_v6  ;;  %3602 = vrot.lane.b32.xlu1 %v6838_v35, %s6313_s7  ;;  %v6085_v6 = vcombine.low %v4101_v3, %v4101_v3 }
  0xb5   : > { %5912 = vmatmul.mubr.msk.bf16.vlgmr.msra.gmra.mrb[12].mxu1 %vm1017_vm2, %v6762_v26  ;;  %1405 = vmatpush1.bf16.msra.mxu0 %v1071_v45  ;;  %v4102_v45 = vld [vmem:[#allocation3 + $0xc] sm:$0xff] }
  0xb6   : > { %v1498_v0 = vpop.permute.xlu1 %1497  ;;  %v1496_v60 = vpop.permute.xlu0 %1495  ;;  %1639 = vmatprep.mubr.bf16.mxu1 %v6307_v1  ;;  %3600 = vrot.lane.b32.xlu0 %v6848_v14, %s6313_s7 }
  0xb7   : > { %v1532_v2 = vsel %vm1531_vm3, %v1494_v28, %v1496_v60  ;;  %v1533_v4 = vsel %vm1531_vm3, %v1496_v60, %v1498_v0  ;;  %v7017_v60 = vld [vmem:[#allocation4 + $0x4c] ss:$0 sps:$4 sm:$0xff]  }
  0xb8   : > { %5934 = vmatprep.subr.msk.bf16.mxu1 %vm1021_vm1, %v1533_v4  ;;  %v1554_v21 = vsel %vm1021_vm1, %v1532_v2, 0  ;;  %3606 = vrot.lane.b32.xlu1 %v6857_v57, %s6313_s7 }
  0xb9   : > { %5914 = vmatmul.mubr.msk.bf16.vlgmr.msra.gmra.mrb[16].mxu0 %vm1017_vm2, %v6762_v26  ;;  %1608 = vmatpush1.bf16.msra.mxu1 %v1554_v21  ;;  %v6900_v26 = vcombine.high %v6615_v46, %v6615_v46 }
  0xba   : > { %v1502_v15 = vpop.permute.xlu1 %1501  ;;  %v1500_v12 = vpop.permute.xlu0 %1499  ;;  %1680 = vmatprep.mubr.bf16.mxu0 %v6307_v1  ;;  %3604 = vrot.lane.b32.xlu0 %v6866_v62, %s6313_s7 }
  0xbb   : > { %v1534_v63 = vsel %vm1531_vm3, %v1498_v0, %v1500_v12  ;;  %v1535_v43 = vsel %vm1531_vm3, %v1500_v12, %v1502_v15  ;;  %v4103_v12 = vld [vmem:[#allocation3 + $0x14] sm:$0xff] }
  0xbc   : > { %5936 = vmatprep.subr.msk.bf16.mxu0 %vm1021_vm1, %v1535_v43  ;;  %v1560_v36 = vsel %vm1021_vm1, %v1534_v63, 0  ;;  %3610 = vrot.lane.b32.xlu1 %v6876_v16, %s6313_s7 }
  0xbd   : > { %5935 = vmatmul.mubr.msk.bf16.vlgmr.msra.gmra.mrb[16].mxu1 %vm1017_vm2, %v6883_v13  ;;  %1649 = vmatpush1.bf16.msra.mxu0 %v1560_v36  ;;  %v6086_v36 = vcombine.high %v4101_v3, %v4101_v3 }
  0xbe   : > { %v1506_v29 = vpop.permute.xlu1 %1505  ;;  %v1504_v37 = vpop.permute.xlu0 %1503  ;;  %1721 = vmatprep.mubr.bf16.mxu1 %v6307_v1  ;;  %3608 = vrot.lane.b32.xlu0 %v6890_v30, %s6313_s7 }
  0xbf   : > { %v1536_v22 = vsel %vm1531_vm3, %v1502_v15, %v1504_v37  ;;  %v1537_v40 = vsel %vm1531_vm3, %v1504_v37, %v1506_v29  ;;  %v6087_v15 = vcombine.low %v4102_v45, %v4102_v45 }
  0xc0   : > { %5938 = vmatprep.subr.msk.bf16.mxu1 %vm1021_vm1, %v1537_v40  ;;  %v1566_v42 = vsel %vm1021_vm1, %v1536_v22, 0  ;;  %3614 = vrot.lane.b32.xlu1 %v6900_v26, %s6313_s7 }
  0xc1   : > { %5937 = vmatmul.mubr.msk.bf16.vlgmr.msra.gmra.mrb[20].mxu0 %vm1017_vm2, %v6883_v13  ;;  %1690 = vmatpush1.bf16.msra.mxu1 %v1566_v42  ;;  %v6088_v42 = vcombine.high %v4102_v45, %v4102_v45 }
  0xc2   : > { %v1510_v46 = vpop.permute.xlu1 %1509  ;;  %v1508_v32 = vpop.permute.xlu0 %1507  ;;  %1762 = vmatprep.mubr.bf16.mxu0 %v6307_v1  ;;  %3612 = vrot.lane.b32.xlu0 %v6909_v20, %s6313_s7 }
  0xc3   : > { %v1538_v41 = vsel %vm1531_vm3, %v1506_v29, %v1508_v32  ;;  %v1539_v47 = vsel %vm1531_vm3, %v1508_v32, %v1510_v46  ;;  %v6089_v29 = vcombine.low %v4103_v12, %v4103_v12  ;;  %v4104_v32 = vld [vmem:[#allocation3 + $0x1c] sm:$0xff] }
  0xc4   : > { %5940 = vmatprep.subr.msk.bf16.mxu0 %vm1021_vm1, %v1539_v47  ;;  %v1572_v39 = vsel %vm1021_vm1, %v1538_v41, 0  ;;  %3618 = vrot.lane.b32.xlu1 %v6919_v38, %s6313_s7 }
  0xc5   : > { %5939 = vmatmul.mubr.msk.bf16.vlgmr.msra.gmra.mrb[20].mxu1 %vm1017_vm2, %v6883_v13  ;;  %1731 = vmatpush1.bf16.msra.mxu0 %v1572_v39 }
  0xc6   : > { %v1514_v59 = vpop.permute.xlu1 %1513  ;;  %v1512_v24 = vpop.permute.xlu0 %1511  ;;  %1803 = vmatprep.mubr.bf16.mxu1 %v6307_v1  ;;  %3616 = vrot.lane.b32.xlu0 %v6928_v23, %s6313_s7 }
  0xc7   : > { %v1540_v51 = vsel %vm1531_vm3, %v1510_v46, %v1512_v24  ;;  %v1541_v49 = vsel %vm1531_vm3, %v1512_v24, %v1514_v59  ;;  %v6091_v24 = vcombine.low %v4104_v32, %v4104_v32 }
  0xc8   : > { %5942 = vmatprep.subr.msk.bf16.mxu1 %vm1021_vm1, %v1541_v49  ;;  %v1578_v52 = vsel %vm1021_vm1, %v1540_v51, 0  ;;  %3622 = vrot.lane.b32.xlu1 %v6938_v48, %s6313_s7  ;;  %v6090_v51 = vcombine.high %v4103_v12, %v4103_v12 }
  0xc9   : > { %5941 = vmatmul.mubr.msk.bf16.vlgmr.msra.gmra.mrb[24].mxu0 %vm1017_vm2, %v6883_v13  ;;  %1772 = vmatpush1.bf16.msra.mxu1 %v1578_v52  ;;  %v4105_v52 = vld [vmem:[#allocation3 + $0x24] sm:$0xff] }
  0xca   : > { %v1518_v56 = vpop.permute.xlu1 %1517  ;;  %v1516_v25 = vpop.permute.xlu0 %1515  ;;  %1844 = vmatprep.mubr.bf16.mxu0 %v6307_v1  ;;  %3620 = vrot.lane.b32.xlu0 %v6947_v61, %s6313_s7 }
  0xcb   : > { %v1542_v53 = vsel %vm1531_vm3, %v1514_v59, %v1516_v25  ;;  %v1543_v54 = vsel %vm1531_vm3, %v1516_v25, %v1518_v56 }
  0xcc   : > { %5944 = vmatprep.subr.msk.bf16.mxu0 %vm1021_vm1, %v1543_v54  ;;  %v1584_v50 = vsel %vm1021_vm1, %v1542_v53, 0  ;;  %3626 = vrot.lane.b32.xlu1 %v6957_v17, %s6313_s7 }
  0xcd   : > { %5943 = vmatmul.mubr.msk.bf16.vlgmr.msra.gmra.mrb[24].mxu1 %vm1017_vm2, %v6883_v13  ;;  %1813 = vmatpush1.bf16.msra.mxu0 %v1584_v50  ;;  %v6093_v50 = vcombine.low %v4105_v52, %v4105_v52 }
  0xce   : > { %v1522_v34 = vpop.permute.xlu1 %1521  ;;  %v1520_v7 = vpop.permute.xlu0 %1519  ;;  %1885 = vmatprep.mubr.bf16.mxu1 %v6307_v1  ;;  %3624 = vrot.lane.b32.xlu0 %v6966_v31, %s6313_s7 }
  0xcf   : > { %v1544_v18 = vsel %vm1531_vm3, %v1518_v56, %v1520_v7  ;;  %v1545_v33 = vsel %vm1531_vm3, %v1520_v7, %v1522_v34 }
  0xd0   : > { %5946 = vmatprep.subr.msk.bf16.mxu1 %vm1021_vm1, %v1545_v33  ;;  %v1590_v11 = vsel %vm1021_vm1, %v1544_v18, 0  ;;  %3630 = vrot.lane.b32.xlu1 %v6976_v27, %s6313_s7  ;;  %v4106_v18 = vld [vmem:[#allocation3 + $0x2c] sm:$0xff] }
  0xd1   : > { %5945 = vmatmul.mubr.msk.bf16.vlgmr.msra.gmra.mrb[28].mxu0 %vm1017_vm2, %v6883_v13  ;;  %1854 = vmatpush1.bf16.msra.mxu1 %v1590_v11 }
  0xd2   : > { %v1526_v44 = vpop.permute.xlu1 %1525  ;;  %v1524_v58 = vpop.permute.xlu0 %1523  ;;  %1926 = vmatprep.mubr.bf16.mxu0 %v6307_v1  ;;  %3628 = vrot.lane.b32.xlu0 %v6985_v9, %s6313_s7 }
  0xd3   : > { %v1546_v8 = vsel %vm1531_vm3, %v1522_v34, %v1524_v58  ;;  %v1547_v28 = vsel %vm1531_vm3, %v1524_v58, %v1526_v44  ;;  %v6092_v34 = vcombine.high %v4104_v32, %v4104_v32  ;;  %v6095_v58 = vcombine.low %v4106_v18, %v4106_v18 }
  0xd4   : > { %5948 = vmatprep.subr.msk.bf16.mxu0 %vm1021_vm1, %v1547_v28  ;;  %v1596_v55 = vsel %vm1021_vm1, %v1546_v8, 0  ;;  %3634 = vrot.lane.b32.xlu1 %v6995_v19, %s6313_s7  ;;  %v6094_v8 = vcombine.high %v4105_v52, %v4105_v52 }
  0xd5   : > { %5947 = vmatmul.mubr.msk.bf16.vlgmr.msra.gmra.mrb[28].mxu1 %vm1017_vm2, %v6883_v13  ;;  %1895 = vmatpush1.bf16.msra.mxu0 %v1596_v55  ;;  %v4107_v55 = vld [vmem:[#allocation3 + $0x34] sm:$0xff] }
  0xd6   : > { %v1530_v0 = vpop.permute.xlu1 %1529  ;;  %v1528_v10 = vpop.permute.xlu0 %1527  ;;  %1967 = vmatprep.mubr.bf16.mxu1 %v6307_v1  ;;  %3632 = vrot.lane.b32.xlu0 %v7004_v5, %s6313_s7 }
  0xd7   : > { %v1548_v2 = vsel %vm1531_vm3, %v1526_v44, %v1528_v10  ;;  %v1549_v4 = vsel %vm1531_vm3, %v1528_v10, %v1530_v0 }
  0xd8   : > { %5950 = vmatprep.subr.msk.bf16.mxu1 %vm1021_vm1, %v1549_v4  ;;  %v1602_v21 = vsel %vm1021_vm1, %v1548_v2, 0  ;;  %4161 = vrot.lane.b32.xlu1 %v6085_v6, %s6314_s10  ;;  %v6097_v2 = vcombine.low %v4107_v55, %v4107_v55  ;;  %v6096_v4 = vcombine.high %v4106_v18, %v4106_v18 }
  0xd9   : > { %5949 = vmatmul.mubr.msk.bf16.vlgmr.msra.gmra.mrb[32].mxu0 %vm1017_vm2, %v6883_v13  ;;  %1936 = vmatpush1.bf16.msra.mxu1 %v1602_v21 }
  0xda   : > { %v2039_v63 = vpop.permute.xlu1 %2038  ;;  %v2037_v43 = vpop.permute.xlu0 %2036  ;;  %2182 = vmatprep.mubr.bf16.mxu0 %v6307_v1  ;;  %3636 = vrot.lane.b32.xlu0 %v7017_v60, %s6313_s7 }
  0xdb   : > { %v2075_v37 = vsel %vm2074_vm4, %v2037_v43, %v2039_v63 }
  0xdc   : > { %4165 = vrot.lane.b32.xlu1 %v6087_v15, %s6314_s10  ;;  %v2097_v41 = vsel %vm1021_vm1, %v2075_v37, 0  ;;  %v4108_v15 = vld [vmem:[#allocation3 + $0x3c] sm:$0xff]  ;;  %v6098_v37 = vcombine.high %v4107_v55, %v4107_v55 }
  0xdd   : > { %5951 = vmatmul.mubr.msk.bf16.vlgmr.msra.gmra.mrb[32].mxu1 %vm1017_vm2, %v6883_v13  ;;  %v7043_v13 = vld [vmem:[%s8092_s1 + $0x4] sm:$0x3] }
  0xde   : > { %v2043_v22 = vpop.permute.xlu1 %2042  ;;  %v2041_v40 = vpop.permute.xlu0 %2040  ;;  %2223 = vmatprep.mubr.bf16.mxu1 %v6307_v1  ;;  %4163 = vrot.lane.b32.xlu0 %v6086_v36, %s6314_s10 }
  0xdf   : > { %v2076_v46 = vsel %vm2074_vm4, %v2039_v63, %v2041_v40  ;;  %v2077_v47 = vsel %vm2074_vm4, %v2041_v40, %v2043_v22  ;;  %v4109_v40 = vld [vmem:[#allocation3 + $0x44] sm:$0xff] }
  0xe0   : > { %5972 = vmatprep.subr.msk.bf16.mxu0 %vm1021_vm1, %v2076_v46  ;;  %4169 = vrot.lane.b32.xlu1 %v6089_v29, %s6314_s10  ;;  %v2103_v56 = vsel %vm1021_vm1, %v2077_v47, 0  ;;  %v6099_v29 = vcombine.low %v4108_v15, %v4108_v15  ;;  %v6101_v47 = vcombine.low %v4109_v40, %v4109_v40 }
  0xe1   : > { %2151 = vmatpush1.bf16.msra.mxu0 %v2097_v41 }
  0xe2   : > { %v2047_v39 = vpop.permute.xlu1 %2046  ;;  %v2045_v59 = vpop.permute.xlu0 %2044  ;;  %4167 = vrot.lane.b32.xlu0 %v6088_v42, %s6314_s10 }
  0xe3   : > { %v2078_v49 = vsel %vm2074_vm4, %v2043_v22, %v2045_v59  ;;  %v2079_v25 = vsel %vm2074_vm4, %v2045_v59, %v2047_v39 }
  0xe4   : > { %5973 = vmatmul.mubr.msk.bf16.vlgmr.msra.gmra.mrb[36].mxu0 %vm1017_vm2, %v7043_v13  ;;  %5974 = vmatprep.subr.msk.bf16.mxu1 %vm1021_vm1, %v2078_v49  ;;  %v2109_v33 = vsel %vm1021_vm1, %v2079_v25, 0  ;;  %v6102_v25 = vcombine.high %v4109_v40, %v4109_v40 }
  0xe5   : > { %2192 = vmatpush1.bf16.msra.mxu1 %v2103_v56  ;;  %2264 = vmatprep.mubr.bf16.mxu0 %v6307_v1  ;;  %v6278_v56 = vld [vmem:[#allocation3 + $0x4c] ss:$0 sps:$4 sm:$0xff]  }
  0xe6   : > { %v2051_v53 = vpop.permute.xlu1 %2050  ;;  %v2049_v54 = vpop.permute.xlu0 %2048  ;;  %4173 = vrot.lane.b32.xlu1 %v6091_v24, %s6314_s10  ;;  %4171 = vrot.lane.b32.xlu0 %v6090_v51, %s6314_s10 }
  0xe7   : > { %v2080_v7 = vsel %vm2074_vm4, %v2047_v39, %v2049_v54  ;;  %v2081_v11 = vsel %vm2074_vm4, %v2049_v54, %v2051_v53  ;;  %v6100_v39 = vcombine.high %v4108_v15, %v4108_v15  ;;  %v4662_v54 = vld [vmem:[#allocation2 + $0x4] sm:$0xff] }
  0xe8   : > { %5975 = vmatmul.mubr.msk.bf16.vlgmr.msra.gmra.mrb[36].mxu1 %vm1017_vm2, %v7043_v13  ;;  %5976 = vmatprep.subr.msk.bf16.mxu0 %vm1021_vm1, %v2080_v7  ;;  %v2115_v6 = vsel %vm1021_vm1, %v2081_v11, 0  ;;  %v7111_v11 = vcombine.low %v4662_v54, %v4662_v54 }
  0xe9   : > { %2233 = vmatpush1.bf16.msra.mxu0 %v2109_v33  ;;  %2305 = vmatprep.mubr.bf16.mxu1 %v6307_v1  ;;  %v7109_v33 = vcombine.high %v4662_v54, %v4662_v54 }
  0xea   : > { %v2055_v3 = vpop.permute.xlu1 %2054  ;;  %v2053_v44 = vpop.permute.xlu0 %2052  ;;  %4177 = vrot.lane.b32.xlu1 %v6093_v50, %s6314_s10  ;;  %4175 = vrot.lane.b32.xlu0 %v6092_v34, %s6314_s10 }
  0xeb   : > { %v2082_v28 = vsel %vm2074_vm4, %v2051_v53, %v2053_v44  ;;  %v2083_v45 = vsel %vm2074_vm4, %v2053_v44, %v2055_v3  ;;  %v4663_v44 = vld [vmem:[#allocation2 + $0xc] sm:$0xff] }
  0xec   : > { %5977 = vmatmul.mubr.msk.bf16.vlgmr.msra.gmra.mrb[40].mxu0 %vm1017_vm2, %v7043_v13  ;;  %5978 = vmatprep.subr.msk.bf16.mxu1 %vm1021_vm1, %v2082_v28  ;;  %v2121_v12 = vsel %vm1021_vm1, %v2083_v45, 0  ;;  %v7123_v55 = vcombine.high %v4663_v44, %v4663_v44 }
  0xed   : > { %2274 = vmatpush1.bf16.msra.mxu1 %v2115_v6  ;;  %2346 = vmatprep.mubr.bf16.mxu0 %v6307_v1  ;;  %v7125_v6 = vcombine.low %v4663_v44, %v4663_v44 }
  0xee   : > { %v2059_v0 = vpop.permute.xlu1 %2058  ;;  %v2057_v10 = vpop.permute.xlu0 %2056  ;;  %4181 = vrot.lane.b32.xlu1 %v6095_v58, %s6314_s10  ;;  %4179 = vrot.lane.b32.xlu0 %v6094_v8, %s6314_s10 }
  0xef   : > { %v2084_v21 = vsel %vm2074_vm4, %v2055_v3, %v2057_v10  ;;  %v2085_v63 = vsel %vm2074_vm4, %v2057_v10, %v2059_v0  ;;  %v4664_v10 = vld [vmem:[#allocation2 + $0x14] sm:$0xff] }
  0xf0   : > { %5979 = vmatmul.mubr.msk.bf16.vlgmr.msra.gmra.mrb[40].mxu1 %vm1017_vm2, %v7043_v13  ;;  %5980 = vmatprep.subr.msk.bf16.mxu0 %vm1021_vm1, %v2084_v21  ;;  %v2127_v42 = vsel %vm1021_vm1, %v2085_v63, 0 }
  0xf1   : > { %2315 = vmatpush1.bf16.msra.mxu0 %v2121_v12  ;;  %2387 = vmatprep.mubr.bf16.mxu1 %v6307_v1  ;;  %v7143_v12 = vcombine.high %v4664_v10, %v4664_v10 }
  0xf2   : > { %v2063_v43 = vpop.permute.xlu1 %2062  ;;  %v2061_v36 = vpop.permute.xlu0 %2060  ;;  %4185 = vrot.lane.b32.xlu1 %v6097_v2, %s6314_s10  ;;  %4183 = vrot.lane.b32.xlu0 %v6096_v4, %s6314_s10  ;;  %v7136_v4 = vld [vmem:[%s8092_s1 + $0x6] sm:$0x3] }
  0xf3   : > { %v2086_v22 = vsel %vm2074_vm4, %v2059_v0, %v2061_v36  ;;  %v2087_v46 = vsel %vm2074_vm4, %v2061_v36, %v2063_v43  ;;  %v4665_v36 = vld [vmem:[#allocation2 + $0x1c] sm:$0xff] }
  0xf4   : > { %5981 = vmatmul.mubr.msk.bf16.vlgmr.msra.gmra.mrb[44].mxu0 %vm1017_vm2, %v7043_v13  ;;  %5982 = vmatprep.subr.msk.bf16.mxu1 %vm1021_vm1, %v2086_v22  ;;  %v2133_v24 = vsel %vm1021_vm1, %v2087_v46, 0  ;;  %v7158_v40 = vcombine.high %v4665_v36, %v4665_v36 }
  0xf5   : > { %2356 = vmatpush1.bf16.msra.mxu1 %v2127_v42  ;;  %2428 = vmatprep.mubr.bf16.mxu0 %v6307_v1  ;;  %v7160_v42 = vcombine.low %v4665_v36, %v4665_v36 }
  0xf6   : > { %v2067_v32 = vpop.permute.xlu1 %2066  ;;  %v2065_v41 = vpop.permute.xlu0 %2064  ;;  %4189 = vrot.lane.b32.xlu1 %v6099_v29, %s6314_s10  ;;  %4187 = vrot.lane.b32.xlu0 %v6098_v37, %s6314_s10 }
  0xf7   : > { %v2088_v59 = vsel %vm2074_vm4, %v2063_v43, %v2065_v41  ;;  %v2089_v51 = vsel %vm2074_vm4, %v2065_v41, %v2067_v32  ;;  %v4666_v41 = vld [vmem:[#allocation2 + $0x24] sm:$0xff] }
  0xf8   : > { %5983 = vmatmul.mubr.msk.bf16.vlgmr.msra.gmra.mrb[44].mxu1 %vm1017_vm2, %v7043_v13  ;;  %5984 = vmatprep.subr.msk.bf16.mxu0 %vm1021_vm1, %v2088_v59  ;;  %v2139_v50 = vsel %vm1021_vm1, %v2089_v51, 0  ;;  %v7175_v51 = vcombine.low %v4666_v41, %v4666_v41 }
  0xf9   : > { %2397 = vmatpush1.bf16.msra.mxu0 %v2133_v24  ;;  %2469 = vmatprep.mubr.bf16.mxu1 %v6307_v1  ;;  %v7173_v24 = vcombine.high %v4666_v41, %v4666_v41 }
  0xfa   : > { %v2071_v49 = vpop.permute.xlu1 %2070  ;;  %v2069_v52 = vpop.permute.xlu0 %2068  ;;  %4193 = vrot.lane.b32.xlu1 %v6101_v47, %s6314_s10  ;;  %4191 = vrot.lane.b32.xlu0 %v6100_v39, %s6314_s10 }
  0xfb   : > { %v2090_v53 = vsel %vm2074_vm4, %v2067_v32, %v2069_v52  ;;  %v2091_v34 = vsel %vm2074_vm4, %v2069_v52, %v2071_v49 }
  0xfc   : > { %5985 = vmatmul.mubr.msk.bf16.vlgmr.msra.gmra.mrb[48].mxu0 %vm1017_vm2, %v7043_v13  ;;  %5986 = vmatprep.subr.msk.bf16.mxu1 %vm1021_vm1, %v2090_v53  ;;  %v2145_v58 = vsel %vm1021_vm1, %v2091_v34, 0 }
  0xfd   : > { %2438 = vmatpush1.bf16.msra.mxu1 %v2139_v50  ;;  %2510 = vmatprep.mubr.bf16.mxu0 %v6307_v1 }
  0xfe   : > { %v2540_v7 = vpop.permute.xlu1 %2539  ;;  %v2073_v18 = vpop.permute.xlu0 %2072  ;;  %4197 = vrot.lane.b32.xlu1 %v6278_v56, %s6314_s10  ;;  %4195 = vrot.lane.b32.xlu0 %v6102_v25, %s6314_s10  ;;  %v4667_v56 = vld [vmem:[#allocation2 + $0x2c] sm:$0xff] }
  0xff   : > { %v2092_v3 = vsel %vm2074_vm4, %v2071_v49, %v2073_v18  ;;  %v7188_v50 = vcombine.high %v4667_v56, %v4667_v56  ;;  %v7190_v34 = vcombine.low %v4667_v56, %v4667_v56 }
 0x100   : > { %5987 = vmatmul.mubr.msk.bf16.vlgmr.msra.gmra.mrb[48].mxu1 %vm1017_vm2, %v7043_v13  ;;  %5988 = vmatprep.subr.msk.bf16.mxu0 %vm1021_vm1, %v2092_v3  ;;  %v4668_v3 = vld [vmem:[#allocation2 + $0x34] sm:$0xff] }
 0x101   : > { %2479 = vmatpush1.bf16.msra.mxu0 %v2145_v58  ;;  %2685 = vmatprep.mubr.bf16.mxu1 %v6307_v1 }
 0x102   : > { %v2544_v8 = vpop.permute.xlu1 %2543  ;;  %v2542_v28 = vpop.permute.xlu0 %2541  ;;  %4724 = vrot.lane.b32.xlu1 %v7109_v33, %s6315_s13  ;;  %4722 = vrot.lane.b32.xlu0 %v7111_v11, %s6315_s13 }
 0x103   : > { %v2578_v45 = vsel %vm2577_vm5, %v2540_v7, %v2542_v28  ;;  %v2579_v0 = vsel %vm2577_vm5, %v2542_v28, %v2544_v8  ;;  %v7203_v28 = vcombine.high %v4668_v3, %v4668_v3 }
 0x104   : > { %v2600_v2 = vsel %vm1021_vm1, %v2578_v45, 0  ;;  %5989 = vmatmul.mubr.msk.bf16.vlgmr.msra.gmra.mrb[52].mxu0 %vm1017_vm2, %v7043_v13  ;;  %5991 = vmatprep.subr.msk.bf16.mxu1 %vm1021_vm1, %v2579_v0  ;;  %v7145_v13 = vcombine.low %v4664_v10, %v4664_v10  ;;  %v7205_v45 = vcombine.low %v4668_v3, %v4668_v3 }
 0x105   : > { %2654 = vmatpush1.bf16.msra.mxu1 %v2600_v2  ;;  %2726 = vmatprep.mubr.bf16.mxu0 %v6307_v1  ;;  %v4669_v2 = vld [vmem:[#allocation2 + $0x3c] sm:$0xff] }
 0x106   : > { %v2548_v21 = vpop.permute.xlu1 %2547  ;;  %v2546_v15 = vpop.permute.xlu0 %2545  ;;  %4728 = vrot.lane.b32.xlu1 %v7123_v55, %s6315_s13  ;;  %4726 = vrot.lane.b32.xlu0 %v7125_v6, %s6315_s13  ;;  %v7220_v36 = vcombine.low %v4669_v2, %v4669_v2 }
 0x107   : > { %v2580_v63 = vsel %vm2577_vm5, %v2544_v8, %v2546_v15  ;;  %v2581_v43 = vsel %vm2577_vm5, %v2546_v15, %v2548_v21 }
 0x108   : > { %v2606_v29 = vsel %vm1021_vm1, %v2580_v63, 0  ;;  %5992 = vmatmul.mubr.msk.bf16.vlgmr.msra.gmra.mrb[52].mxu1 %vm1017_vm2, %v7136_v4  ;;  %5993 = vmatprep.subr.msk.bf16.mxu0 %vm1021_vm1, %v2581_v43  ;;  %v7218_v43 = vcombine.high %v4669_v2, %v4669_v2 }
 0x109   : > { %2695 = vmatpush1.bf16.msra.mxu0 %v2606_v29  ;;  %2767 = vmatprep.mubr.bf16.mxu1 %v6307_v1 }
 0x10a   : > { %v2552_v37 = vpop.permute.xlu1 %2551  ;;  %v2550_v22 = vpop.permute.xlu0 %2549  ;;  %4732 = vrot.lane.b32.xlu1 %v7143_v12, %s6315_s13  ;;  %4730 = vrot.lane.b32.xlu0 %v7145_v13, %s6315_s13 }
 0x10b   : > { %v2582_v46 = vsel %vm2577_vm5, %v2548_v21, %v2550_v22  ;;  %v2583_v32 = vsel %vm2577_vm5, %v2550_v22, %v2552_v37  ;;  %v4670_v22 = vld [vmem:[#allocation2 + $0x44] sm:$0xff] }
 0x10c   : > { %v2612_v47 = vsel %vm1021_vm1, %v2582_v46, 0  ;;  %5994 = vmatmul.mubr.msk.bf16.vlgmr.msra.gmra.mrb[56].mxu0 %vm1017_vm2, %v7136_v4  ;;  %5995 = vmatprep.subr.msk.bf16.mxu1 %vm1021_vm1, %v2583_v32 }
 0x10d   : > { %2736 = vmatpush1.bf16.msra.mxu1 %v2612_v47  ;;  %2808 = vmatprep.mubr.bf16.mxu0 %v6307_v1  ;;  %v7233_v47 = vcombine.high %v4670_v22, %v4670_v22 }
 0x10e   : > { %v2556_v39 = vpop.permute.xlu1 %2555  ;;  %v2554_v59 = vpop.permute.xlu0 %2553  ;;  %4736 = vrot.lane.b32.xlu1 %v7158_v40, %s6315_s13  ;;  %4734 = vrot.lane.b32.xlu0 %v7160_v42, %s6315_s13 }
 0x10f   : > { %v2584_v49 = vsel %vm2577_vm5, %v2552_v37, %v2554_v59  ;;  %v2585_v52 = vsel %vm2577_vm5, %v2554_v59, %v2556_v39 }
 0x110   : > { %v2618_v25 = vsel %vm1021_vm1, %v2584_v49, 0  ;;  %5996 = vmatmul.mubr.msk.bf16.vlgmr.msra.gmra.mrb[56].mxu1 %vm1017_vm2, %v7136_v4  ;;  %5997 = vmatprep.subr.msk.bf16.mxu0 %vm1021_vm1, %v2585_v52  ;;  %v7237_v49 = vcombine.low %v4670_v22, %v4670_v22 }
 0x111   : > { %2777 = vmatpush1.bf16.msra.mxu0 %v2618_v25  ;;  %2849 = vmatprep.mubr.bf16.mxu1 %v6307_v1 }
 0x112   : > { %v2560_v53 = vpop.permute.xlu1 %2559  ;;  %v2558_v54 = vpop.permute.xlu0 %2557  ;;  %4740 = vrot.lane.b32.xlu1 %v7173_v24, %s6315_s13  ;;  %4738 = vrot.lane.b32.xlu0 %v7175_v51, %s6315_s13 }
 0x113   : > { %v2586_v7 = vsel %vm2577_vm5, %v2556_v39, %v2558_v54  ;;  %v2587_v18 = vsel %vm2577_vm5, %v2558_v54, %v2560_v53 }
 0x114   : > { %v2624_v44 = vsel %vm1021_vm1, %v2586_v7, 0  ;;  %5998 = vmatmul.mubr.msk.bf16.vlgmr.msra.gmra.mrb[60].mxu0 %vm1017_vm2, %v7136_v4  ;;  %5999 = vmatprep.subr.msk.bf16.mxu1 %vm1021_vm1, %v2587_v18 }
 0x115   : > { %2818 = vmatpush1.bf16.msra.mxu1 %v2624_v44  ;;  %2890 = vmatprep.mubr.bf16.mxu0 %v6307_v1 }
 0x116   : > { %v2564_v58 = vpop.permute.xlu1 %2563  ;;  %v2562_v8 = vpop.permute.xlu0 %2561  ;;  %4744 = vrot.lane.b32.xlu1 %v7188_v50, %s6315_s13  ;;  %4742 = vrot.lane.b32.xlu0 %v7190_v34, %s6315_s13 }
 0x117   : > { %v2588_v0 = vsel %vm2577_vm5, %v2560_v53, %v2562_v8  ;;  %v2589_v10 = vsel %vm2577_vm5, %v2562_v8, %v2564_v58  ;;  %v3100_v53 = vsel %vm1021_vm1, %v7111_v11, 0  ;;  %v3106_v11 = vsel %vm1021_vm1, %v7125_v6, 0 }
 0x118   : > { %v2630_v21 = vsel %vm1021_vm1, %v2588_v0, 0  ;;  %6000 = vmatmul.mubr.msk.bf16.vlgmr.msra.gmra.mrb[60].mxu1 %vm1017_vm2, %v7136_v4  ;;  %6001 = vmatprep.subr.msk.bf16.mxu0 %vm1021_vm1, %v2589_v10  ;;  %v3112_v6 = vsel %vm1021_vm1, %v7145_v13, 0 }
 0x119   : > { %2859 = vmatpush1.bf16.msra.mxu0 %v2630_v21  ;;  %2931 = vmatprep.mubr.bf16.mxu1 %v6307_v1  ;;  %v7431_v21 = vld [vmem:[%s8092_s1 + $0xa] sm:$0x3] }
 0x11a   : > { %v2568_v15 = vpop.permute.xlu1 %2567  ;;  %v2566_v63 = vpop.permute.xlu0 %2565  ;;  %4748 = vrot.lane.b32.xlu1 %v7203_v28, %s6315_s13  ;;  %4746 = vrot.lane.b32.xlu0 %v7205_v45, %s6315_s13 }
 0x11b   : > { %v2590_v29 = vsel %vm2577_vm5, %v2564_v58, %v2566_v63  ;;  %v2591_v37 = vsel %vm2577_vm5, %v2566_v63, %v2568_v15 }
 0x11c   : > { %v2636_v46 = vsel %vm1021_vm1, %v2590_v29, 0  ;;  %6002 = vmatmul.mubr.msk.bf16.vlgmr.msra.gmra.mrb[64].mxu0 %vm1017_vm2, %v7136_v4  ;;  %6003 = vmatprep.subr.msk.bf16.mxu1 %vm1021_vm1, %v2591_v37 }
 0x11d   : > { %2900 = vmatpush1.bf16.msra.mxu1 %v2636_v46  ;;  %2972 = vmatprep.mubr.bf16.mxu0 %v6307_v1 }
 0x11e   : > { %v2572_v32 = vpop.permute.xlu1 %2571  ;;  %v2570_v41 = vpop.permute.xlu0 %2569  ;;  %4752 = vrot.lane.b32.xlu1 %v7218_v43, %s6315_s13  ;;  %4750 = vrot.lane.b32.xlu0 %v7220_v36, %s6315_s13 }
 0x11f   : > { %v2592_v39 = vsel %vm2577_vm5, %v2568_v15, %v2570_v41  ;;  %v2593_v59 = vsel %vm2577_vm5, %v2570_v41, %v2572_v32 }
 0x120   : > { %v2642_v52 = vsel %vm1021_vm1, %v2592_v39, 0  ;;  %6004 = vmatmul.mubr.msk.bf16.vlgmr.msra.gmra.mrb[64].mxu1 %vm1017_vm2, %v7136_v4  ;;  %6005 = vmatprep.subr.msk.bf16.mxu0 %vm1021_vm1, %v2593_v59 }
 0x121   : > { %2941 = vmatpush1.bf16.msra.mxu0 %v2642_v52  ;;  %3013 = vmatprep.mubr.bf16.mxu1 %v6307_v1 }
 0x122   : > { %v2576_v56 = vpop.permute.xlu1 %2575  ;;  %v2574_v25 = vpop.permute.xlu0 %2573  ;;  %6028 = vmatprep.subr.msk.bf16.mxu0 %vm1021_vm1, %v7109_v33  ;;  %4756 = vrot.lane.b32.xlu1 %v7233_v47, %s6315_s13  ;;  %v6298_v33 = vld [vmem:[#allocation2 + $0x4c] ss:$0 sps:$4 sm:$0xff]  }
 0x123   : > { %v2594_v54 = vsel %vm2577_vm5, %v2572_v32, %v2574_v25  ;;  %v2595_v7 = vsel %vm2577_vm5, %v2574_v25, %v2576_v56  ;;  %4754 = vrot.lane.b32.xlu0 %v7237_v49, %s6315_s13 }
 0x124   : > { %v2648_v18 = vsel %vm1021_vm1, %v2594_v54, 0  ;;  %6006 = vmatmul.mubr.msk.bf16.vlgmr.msra.gmra.mrb[68].mxu0 %vm1017_vm2, %v7136_v4  ;;  %6007 = vmatprep.subr.msk.bf16.mxu1 %vm1021_vm1, %v2595_v7 }
 0x125   : > { %2982 = vmatpush1.bf16.msra.mxu1 %v2648_v18  ;;  %3154 = vmatpush1.bf16.msra.mxu0 %v3100_v53 }
 0x126   : > { %3185 = vmatprep.mubr.bf16.mxu0 %v6307_v1  ;;  %6030 = vmatprep.subr.msk.bf16.mxu1 %vm1021_vm1, %v7123_v55  ;;  %v7263_v3 = vpop.permute.xlu1 %3602  ;;  %v7277_v55 = vld [vmem:[%s8092_s1 + $0x8] sm:$0x3] }
 0x127   : > { %6032 = vmatprep.subr.msk.bf16.mxu0 %vm1021_vm1, %v7143_v12  ;;  %5225 = vrot.lane.b32.xlu1 %v6848_v14, %s6316_s18  ;;  %v3118_v12 = vsel %vm1021_vm1, %v7160_v42, 0 }
 0x128   : > { %6008 = vmatmul.mubr.msk.bf16.vlgmr.msra.gmra.mrb[68].mxu1 %vm1017_vm2, %v7136_v4  ;;  %4758 = vrot.lane.b32.xlu0 %v6298_v33, %s6315_s13  ;;  %v7272_v44 = vpop.permute.xlu0 %3600 }
 0x129   : > { %3195 = vmatpush1.bf16.msra.mxu1 %v3106_v11  ;;  %3226 = vmatprep.mubr.bf16.mxu1 %v6307_v1  ;;  %v3639_v58 = vsel %vm3638_vm6, %v7272_v44, %v7263_v3 }
 0x12a   : > { %6034 = vmatprep.subr.msk.bf16.mxu1 %vm1021_vm1, %v7158_v40  ;;  %v7284_v14 = vpop.permute.xlu1 %3606 }
 0x12b   : > { %5229 = vrot.lane.b32.xlu1 %v6866_v62, %s6316_s18  ;;  %v3124_v62 = vsel %vm1021_vm1, %v7175_v51, 0 }
 0x12c   : > { %6029 = vmatmul.mubr.msk.bf16.vlgmr.msra.gmra.mrb[72].mxu0 %vm1017_vm2, %v7277_v55  ;;  %5227 = vrot.lane.b32.xlu0 %v6838_v35, %s6316_s18  ;;  %v7292_v4 = vpop.permute.xlu0 %3604 }
 0x12d   : > { %3236 = vmatpush1.bf16.msra.mxu0 %v3112_v6  ;;  %3267 = vmatprep.mubr.bf16.mxu0 %v6307_v1 }
 0x12e   : > { %6036 = vmatprep.subr.msk.bf16.mxu0 %vm1021_vm1, %v7173_v24  ;;  %v7299_v13 = vpop.permute.xlu1 %3610 }
 0x12f   : > { %5233 = vrot.lane.b32.xlu1 %v6890_v30, %s6316_s18  ;;  %v3130_v30 = vsel %vm1021_vm1, %v7190_v34, 0 }
 0x130   : > { %6031 = vmatmul.mubr.msk.bf16.vlgmr.msra.gmra.mrb[72].mxu1 %vm1017_vm2, %v7277_v55  ;;  %5231 = vrot.lane.b32.xlu0 %v6857_v57, %s6316_s18  ;;  %v7307_v35 = vpop.permute.xlu0 %3608 }
 0x131   : > { %3277 = vmatpush1.bf16.msra.mxu1 %v3118_v12  ;;  %3308 = vmatprep.mubr.bf16.mxu1 %v6307_v1  ;;  %v3643_v2 = vsel %vm3638_vm6, %v7307_v35, %v7299_v13 }
 0x132   : > { %6038 = vmatprep.subr.msk.bf16.mxu1 %vm1021_vm1, %v7188_v50  ;;  %v7314_v40 = vpop.permute.xlu1 %3614  ;;  %v3148_v50 = vsel %vm1021_vm1, %v7237_v49, 0  ;;  %v3673_v15 = vsel %vm1021_vm1, %v3643_v2, 0 }
 0x133   : > { %5237 = vrot.lane.b32.xlu1 %v6909_v20, %s6316_s18  ;;  %v3136_v20 = vsel %vm1021_vm1, %v7205_v45, 0  ;;  %v3641_v45 = vsel %vm3638_vm6, %v7292_v4, %v7284_v14 }
 0x134   : > { %6033 = vmatmul.mubr.msk.bf16.vlgmr.msra.gmra.mrb[76].mxu0 %vm1017_vm2, %v7277_v55  ;;  %5235 = vrot.lane.b32.xlu0 %v6876_v16, %s6316_s18  ;;  %v7322_v57 = vpop.permute.xlu0 %3612 }
 0x135   : > { %3318 = vmatpush1.bf16.msra.mxu0 %v3124_v62  ;;  %3349 = vmatprep.mubr.bf16.mxu0 %v6307_v1 }
 0x136   : > { %6040 = vmatprep.subr.msk.bf16.mxu0 %vm1021_vm1, %v7203_v28  ;;  %v7329_v42 = vpop.permute.xlu1 %3618 }
 0x137   : > { %5241 = vrot.lane.b32.xlu1 %v6928_v23, %s6316_s18  ;;  %v3142_v23 = vsel %vm1021_vm1, %v7220_v36, 0 }
 0x138   : > { %6035 = vmatmul.mubr.msk.bf16.vlgmr.msra.gmra.mrb[76].mxu1 %vm1017_vm2, %v7277_v55  ;;  %5239 = vrot.lane.b32.xlu0 %v6900_v26, %s6316_s18  ;;  %v7337_v16 = vpop.permute.xlu0 %3616 }
 0x139   : > { %3359 = vmatpush1.bf16.msra.mxu1 %v3130_v30  ;;  %3390 = vmatprep.mubr.bf16.mxu1 %v6307_v1  ;;  %v3646_v0 = vsel %vm3638_vm6, %v7314_v40, %v7337_v16  ;;  %v3647_v46 = vsel %vm3638_vm6, %v7337_v16, %v7329_v42 }
 0x13a   : > { %6042 = vmatprep.subr.msk.bf16.mxu1 %vm1021_vm1, %v7218_v43  ;;  %v7344_v24 = vpop.permute.xlu1 %3622  ;;  %v3645_v43 = vsel %vm3638_vm6, %v7322_v57, %v7314_v40  ;;  %v3685_v41 = vsel %vm1021_vm1, %v3647_v46, 0 }
 0x13b   : > { %5245 = vrot.lane.b32.xlu1 %v6947_v61, %s6316_s18  ;;  %v3640_v61 = vsel %vm3638_vm6, %v7263_v3, %v7292_v4  ;;  %v3679_v37 = vsel %vm1021_vm1, %v3645_v43, 0 }
 0x13c   : > { %6037 = vmatmul.mubr.msk.bf16.vlgmr.msra.gmra.mrb[80].mxu0 %vm1017_vm2, %v7277_v55  ;;  %5243 = vrot.lane.b32.xlu0 %v6919_v38, %s6316_s18  ;;  %v7352_v26 = vpop.permute.xlu0 %3620 }
 0x13d   : > { %3400 = vmatpush1.bf16.msra.mxu0 %v3136_v20  ;;  %3431 = vmatprep.mubr.bf16.mxu0 %v6307_v1  ;;  %v3649_v59 = vsel %vm3638_vm6, %v7352_v26, %v7344_v24 }
 0x13e   : > { %6044 = vmatprep.subr.msk.bf16.mxu0 %vm1021_vm1, %v7233_v47  ;;  %v7359_v51 = vpop.permute.xlu1 %3626  ;;  %v3691_v52 = vsel %vm1021_vm1, %v3649_v59, 0 }
 0x13f   : > { %5249 = vrot.lane.b32.xlu1 %v6966_v31, %s6316_s18  ;;  %v3642_v31 = vsel %vm3638_vm6, %v7284_v14, %v7307_v35 }
 0x140   : > { %6039 = vmatmul.mubr.msk.bf16.vlgmr.msra.gmra.mrb[80].mxu1 %vm1017_vm2, %v7277_v55  ;;  %5247 = vrot.lane.b32.xlu0 %v6938_v48, %s6316_s18  ;;  %v7370_v38 = vpop.permute.xlu0 %3624 }
 0x141   : > { %3441 = vmatpush1.bf16.msra.mxu1 %v3142_v23  ;;  %3472 = vmatprep.mubr.bf16.mxu1 %v6307_v1  ;;  %v3650_v29 = vsel %vm3638_vm6, %v7344_v24, %v7370_v38  ;;  %v3651_v53 = vsel %vm3638_vm6, %v7370_v38, %v7359_v51 }
 0x142   : > { %6066 = vmatprep.subr.msk.bf16.mxu1 %vm1021_vm1, %v3640_v61  ;;  %v7376_v34 = vpop.permute.xlu1 %3630  ;;  %v3697_v7 = vsel %vm1021_vm1, %v3651_v53, 0 }
 0x143   : > { %5253 = vrot.lane.b32.xlu1 %v6985_v9, %s6316_s18  ;;  %v3644_v9 = vsel %vm3638_vm6, %v7299_v13, %v7322_v57 }
 0x144   : > { %6041 = vmatmul.mubr.msk.bf16.vlgmr.msra.gmra.mrb[84].mxu0 %vm1017_vm2, %v7277_v55  ;;  %5251 = vrot.lane.b32.xlu0 %v6957_v17, %s6316_s18  ;;  %v7387_v48 = vpop.permute.xlu0 %3628  ;;  %v3661_v17 = vsel %vm1021_vm1, %v3639_v58, 0 }
 0x145   : > { %3482 = vmatpush1.bf16.msra.mxu0 %v3148_v50  ;;  %3513 = vmatprep.mubr.bf16.mxu0 %v6307_v1  ;;  %v3652_v32 = vsel %vm3638_vm6, %v7359_v51, %v7387_v48  ;;  %v3653_v11 = vsel %vm3638_vm6, %v7387_v48, %v7376_v34 }
 0x146   : > { %6068 = vmatprep.subr.msk.bf16.mxu0 %vm1021_vm1, %v3642_v31  ;;  %v7394_v8 = vpop.permute.xlu1 %3634  ;;  %v3703_v44 = vsel %vm1021_vm1, %v3653_v11, 0  ;;  %v7560_v31 = vld [vmem:[%s8092_s1 + $0xc] sm:$0x3] }
 0x147   : > { %5257 = vrot.lane.b32.xlu1 %v7004_v5, %s6316_s18 }
 0x148   : > { %6043 = vmatmul.mubr.msk.bf16.vlgmr.msra.gmra.mrb[84].mxu1 %vm1017_vm2, %v7277_v55  ;;  %5255 = vrot.lane.b32.xlu0 %v6976_v27, %s6316_s18  ;;  %v7406_v28 = vpop.permute.xlu0 %3632  ;;  %v3667_v27 = vsel %vm1021_vm1, %v3641_v45, 0 }
 0x149   : > { %3715 = vmatpush1.bf16.msra.mxu1 %v3661_v17  ;;  %3746 = vmatprep.mubr.bf16.mxu1 %v6307_v1  ;;  %v3654_v49 = vsel %vm3638_vm6, %v7376_v34, %v7406_v28  ;;  %v3655_v14 = vsel %vm3638_vm6, %v7406_v28, %v7394_v8 }
 0x14a   : > { %6070 = vmatprep.subr.msk.bf16.mxu1 %vm1021_vm1, %v3644_v9  ;;  %v7413_v5 = vpop.permute.xlu1 %4161  ;;  %v3709_v12 = vsel %vm1021_vm1, %v3655_v14, 0 }
 0x14b   : > { %5261 = vrot.lane.b32.xlu1 %v7017_v60, %s6316_s18 }
 0x14c   : > { %6045 = vmatmul.mubr.msk.bf16.vlgmr.msra.gmra.mrb[88].mxu0 %vm1017_vm2, %v7277_v55  ;;  %5259 = vrot.lane.b32.xlu0 %v6995_v19, %s6316_s18  ;;  %v3637_v10 = vpop.permute.xlu0 %3636  ;;  %v3648_v19 = vsel %vm3638_vm6, %v7329_v42, %v7352_v26 }
 0x14d   : > { %3756 = vmatpush1.bf16.msra.mxu0 %v3667_v27  ;;  %3787 = vmatprep.mubr.bf16.mxu0 %v6307_v1  ;;  %v3656_v54 = vsel %vm3638_vm6, %v7394_v8, %v3637_v10 }
 0x14e   : > { %6072 = vmatprep.subr.msk.bf16.mxu0 %vm1021_vm1, %v3646_v0  ;;  %v7435_v60 = vpop.permute.xlu1 %4165 }
 0x150   : > { %6067 = vmatmul.mubr.msk.bf16.vlgmr.msra.gmra.mrb[88].mxu1 %vm1017_vm2, %v7431_v21  ;;  %v4164_v63 = vpop.permute.xlu0 %4163 }
 0x151   : > { %3797 = vmatpush1.bf16.msra.mxu1 %v3673_v15  ;;  %3828 = vmatprep.mubr.bf16.mxu1 %v6307_v1  ;;  %v4201_v3 = vsel %vm4199_vm7, %v4164_v63, %v7435_v60  ;;  %v4200_v62 = vsel %vm4199_vm7, %v7413_v5, %v4164_v63 }
 0x152   : > { %6074 = vmatprep.subr.msk.bf16.mxu1 %vm1021_vm1, %v3648_v19  ;;  %v7448_v36 = vpop.permute.xlu1 %4169  ;;  %v4222_v57 = vsel %vm1021_vm1, %v4200_v62, 0 }
 0x154   : > { %6069 = vmatmul.mubr.msk.bf16.vlgmr.msra.gmra.mrb[92].mxu0 %vm1017_vm2, %v7431_v21  ;;  %v4168_v22 = vpop.permute.xlu0 %4167 }
 0x155   : > { %3838 = vmatpush1.bf16.msra.mxu0 %v3679_v37  ;;  %3869 = vmatprep.mubr.bf16.mxu0 %v6307_v1  ;;  %v4203_v4 = vsel %vm4199_vm7, %v4168_v22, %v7448_v36  ;;  %v4202_v16 = vsel %vm4199_vm7, %v7435_v60, %v4168_v22 }
 0x156   : > { %6076 = vmatprep.subr.msk.bf16.mxu0 %vm1021_vm1, %v3650_v29  ;;  %v4228_v61 = vsel %vm1021_vm1, %v4202_v16, 0 }
 0x158   : > { %6071 = vmatmul.mubr.msk.bf16.vlgmr.msra.gmra.mrb[92].mxu1 %vm1017_vm2, %v7431_v21  ;;  %v7467_v47 = vpop.permute.xlu1 %4173  ;;  %v4172_v39 = vpop.permute.xlu0 %4171 }
 0x159   : > { %3879 = vmatpush1.bf16.msra.mxu1 %v3685_v41  ;;  %3910 = vmatprep.mubr.bf16.mxu1 %v6307_v1  ;;  %v4205_v40 = vsel %vm4199_vm7, %v4172_v39, %v7467_v47  ;;  %v4204_v34 = vsel %vm4199_vm7, %v7448_v36, %v4172_v39 }
 0x15a   : > { %6078 = vmatprep.subr.msk.bf16.mxu1 %vm1021_vm1, %v3652_v32  ;;  %v4234_v28 = vsel %vm1021_vm1, %v4204_v34, 0 }
 0x15c   : > { %6073 = vmatmul.mubr.msk.bf16.vlgmr.msra.gmra.mrb[96].mxu0 %vm1017_vm2, %v7431_v21  ;;  %v7480_v56 = vpop.permute.xlu1 %4177  ;;  %v7482_v25 = vpop.permute.xlu0 %4175 }
 0x15d   : > { %3920 = vmatpush1.bf16.msra.mxu0 %v3691_v52  ;;  %3951 = vmatprep.mubr.bf16.mxu0 %v6307_v1  ;;  %v4207_v23 = vsel %vm4199_vm7, %v7482_v25, %v7480_v56  ;;  %v4206_v0 = vsel %vm4199_vm7, %v7467_v47, %v7482_v25 }
 0x15e   : > { %6080 = vmatprep.subr.msk.bf16.mxu0 %vm1021_vm1, %v3654_v49  ;;  %v4240_v19 = vsel %vm1021_vm1, %v4206_v0, 0 }
 0x160   : > { %6075 = vmatmul.mubr.msk.bf16.vlgmr.msra.gmra.mrb[96].mxu1 %vm1017_vm2, %v7431_v21  ;;  %v7494_v18 = vpop.permute.xlu1 %4181  ;;  %v7496_v33 = vpop.permute.xlu0 %4179 }
 0x161   : > { %3961 = vmatpush1.bf16.msra.mxu1 %v3697_v7  ;;  %3992 = vmatprep.mubr.bf16.mxu1 %v6307_v1  ;;  %v4209_v9 = vsel %vm4199_vm7, %v7496_v33, %v7494_v18  ;;  %v4208_v43 = vsel %vm4199_vm7, %v7480_v56, %v7496_v33 }
 0x162   : > { %6082 = vmatprep.subr.msk.bf16.mxu1 %vm1021_vm1, %v3656_v54  ;;  %v4246_v32 = vsel %vm1021_vm1, %v4208_v43, 0 }
 0x164   : > { %6077 = vmatmul.mubr.msk.bf16.vlgmr.msra.gmra.mrb[100].mxu0 %vm1017_vm2, %v7431_v21  ;;  %v7508_v55 = vpop.permute.xlu1 %4185  ;;  %v7510_v6 = vpop.permute.xlu0 %4183 }
 0x165   : > { %4002 = vmatpush1.bf16.msra.mxu0 %v3703_v44  ;;  %4033 = vmatprep.mubr.bf16.mxu0 %v6307_v1  ;;  %v4210_v39 = vsel %vm4199_vm7, %v7494_v18, %v7510_v6 }
 0x166   : > { %6104 = vmatprep.subr.msk.bf16.mxu0 %vm1021_vm1, %v4201_v3  ;;  %v4252_v53 = vsel %vm1021_vm1, %v4210_v39, 0 }
 0x168   : > { %6079 = vmatmul.mubr.msk.bf16.vlgmr.msra.gmra.mrb[100].mxu1 %vm1017_vm2, %v7431_v21  ;;  %v7522_v13 = vpop.permute.xlu1 %4189  ;;  %v7524_v35 = vpop.permute.xlu0 %4187 }
 0x169   : > { %4043 = vmatpush1.bf16.msra.mxu1 %v3709_v12  ;;  %4074 = vmatprep.mubr.bf16.mxu1 %v6307_v1  ;;  %v4213_v22 = vsel %vm4199_vm7, %v7524_v35, %v7522_v13  ;;  %v4212_v18 = vsel %vm4199_vm7, %v7508_v55, %v7524_v35 }
 0x16a   : > { %6106 = vmatprep.subr.msk.bf16.mxu1 %vm1021_vm1, %v4203_v4  ;;  %v4258_v14 = vsel %vm1021_vm1, %v4212_v18, 0 }
 0x16c   : > { %6081 = vmatmul.mubr.msk.bf16.vlgmr.msra.gmra.mrb[104].mxu0 %vm1017_vm2, %v7431_v21  ;;  %v7535_v30 = vpop.f32.mrb[0].mxu0  ;;  %v7537_v42 = vpop.permute.xlu1 %4193 }
 0x16d   : > { %4276 = vmatpush1.bf16.msra.mxu0 %v4222_v57  ;;  %v7541_v20 = vpop.f32.mrb[1].mxu0  ;;  %4307 = vmatprep.mubr.bf16.mxu0 %v6307_v1  ;;  %v7544_v24 = vpop.permute.xlu0 %4191 }
 0x16e   : > { %v1114_v26 = vpop.f32.mrb[2].mxu0  ;;  %6108 = vmatprep.subr.msk.bf16.mxu0 %vm1021_vm1, %v4205_v40  ;;  %v4215_v56 = vsel %vm4199_vm7, %v7544_v24, %v7537_v42  ;;  %v4214_v12 = vsel %vm4199_vm7, %v7522_v13, %v7544_v24 }
 0x16f   : > { %v1115_v51 = vpop.f32.mrb[3].mxu0  ;;  %v4264_v26 = vsel %vm1021_vm1, %v4214_v12, 0 }
 0x170   : > { %6083 = vmatmul.mubr.msk.bf16.vlgmr.msra.gmra.mrb[104].mxu1 %vm1017_vm2, %v7431_v21  ;;  %v7553_v38 = vpop.f32.mrb[0].mxu1  ;;  %v4198_v50 = vpop.permute.xlu1 %4197  ;;  %v4211_v21 = vsel %vm4199_vm7, %v7510_v6, %v7508_v55 }
 0x171   : > { %4317 = vmatpush1.bf16.msra.mxu1 %v4228_v61  ;;  %4348 = vmatprep.mubr.bf16.mxu1 %v6307_v1  ;;  %v7563_v48 = vpop.f32.mrb[1].mxu1  ;;  %v7565_v58 = vpop.permute.xlu0 %4195 }
 0x172   : > { %6110 = vmatprep.subr.msk.bf16.mxu1 %vm1021_vm1, %v4207_v23  ;;  %v1155_v8 = vpop.f32.mrb[2].mxu1  ;;  %v4217_v44 = vsel %vm4199_vm7, %v7565_v58, %v4198_v50  ;;  %v4216_v23 = vsel %vm4199_vm7, %v7537_v42, %v7565_v58 }
 0x173   : > { %v1156_v17 = vpop.f32.mrb[3].mxu1  ;;  %v4270_v42 = vsel %vm1021_vm1, %v4216_v23, 0 }
 0x174   : > { %6105 = vmatmul.mubr.msk.bf16.vlgmr.msra.gmra.mrb[108].mxu0 %vm1017_vm2, %v7560_v31  ;;  %v7574_v45 = vpop.f32.mrb[4].mxu0  ;;  %v7576_v5 = vpop.permute.xlu1 %4724 }
 0x175   : > { %4358 = vmatpush1.bf16.msra.mxu0 %v4234_v28  ;;  %v7581_v27 = vpop.f32.mrb[5].mxu0  ;;  %4389 = vmatprep.mubr.bf16.mxu0 %v6307_v1  ;;  %v7584_v10 = vpop.permute.xlu0 %4722 }
 0x176   : > { %v1196_v2 = vpop.f32.mrb[6].mxu0  ;;  %6112 = vmatprep.subr.msk.bf16.mxu0 %vm1021_vm1, %v4209_v9  ;;  %v4761_v34 = vsel %vm4760_vm8, %v7584_v10, %v7576_v5 }
 0x177   : > { %v1197_v60 = vpop.f32.mrb[7].mxu0  ;;  %v4783_v0 = vsel %vm1021_vm1, %v4761_v34, 0 }
 0x178   : > { %6107 = vmatmul.mubr.msk.bf16.vlgmr.msra.gmra.mrb[108].mxu1 %vm1017_vm2, %v7560_v31  ;;  %v7593_v15 = vpop.f32.mrb[4].mxu1  ;;  %v7595_v63 = vpop.permute.xlu1 %4728 }
 0x179   : > { %4399 = vmatpush1.bf16.msra.mxu1 %v4240_v19  ;;  %4430 = vmatprep.mubr.bf16.mxu1 %v6307_v1  ;;  %v7601_v36 = vpop.f32.mrb[5].mxu1  ;;  %v7603_v29 = vpop.permute.xlu0 %4726 }
 0x17a   : > { %6114 = vmatprep.subr.msk.bf16.mxu1 %vm1021_vm1, %v4211_v21  ;;  %v1237_v37 = vpop.f32.mrb[6].mxu1  ;;  %v4762_v16 = vsel %vm4760_vm8, %v7576_v5, %v7603_v29  ;;  %v4763_v2 = vsel %vm4760_vm8, %v7603_v29, %v7595_v63 }
 0x17b   : > { %v1238_v46 = vpop.f32.mrb[7].mxu1  ;;  %v4789_v29 = vsel %vm1021_vm1, %v4763_v2, 0 }
 0x17c   : > { %6109 = vmatmul.mubr.msk.bf16.vlgmr.msra.gmra.mrb[112].mxu0 %vm1017_vm2, %v7560_v31  ;;  %v7612_v41 = vpop.f32.mrb[8].mxu0  ;;  %v7614_v47 = vpop.permute.xlu1 %4732 }
 0x17d   : > { %4440 = vmatpush1.bf16.msra.mxu0 %v4246_v32  ;;  %v7619_v59 = vpop.f32.mrb[9].mxu0  ;;  %4471 = vmatprep.mubr.bf16.mxu0 %v6307_v1  ;;  %v7622_v49 = vpop.permute.xlu0 %4730 }
 0x17e   : > { %v1278_v52 = vpop.f32.mrb[10].mxu0  ;;  %6116 = vmatprep.subr.msk.bf16.mxu0 %vm1021_vm1, %v4213_v22  ;;  %v4764_v9 = vsel %vm4760_vm8, %v7595_v63, %v7622_v49  ;;  %v5726_v63 = vld [vmem:[%s8094_s3] sm:$0xf] }
 0x17f   : > { %v1279_v25 = vpop.f32.mrb[11].mxu0  ;;  %5729 = vperm.xlu0 %6200, %v5726_v63  }
 0x180   : > { %6111 = vmatmul.mubr.msk.bf16.vlgmr.msra.gmra.mrb[112].mxu1 %vm1017_vm2, %v7560_v31  ;;  %v7631_v54 = vpop.f32.mrb[8].mxu1  ;;  %v7633_v7 = vpop.permute.xlu1 %4736 }
 0x181   : > { %4481 = vmatpush1.bf16.msra.mxu1 %v4252_v53  ;;  %4512 = vmatprep.mubr.bf16.mxu1 %v6307_v1  ;;  %v7639_v33 = vpop.f32.mrb[9].mxu1  ;;  %v7641_v11 = vpop.permute.xlu0 %4734 }
 0x182   : > { %6118 = vmatprep.subr.msk.bf16.mxu1 %vm1021_vm1, %v4215_v56  ;;  %v1319_v3 = vpop.f32.mrb[10].mxu1  ;;  %v4766_v60 = vsel %vm4760_vm8, %v7614_v47, %v7641_v11 }
 0x183   : > { %v1320_v6 = vpop.f32.mrb[11].mxu1 }
 0x184   : > { %6113 = vmatmul.mubr.msk.bf16.vlgmr.msra.gmra.mrb[116].mxu0 %vm1017_vm2, %v7560_v31  ;;  %v7649_v55 = vpop.f32.mrb[12].mxu0  ;;  %v7651_v4 = vpop.permute.xlu1 %4740 }
 0x185   : > { %4522 = vmatpush1.bf16.msra.mxu0 %v4258_v14  ;;  %v7656_v35 = vpop.f32.mrb[13].mxu0  ;;  %4553 = vmatprep.mubr.bf16.mxu0 %v6307_v1  ;;  %v7659_v62 = vpop.permute.xlu0 %4738 }
 0x186   : > { %v1360_v40 = vpop.f32.mrb[14].mxu0  ;;  %6120 = vmatprep.subr.msk.bf16.mxu0 %vm1021_vm1, %v4217_v44  ;;  %v4768_v56 = vsel %vm4760_vm8, %v7633_v7, %v7659_v62 }
 0x187   : > { %v1361_v57 = vpop.f32.mrb[15].mxu0 }
 0x188   : > { %6115 = vmatmul.mubr.msk.bf16.vlgmr.msra.gmra.mrb[116].mxu1 %vm1017_vm2, %v7560_v31  ;;  %v7668_v13 = vpop.f32.mrb[12].mxu1  ;;  %v7670_v24 = vpop.permute.xlu1 %4744 }
 0x189   : > { %4563 = vmatpush1.bf16.msra.mxu1 %v4264_v26  ;;  %v7675_v51 = vpop.f32.mrb[13].mxu1  ;;  %4594 = vmatprep.mubr.bf16.mxu1 %v6307_v1  ;;  %v7678_v61 = vpop.permute.xlu0 %4742 }
 0x18a   : > { %v1401_v50 = vpop.f32.mrb[14].mxu1  ;;  %6142 = vmatprep.subr.msk.bf16.mxu1 %vm1021_vm1, %v4762_v16  ;;  %v4770_v14 = vsel %vm4760_vm8, %v7651_v4, %v7678_v61 }
 0x18b   : > { %v1402_v8 = vpop.f32.mrb[15].mxu1 }
 0x18c   : > { %6117 = vmatmul.mubr.msk.bf16.vlgmr.msra.gmra.mrb[120].mxu0 %vm1017_vm2, %v7560_v31  ;;  %v7690_v58 = vpop.f32.mrb[16].mxu0  ;;  %v7692_v17 = vpop.permute.xlu1 %4748 }
 0x18d   : > { %4604 = vmatpush1.bf16.msra.mxu0 %v4270_v42  ;;  %v7694_v28 = vpop.f32.mrb[17].mxu0  ;;  %4635 = vmatprep.mubr.bf16.mxu0 %v6307_v1  ;;  %v7697_v5 = vpop.permute.xlu0 %4746 }
 0x18e   : > { %v1442_v10 = vpop.f32.mrb[18].mxu0  ;;  %6144 = vmatprep.subr.msk.bf16.mxu0 %vm1021_vm1, %v4764_v9  ;;  %v4772_v50 = vsel %vm4760_vm8, %v7670_v24, %v7697_v5 }
 0x18f   : > { %v1443_v21 = vpop.f32.mrb[19].mxu0 }
 0x190   : > { %v1641_v19 = vpop.f32.mrb[16].mxu1  ;;  %6119 = vmatmul.mubr.msk.bf16.vlgmr.msra.gmra.mrb[120].mxu1 %vm1017_vm2, %v7560_v31  ;;  %v7709_v43 = vpop.permute.xlu1 %4752 }
 0x191   : > { %v7712_v37 = vadd.f32 %v1641_v19, %v7535_v30  ;;  %v1643_v22 = vpop.f32.mrb[17].mxu1  ;;  %4837 = vmatpush1.bf16.msra.mxu1 %v4783_v0  ;;  %4868 = vmatprep.mubr.bf16.mxu1 %v6307_v1  ;;  %v7715_v46 = vpop.permute.xlu0 %4750  ;;  %v4765_v30 = vsel %vm4760_vm8, %v7622_v49, %v7614_v47  ;;  %v7741_v47 = vld [vmem:[%s8092_s1 + $0xe] sm:$0x3] }
 0x192   : > { %v7722_v32 = vadd.f32 %v1643_v22, %v7541_v20  ;;  %v1645_v39 = vpop.f32.mrb[18].mxu1  ;;  %6146 = vmatprep.subr.msk.bf16.mxu1 %vm1021_vm1, %v4766_v60  ;;  %v4795_v3 = vsel %vm1021_vm1, %v4765_v30, 0  ;;  %v4774_v2 = vsel %vm4760_vm8, %v7692_v17, %v7715_v46 }
 0x193   : > { %v1646_v52 = vpop.f32.mrb[19].mxu1 }
 0x194   : > { %v1682_v25 = vpop.f32.mrb[20].mxu0  ;;  %6121 = vmatmul.mubr.msk.bf16.vlgmr.msra.gmra.mrb[124].mxu0 %vm1017_vm2, %v7560_v31  ;;  %v7733_v53 = vpop.permute.xlu1 %4756 }
 0x195   : > { %v7736_v20 = vadd.f32 %v1682_v25, %v7553_v38  ;;  %v1684_v18 = vpop.f32.mrb[21].mxu0  ;;  %4878 = vmatpush1.bf16.msra.mxu0 %v4789_v29  ;;  %4909 = vmatprep.mubr.bf16.mxu0 %v6307_v1  ;;  %v7744_v49 = vpop.permute.xlu0 %4754  ;;  %v4767_v38 = vsel %vm4760_vm8, %v7641_v11, %v7633_v7 }
 0x196   : > { %v7748_v31 = vadd.f32 %v1684_v18, %v7563_v48  ;;  %v1686_v44 = vpop.f32.mrb[22].mxu0  ;;  %6148 = vmatprep.subr.msk.bf16.mxu0 %vm1021_vm1, %v4768_v56  ;;  %v4801_v7 = vsel %vm1021_vm1, %v4767_v38, 0  ;;  %v4776_v39 = vsel %vm4760_vm8, %v7709_v43, %v7744_v49 }
 0x197   : > { %v1687_v6 = vpop.f32.mrb[23].mxu0 }
 0x198   : > { %v1723_v12 = vpop.f32.mrb[20].mxu1  ;;  %6143 = vmatmul.mubr.msk.bf16.vlgmr.msra.gmra.mrb[124].mxu1 %vm1017_vm2, %v7741_v47 }
 0x199   : > { %v7760_v40 = vadd.f32 %v1723_v12, %v7574_v45  ;;  %v1725_v48 = vpop.f32.mrb[21].mxu1  ;;  %4919 = vmatpush1.bf16.msra.mxu1 %v4795_v3  ;;  %4950 = vmatprep.mubr.bf16.mxu1 %v6307_v1  ;;  %v7763_v57 = vpop.permute.xlu1 %5225  ;;  %v4769_v45 = vsel %vm4760_vm8, %v7659_v62, %v7651_v4 }
 0x19a   : > { %v7767_v11 = vadd.f32 %v1725_v48, %v7581_v27  ;;  %v1727_v16 = vpop.f32.mrb[22].mxu1  ;;  %6150 = vmatprep.subr.msk.bf16.mxu1 %vm1021_vm1, %v4770_v14  ;;  %v4759_v26 = vpop.permute.xlu0 %4758  ;;  %v4807_v4 = vsel %vm1021_vm1, %v4769_v45, 0 }
 0x19b   : > { %v1728_v23 = vpop.f32.mrb[23].mxu1  ;;  %v4778_v44 = vsel %vm4760_vm8, %v7733_v53, %v4759_v26 }
 0x19c   : > { %v1764_v34 = vpop.f32.mrb[24].mxu0  ;;  %6145 = vmatmul.mubr.msk.bf16.vlgmr.msra.gmra.mrb[128].mxu0 %vm1017_vm2, %v7741_v47 }
 0x19d   : > { %v7779_v27 = vadd.f32 %v1764_v34, %v7593_v15  ;;  %v1766_v8 = vpop.f32.mrb[25].mxu0  ;;  %4960 = vmatpush1.bf16.msra.mxu0 %v4801_v7  ;;  %4991 = vmatprep.mubr.bf16.mxu0 %v6307_v1  ;;  %v7782_v9 = vpop.permute.xlu1 %5229  ;;  %v4771_v15 = vsel %vm4760_vm8, %v7678_v61, %v7670_v24 }
 0x19e   : > { %v7786_v62 = vadd.f32 %v1766_v8, %v7601_v36  ;;  %v1768_v42 = vpop.f32.mrb[26].mxu0  ;;  %6152 = vmatprep.subr.msk.bf16.mxu0 %vm1021_vm1, %v4772_v50  ;;  %v5228_v0 = vpop.permute.xlu0 %5227  ;;  %v4813_v24 = vsel %vm1021_vm1, %v4771_v15, 0 }
 0x19f   : > { %v1769_v10 = vpop.f32.mrb[27].mxu0  ;;  %v5265_v16 = vsel %vm5263_vm9, %v5228_v0, %v7782_v9 }
 0x1a0   : > { %v1805_v21 = vpop.f32.mrb[24].mxu1  ;;  %6147 = vmatmul.mubr.msk.bf16.vlgmr.msra.gmra.mrb[128].mxu1 %vm1017_vm2, %v7741_v47 }
 0x1a1   : > { %v7798_v36 = vadd.f32 %v1805_v21, %v7612_v41  ;;  %v1807_v60 = vpop.f32.mrb[25].mxu1  ;;  %5001 = vmatpush1.bf16.msra.mxu1 %v4807_v4  ;;  %5032 = vmatprep.mubr.bf16.mxu1 %v6307_v1  ;;  %v7801_v19 = vpop.permute.xlu1 %5233  ;;  %v4773_v41 = vsel %vm4760_vm8, %v7697_v5, %v7692_v17 }
 0x1a2   : > { %v7805_v61 = vadd.f32 %v1807_v60, %v7619_v59  ;;  %v1809_v22 = vpop.f32.mrb[26].mxu1  ;;  %6154 = vmatprep.subr.msk.bf16.mxu1 %vm1021_vm1, %v4774_v2  ;;  %v5232_v63 = vpop.permute.xlu0 %5231  ;;  %v4819_v17 = vsel %vm1021_vm1, %v4773_v41, 0 }
 0x1a3   : > { %v1810_v29 = vpop.f32.mrb[27].mxu1  ;;  %v5266_v2 = vsel %vm5263_vm9, %v7782_v9, %v5232_v63 }
 0x1a4   : > { %v1846_v30 = vpop.f32.mrb[28].mxu0  ;;  %6149 = vmatmul.mubr.msk.bf16.vlgmr.msra.gmra.mrb[132].mxu0 %vm1017_vm2, %v7741_v47  ;;  %v5292_v60 = vsel %vm1021_vm1, %v5266_v2, 0 }
 0x1a5   : > { %v7817_v59 = vadd.f32 %v1846_v30, %v7631_v54  ;;  %v1848_v52 = vpop.f32.mrb[29].mxu0  ;;  %5042 = vmatpush1.bf16.msra.mxu0 %v4813_v24  ;;  %5073 = vmatprep.mubr.bf16.mxu0 %v6307_v1  ;;  %v7820_v56 = vpop.permute.xlu1 %5237  ;;  %v4775_v54 = vsel %vm4760_vm8, %v7715_v46, %v7709_v43 }
 0x1a6   : > { %v7824_v5 = vadd.f32 %v1848_v52, %v7639_v33  ;;  %v1850_v25 = vpop.f32.mrb[30].mxu0  ;;  %6156 = vmatprep.subr.msk.bf16.mxu0 %vm1021_vm1, %v4776_v39  ;;  %v5236_v18 = vpop.permute.xlu0 %5235  ;;  %v4825_v43 = vsel %vm1021_vm1, %v4775_v54, 0  ;;  %v7904_v52 = vld [vmem:[%s8092_s1 + $0x10] sm:$0x3] }
 0x1a7   : > { %v1851_v3 = vpop.f32.mrb[31].mxu0  ;;  %v5268_v9 = vsel %vm5263_vm9, %v7801_v19, %v5236_v18 }
 0x1a8   : > { %v1887_v38 = vpop.f32.mrb[28].mxu1  ;;  %6151 = vmatmul.mubr.msk.bf16.vlgmr.msra.gmra.mrb[132].mxu1 %vm1017_vm2, %v7741_v47 }
 0x1a9   : > { %v7835_v33 = vadd.f32 %v1887_v38, %v7649_v55  ;;  %v1889_v6 = vpop.f32.mrb[29].mxu1  ;;  %5083 = vmatpush1.bf16.msra.mxu1 %v4819_v17  ;;  %5114 = vmatprep.mubr.bf16.mxu1 %v6307_v1  ;;  %v7838_v14 = vpop.permute.xlu1 %5241  ;;  %v4777_v55 = vsel %vm4760_vm8, %v7744_v49, %v7733_v53  ;;  %v5264_v49 = vsel %vm5263_vm9, %v7763_v57, %v5228_v0 }
 0x1aa   : > { %v7842_v46 = vadd.f32 %v1889_v6, %v7656_v35  ;;  %v1891_v12 = vpop.f32.mrb[30].mxu1  ;;  %6158 = vmatprep.subr.msk.bf16.mxu1 %vm1021_vm1, %v4778_v44  ;;  %v5240_v48 = vpop.permute.xlu0 %5239  ;;  %v4831_v23 = vsel %vm1021_vm1, %v4777_v55, 0  ;;  %v5286_v0 = vsel %vm1021_vm1, %v5264_v49, 0 }
 0x1ab   : > { %v1892_v7 = vpop.f32.mrb[31].mxu1 }
 0x1ac   : > { %v1928_v26 = vpop.f32.mrb[32].mxu0  ;;  %6153 = vmatmul.mubr.msk.bf16.vlgmr.msra.gmra.mrb[136].mxu0 %vm1017_vm2, %v7741_v47 }
 0x1ad   : > { %v7853_v45 = vadd.f32 %v1928_v26, %v7668_v13  ;;  %v1930_v35 = vpop.f32.mrb[33].mxu0  ;;  %5124 = vmatpush1.bf16.msra.mxu0 %v4825_v43  ;;  %5155 = vmatprep.mubr.bf16.mxu0 %v6307_v1  ;;  %v5267_v13 = vsel %vm5263_vm9, %v5232_v63, %v7801_v19  ;;  %v7865_v8 = vpop.permute.xlu1 %5245  ;;  %v5271_v63 = vsel %vm5263_vm9, %v5240_v48, %v7838_v14  ;;  %v5298_v19 = vsel %vm1021_vm1, %v5268_v9, 0 }
 0x1ae   : > { %v7858_v50 = vadd.f32 %v1930_v35, %v7675_v51  ;;  %v1932_v53 = vpop.f32.mrb[34].mxu0  ;;  %6161 = vmatprep.subr.msk.bf16.mxu0 %vm1021_vm1, %v5265_v16  ;;  %v5244_v42 = vpop.permute.xlu0 %5243 }
 0x1af   : > { %v1933_v34 = vpop.f32.mrb[35].mxu0 }
 0x1b0   : > { %v1969_v4 = vpop.f32.mrb[32].mxu1  ;;  %6155 = vmatmul.mubr.msk.bf16.vlgmr.msra.gmra.mrb[136].mxu1 %vm1017_vm2, %v7741_v47 }
 0x1b1   : > { %v7870_v51 = vadd.f32 %v1969_v4, %v7690_v58  ;;  %v1971_v15 = vpop.f32.mrb[33].mxu1  ;;  %5165 = vmatpush1.bf16.msra.mxu1 %v4831_v23  ;;  %5196 = vmatprep.mubr.bf16.mxu1 %v6307_v1  ;;  %v5269_v58 = vsel %vm5263_vm9, %v5236_v18, %v7820_v56 }
 0x1b2   : > { %v7874_v57 = vadd.f32 %v1971_v15, %v7694_v28  ;;  %6163 = vmatprep.subr.msk.bf16.mxu1 %vm1021_vm1, %v5267_v13  ;;  %v1973_v10 = vpop.f32.mrb[34].mxu1  ;;  %v7885_v28 = vpop.permute.xlu1 %5249 }
 0x1b3   : > { %v1974_v21 = vpop.f32.mrb[35].mxu1  ;;  %v5248_v24 = vpop.permute.xlu0 %5247 }
 0x1b4   : > { %6157 = vmatmul.mubr.msk.bf16.vlgmr.msra.gmra.mrb[140].mxu0 %vm1017_vm2, %v7741_v47  ;;  %v5275_v12 = vsel %vm5263_vm9, %v5248_v24, %v7885_v28  ;;  %v5274_v23 = vsel %vm5263_vm9, %v7865_v8, %v5248_v24 }
 0x1b5   : > { %5340 = vmatpush1.bf16.msra.mxu0 %v5286_v0  ;;  %5371 = vmatprep.mubr.bf16.mxu0 %v6307_v1  ;;  %v5316_v4 = vsel %vm1021_vm1, %v5274_v23, 0 }
 0x1b6   : > { %6165 = vmatprep.subr.msk.bf16.mxu0 %vm1021_vm1, %v5269_v58  ;;  %v5254_v25 = vpop.permute.xlu1 %5253 }
 0x1b7   : > { %v2184_v22 = vpop.f32.mrb[36].mxu0  ;;  %v5252_v3 = vpop.permute.xlu0 %5251 }
 0x1b8   : > { %v7894_v41 = vadd.f32 %v2184_v22, %v7712_v37  ;;  %v2186_v29 = vpop.f32.mrb[37].mxu0  ;;  %6159 = vmatmul.mubr.msk.bf16.vlgmr.msra.gmra.mrb[140].mxu1 %vm1017_vm2, %v7741_v47  ;;  %v5270_v47 = vsel %vm5263_vm9, %v7820_v56, %v5240_v48  ;;  %v5277_v53 = vsel %vm5263_vm9, %v5252_v3, %v5254_v25 }
 0x1b9   : > { %v7899_v39 = vadd.f32 %v2186_v29, %v7722_v32  ;;  %5381 = vmatpush1.bf16.msra.mxu1 %v5292_v60  ;;  %v2188_v30 = vpop.f32.mrb[38].mxu0  ;;  %5412 = vmatprep.mubr.bf16.mxu1 %v6307_v1  ;;  %v5273_v32 = vsel %vm5263_vm9, %v5244_v42, %v7865_v8  ;;  %v5304_v56 = vsel %vm1021_vm1, %v5270_v47, 0 }
 0x1ba   : > { %v2189_v37 = vpop.f32.mrb[39].mxu0  ;;  %6167 = vmatprep.subr.msk.bf16.mxu1 %vm1021_vm1, %v5271_v63  ;;  %v5258_v16 = vpop.permute.xlu1 %5257 }
 0x1bb   : > { %v2225_v17 = vpop.f32.mrb[36].mxu1  ;;  %v5256_v35 = vpop.permute.xlu0 %5255 }
 0x1bc   : > { %v7914_v18 = vadd.f32 %v2225_v17, %v7736_v20  ;;  %v2227_v54 = vpop.f32.mrb[37].mxu1  ;;  %6162 = vmatmul.mubr.msk.bf16.vlgmr.msra.gmra.mrb[144].mxu0 %vm1017_vm2, %v7904_v52  ;;  %v5272_v20 = vsel %vm5263_vm9, %v7838_v14, %v5244_v42  ;;  %v5279_v15 = vsel %vm5263_vm9, %v5256_v35, %v5258_v16 }
 0x1bd   : > { %v7919_v44 = vadd.f32 %v2227_v54, %v7748_v31  ;;  %5422 = vmatpush1.bf16.msra.mxu0 %v5298_v19  ;;  %v2229_v38 = vpop.f32.mrb[38].mxu1  ;;  %5453 = vmatprep.mubr.bf16.mxu0 %v6307_v1  ;;  %v5310_v14 = vsel %vm1021_vm1, %v5272_v20, 0 }
 0x1be   : > { %v2230_v6 = vpop.f32.mrb[39].mxu1  ;;  %6169 = vmatprep.subr.msk.bf16.mxu0 %vm1021_vm1, %v5273_v32  ;;  %v5262_v0 = vpop.permute.xlu1 %5261 }
 0x1bf   : > { %v2266_v43 = vpop.f32.mrb[40].mxu0  ;;  %v5260_v2 = vpop.permute.xlu0 %5259 }
 0x1c0   : > { %v7929_v48 = vadd.f32 %v2266_v43, %v7760_v40  ;;  %v2268_v31 = vpop.f32.mrb[41].mxu0  ;;  %6164 = vmatmul.mubr.msk.bf16.vlgmr.msra.gmra.mrb[144].mxu1 %vm1017_vm2, %v7904_v52  ;;  %v5281_v22 = vsel %vm5263_vm9, %v5260_v2, %v5262_v0 }
 0x1c1   : > { %v7934_v55 = vadd.f32 %v2268_v31, %v7767_v11  ;;  %5463 = vmatpush1.bf16.msra.mxu1 %v5304_v56  ;;  %v2270_v7 = vpop.f32.mrb[42].mxu0  ;;  %5494 = vmatprep.mubr.bf16.mxu1 %v6307_v1 }
 0x1c2   : > { %v2271_v26 = vpop.f32.mrb[43].mxu0  ;;  %6171 = vmatprep.subr.msk.bf16.mxu1 %vm1021_vm1, %v5275_v12 }
 0x1c3   : > { %v2307_v40 = vpop.f32.mrb[40].mxu1 }
 0x1c4   : > { %v7943_v11 = vadd.f32 %v2307_v40, %v7779_v27  ;;  %v2309_v49 = vpop.f32.mrb[41].mxu1  ;;  %6166 = vmatmul.mubr.msk.bf16.vlgmr.msra.gmra.mrb[148].mxu0 %vm1017_vm2, %v7904_v52  ;;  %v5276_v27 = vsel %vm5263_vm9, %v7885_v28, %v5252_v3 }
 0x1c5   : > { %v7948_v34 = vadd.f32 %v2309_v49, %v7786_v62  ;;  %5504 = vmatpush1.bf16.msra.mxu0 %v5310_v14  ;;  %v2311_v13 = vpop.f32.mrb[42].mxu1  ;;  %5535 = vmatprep.mubr.bf16.mxu0 %v6307_v1  ;;  %v5322_v28 = vsel %vm1021_vm1, %v5276_v27, 0 }
 0x1c6   : > { %v2312_v42 = vpop.f32.mrb[43].mxu1  ;;  %6173 = vmatprep.subr.msk.bf16.mxu0 %vm1021_vm1, %v5277_v53 }
 0x1c7   : > { %v2348_v8 = vpop.f32.mrb[44].mxu0 }
 0x1c8   : > { %v7957_v10 = vadd.f32 %v2348_v8, %v7798_v36  ;;  %v2350_v62 = vpop.f32.mrb[45].mxu0  ;;  %6168 = vmatmul.mubr.msk.bf16.vlgmr.msra.gmra.mrb[148].mxu1 %vm1017_vm2, %v7904_v52  ;;  %v5278_v36 = vsel %vm5263_vm9, %v5254_v25, %v5256_v35 }
 0x1c9   : > { %v7962_v21 = vadd.f32 %v2350_v62, %v7805_v61  ;;  %5545 = vmatpush1.bf16.msra.mxu1 %v5316_v4  ;;  %v2352_v58 = vpop.f32.mrb[46].mxu0  ;;  %5576 = vmatprep.mubr.bf16.mxu1 %v6307_v1  ;;  %v5328_v30 = vsel %vm1021_vm1, %v5278_v36, 0 }
 0x1ca   : > { %v2353_v60 = vpop.f32.mrb[47].mxu0  ;;  %6175 = vmatprep.subr.msk.bf16.mxu1 %vm1021_vm1, %v5279_v15 }
 0x1cb   : > { %v2389_v24 = vpop.f32.mrb[44].mxu1 }
 0x1cc   : > { %v7970_v9 = vadd.f32 %v2389_v24, %v7817_v59  ;;  %v2391_v63 = vpop.f32.mrb[45].mxu1  ;;  %6170 = vmatmul.mubr.msk.bf16.vlgmr.msra.gmra.mrb[152].mxu0 %vm1017_vm2, %v7904_v52  ;;  %v5280_v59 = vsel %vm5263_vm9, %v5258_v16, %v5260_v2 }
 0x1cd   : > { %v7975_v61 = vadd.f32 %v2391_v63, %v7824_v5  ;;  %5586 = vmatpush1.bf16.msra.mxu0 %v5322_v28  ;;  %v2393_v29 = vpop.f32.mrb[46].mxu1  ;;  %5617 = vmatprep.mubr.bf16.mxu0 %v6307_v1  ;;  %v5334_v25 = vsel %vm1021_vm1, %v5280_v59, 0 }
 0x1ce   : > { %v2394_v19 = vpop.f32.mrb[47].mxu1  ;;  %6177 = vmatprep.subr.msk.bf16.mxu0 %vm1021_vm1, %v5281_v22 }
 0x1cf   : > { %v2430_v37 = vpop.f32.mrb[48].mxu0 }
 0x1d0   : > { %v7982_v17 = vadd.f32 %v2430_v37, %v7835_v33  ;;  %v2432_v47 = vpop.f32.mrb[49].mxu0  ;;  %6172 = vmatmul.mubr.msk.bf16.vlgmr.msra.gmra.mrb[152].mxu1 %vm1017_vm2, %v7904_v52 }
 0x1d1   : > { %v2532_v5 = vadd.f32 %v2432_v47, %v7842_v46  ;;  %5627 = vmatpush1.bf16.msra.mxu1 %v5328_v30  ;;  %v2434_v32 = vpop.f32.mrb[50].mxu0  ;;  %5658 = vmatprep.mubr.bf16.mxu1 %v6307_v1 }
 0x1d2   : > { %v2435_v54 = vpop.f32.mrb[51].mxu0 }
 0x1d3   : > { %v2471_v3 = vpop.f32.mrb[48].mxu1 }
 0x1d4   : > { %v2533_v38 = vadd.f32 %v2471_v3, %v7853_v45  ;;  %v2473_v56 = vpop.f32.mrb[49].mxu1  ;;  %6174 = vmatmul.mubr.msk.bf16.vlgmr.msra.gmra.mrb[156].mxu0 %vm1017_vm2, %v7904_v52 }
 0x1d5   : > { %v2534_v33 = vadd.f32 %v2473_v56, %v7858_v50  ;;  %5668 = vmatpush1.bf16.msra.mxu0 %v5334_v25  ;;  %v2475_v6 = vpop.f32.mrb[50].mxu1  ;;  %5699 = vmatprep.mubr.bf16.mxu0 %v6307_v1 }
 0x1d6   : > { %v2476_v46 = vpop.f32.mrb[51].mxu1 }
 0x1d7   : > { %v2512_v43 = vpop.f32.mrb[52].mxu0 }
 0x1d8   : > { %v2535_v20 = vadd.f32 %v2512_v43, %v7870_v51  ;;  %v2514_v12 = vpop.f32.mrb[53].mxu0  ;;  %6176 = vmatmul.mubr.msk.bf16.vlgmr.msra.gmra.mrb[156].mxu1 %vm1017_vm2, %v7904_v52 }
 0x1d9   : > { %v2536_v45 = vadd.f32 %v2514_v12, %v7874_v57  ;;  %v2516_v31 = vpop.f32.mrb[54].mxu0 }
 0x1da   : > { %v2517_v7 = vpop.f32.mrb[55].mxu0 }
 0x1db   : > { %v2687_v16 = vpop.f32.mrb[52].mxu1 }
 0x1dc   : > { %v3022_v14 = vadd.f32 %v2687_v16, %v7894_v41  ;;  %v2689_v50 = vpop.f32.mrb[53].mxu1  ;;  %6178 = vmatmul.mubr.msk.bf16.vlgmr.msra.gmra.mrb[160].mxu0 %vm1017_vm2, %v7904_v52 }
 0x1dd   : > { %v3023_v1 = vadd.f32 %v2689_v50, %v7899_v39  ;;  %v2691_v26 = vpop.f32.mrb[54].mxu1 }
 0x1de   : > { %v2692_v35 = vpop.f32.mrb[55].mxu1 }
 0x1df   : > { %v2728_v51 = vpop.f32.mrb[56].mxu0 }
 0x1e0   : > { %v3024_v40 = vadd.f32 %v2728_v51, %v7914_v18  ;;  %v2730_v23 = vpop.f32.mrb[57].mxu0 }
 0x1e1   : > { %v3025_v53 = vadd.f32 %v2730_v23, %v7919_v44  ;;  %v2732_v57 = vpop.f32.mrb[58].mxu0 }
 0x1e2   : > { %v2733_v49 = vpop.f32.mrb[59].mxu0 }
 0x1e3   : > { %v2769_v13 = vpop.f32.mrb[56].mxu1 }
 0x1e4   : > { %v3026_v4 = vadd.f32 %v2769_v13, %v7929_v48  ;;  %v2771_v41 = vpop.f32.mrb[57].mxu1 }
 0x1e5   : > { %v3027_v42 = vadd.f32 %v2771_v41, %v7934_v55  ;;  %v2773_v8 = vpop.f32.mrb[58].mxu1 }
 0x1e6   : > { %v2774_v52 = vpop.f32.mrb[59].mxu1 }
 0x1e7   : > { %v2810_v27 = vpop.f32.mrb[60].mxu0 }
 0x1e8   : > { %v3028_v39 = vadd.f32 %v2810_v27, %v7943_v11  ;;  %v2812_v15 = vpop.f32.mrb[61].mxu0 }
 0x1e9   : > { %v3029_v0 = vadd.f32 %v2812_v15, %v7948_v34  ;;  %v2814_v18 = vpop.f32.mrb[62].mxu0 }
 0x1ea   : > { %v2815_v62 = vpop.f32.mrb[63].mxu0 }
 0x1eb   : > { %v2851_v2 = vpop.f32.mrb[60].mxu1 }
 0x1ec   : > { %v3030_v44 = vadd.f32 %v2851_v2, %v7957_v10  ;;  %v2853_v58 = vpop.f32.mrb[61].mxu1 }
 0x1ed   : > { %v3031_v28 = vadd.f32 %v2853_v58, %v7962_v21  ;;  %v2855_v48 = vpop.f32.mrb[62].mxu1 }
 0x1ee   : > { %v2856_v60 = vpop.f32.mrb[63].mxu1 }
 0x1ef   : > { %v2892_v24 = vpop.f32.mrb[64].mxu0 }
 0x1f0   : > { %v3032_v55 = vadd.f32 %v2892_v24, %v7970_v9  ;;  %v2894_v36 = vpop.f32.mrb[65].mxu0 }
 0x1f1   : > { %v3033_v22 = vadd.f32 %v2894_v36, %v7975_v61  ;;  %v2896_v11 = vpop.f32.mrb[66].mxu0 }
 0x1f2   : > { %v2897_v63 = vpop.f32.mrb[67].mxu0 }
 0x1f3   : > { %v2933_v29 = vpop.f32.mrb[64].mxu1 }
 0x1f4   : > { %v3034_v34 = vadd.f32 %v2933_v29, %v7982_v17  ;;  %v2935_v30 = vpop.f32.mrb[65].mxu1 }
 0x1f5   : > { %v3035_v19 = vadd.f32 %v2935_v30, %v2532_v5  ;;  %v2937_v37 = vpop.f32.mrb[66].mxu1 }
 0x1f6   : > { %v2938_v10 = vpop.f32.mrb[67].mxu1 }
 0x1f7   : > { %v2974_v59 = vpop.f32.mrb[68].mxu0 }
 0x1f8   : > { %v3036_v47 = vadd.f32 %v2974_v59, %v2533_v38  ;;  %v2976_v21 = vpop.f32.mrb[69].mxu0 }
 0x1f9   : > { %v3037_v32 = vadd.f32 %v2976_v21, %v2534_v33  ;;  %v2978_v25 = vpop.f32.mrb[70].mxu0 }
 0x1fa   : > { %v2979_v54 = vpop.f32.mrb[71].mxu0 }
 0x1fb   : > { %v3015_v3 = vpop.f32.mrb[68].mxu1 }
 0x1fc   : > { %v3038_v9 = vadd.f32 %v3015_v3, %v2535_v20  ;;  %v3017_v56 = vpop.f32.mrb[69].mxu1 }
 0x1fd   : > { %v3039_v6 = vadd.f32 %v3017_v56, %v2536_v45  ;;  %v3019_v61 = vpop.f32.mrb[70].mxu1 }
 0x1fe   : > { %v3020_v46 = vpop.f32.mrb[71].mxu1 }
 0x1ff   : > { %v3187_v43 = vpop.f32.mrb[72].mxu0 }
 0x200   : > { %v3522_v12 = vadd.f32 %v3187_v43, %v3022_v14  ;;  %v3189_v31 = vpop.f32.mrb[73].mxu0 }
 0x201   : > { %v3523_v17 = vadd.f32 %v3189_v31, %v3023_v1  ;;  %v3191_v7 = vpop.f32.mrb[74].mxu0 }
 0x202   : > { %v3192_v5 = vpop.f32.mrb[75].mxu0 }
 0x203   : > { %v3228_v16 = vpop.f32.mrb[72].mxu1 }
 0x204   : > { %v3524_v50 = vadd.f32 %v3228_v16, %v3024_v40  ;;  %v3230_v26 = vpop.f32.mrb[73].mxu1 }
 0x205   : > { %v3525_v38 = vadd.f32 %v3230_v26, %v3025_v53  ;;  %v3232_v35 = vpop.f32.mrb[74].mxu1 }
 0x206   : > { %v3233_v33 = vpop.f32.mrb[75].mxu1 }
 0x207   : > { %v3269_v51 = vpop.f32.mrb[76].mxu0 }
 0x208   : > { %v3526_v23 = vadd.f32 %v3269_v51, %v3026_v4  ;;  %v3271_v57 = vpop.f32.mrb[77].mxu0 }
 0x209   : > { %v3527_v20 = vadd.f32 %v3271_v57, %v3027_v42  ;;  %v3273_v49 = vpop.f32.mrb[78].mxu0 }
 0x20a   : > { %v3274_v45 = vpop.f32.mrb[79].mxu0 }
 0x20b   : > { %v3310_v13 = vpop.f32.mrb[76].mxu1 }
 0x20c   : > { %v3528_v41 = vadd.f32 %v3310_v13, %v3028_v39  ;;  %v3312_v8 = vpop.f32.mrb[77].mxu1 }
 0x20d   : > { %v3529_v14 = vadd.f32 %v3312_v8, %v3029_v0  ;;  %v3314_v52 = vpop.f32.mrb[78].mxu1 }
 0x20e   : > { %v3315_v1 = vpop.f32.mrb[79].mxu1 }
 0x20f   : > { %v3351_v27 = vpop.f32.mrb[80].mxu0 }
 0x210   : > { %v3530_v15 = vadd.f32 %v3351_v27, %v3030_v44  ;;  %v3353_v18 = vpop.f32.mrb[81].mxu0 }
 0x211   : > { %v3531_v40 = vadd.f32 %v3353_v18, %v3031_v28  ;;  %v3355_v62 = vpop.f32.mrb[82].mxu0 }
 0x212   : > { %v3356_v53 = vpop.f32.mrb[83].mxu0 }
 0x213   : > { %v3392_v2 = vpop.f32.mrb[80].mxu1 }
 0x214   : > { %v3532_v58 = vadd.f32 %v3392_v2, %v3032_v55  ;;  %v3394_v48 = vpop.f32.mrb[81].mxu1 }
 0x215   : > { %v3533_v4 = vadd.f32 %v3394_v48, %v3033_v22  ;;  %v3396_v60 = vpop.f32.mrb[82].mxu1 }
 0x216   : > { %v3397_v42 = vpop.f32.mrb[83].mxu1 }
 0x217   : > { %v3433_v24 = vpop.f32.mrb[84].mxu0 }
 0x218   : > { %v3534_v36 = vadd.f32 %v3433_v24, %v3034_v34  ;;  %v3435_v11 = vpop.f32.mrb[85].mxu0 }
 0x219   : > { %v3535_v39 = vadd.f32 %v3435_v11, %v3035_v19  ;;  %v3437_v63 = vpop.f32.mrb[86].mxu0 }
 0x21a   : > { %v3438_v0 = vpop.f32.mrb[87].mxu0 }
 0x21b   : > { %v3474_v29 = vpop.f32.mrb[84].mxu1 }
 0x21c   : > { %v3536_v30 = vadd.f32 %v3474_v29, %v3036_v47  ;;  %v3476_v37 = vpop.f32.mrb[85].mxu1 }
 0x21d   : > { %v3537_v44 = vadd.f32 %v3476_v37, %v3037_v32  ;;  %v3478_v10 = vpop.f32.mrb[86].mxu1 }
 0x21e   : > { %v3479_v28 = vpop.f32.mrb[87].mxu1 }
 0x21f   : > { %v3515_v59 = vpop.f32.mrb[88].mxu0 }
 0x220   : > { %v3538_v21 = vadd.f32 %v3515_v59, %v3038_v9  ;;  %v3517_v25 = vpop.f32.mrb[89].mxu0 }
 0x221   : > { %v3539_v55 = vadd.f32 %v3517_v25, %v3039_v6  ;;  %v3519_v54 = vpop.f32.mrb[90].mxu0 }
 0x222   : > { %v3520_v22 = vpop.f32.mrb[91].mxu0 }
 0x223   : > { %v3748_v3 = vpop.f32.mrb[88].mxu1 }
 0x224   : > { %v4083_v56 = vadd.f32 %v3748_v3, %v3522_v12  ;;  %v3750_v61 = vpop.f32.mrb[89].mxu1 }
 0x225   : > { %v4084_v34 = vadd.f32 %v3750_v61, %v3523_v17  ;;  %v3752_v46 = vpop.f32.mrb[90].mxu1 }
 0x226   : > { %v3753_v19 = vpop.f32.mrb[91].mxu1 }
 0x227   : > { %v3789_v43 = vpop.f32.mrb[92].mxu0 }
 0x228   : > { %v4085_v31 = vadd.f32 %v3789_v43, %v3524_v50  ;;  %v3791_v7 = vpop.f32.mrb[93].mxu0 }
 0x229   : > { %v4086_v47 = vadd.f32 %v3791_v7, %v3525_v38  ;;  %v3793_v5 = vpop.f32.mrb[94].mxu0 }
 0x22a   : > { %v3794_v32 = vpop.f32.mrb[95].mxu0 }
 0x22b   : > { %v3830_v16 = vpop.f32.mrb[92].mxu1 }
 0x22c   : > { %v4087_v26 = vadd.f32 %v3830_v16, %v3526_v23  ;;  %v3832_v35 = vpop.f32.mrb[93].mxu1 }
 0x22d   : > { %v4088_v9 = vadd.f32 %v3832_v35, %v3527_v20  ;;  %v3834_v33 = vpop.f32.mrb[94].mxu1 }
 0x22e   : > { %v3835_v6 = vpop.f32.mrb[95].mxu1 }
 0x22f   : > { %v3871_v51 = vpop.f32.mrb[96].mxu0 }
 0x230   : > { %v4089_v57 = vadd.f32 %v3871_v51, %v3528_v41  ;;  %v3873_v49 = vpop.f32.mrb[97].mxu0 }
 0x231   : > { %v4090_v12 = vadd.f32 %v3873_v49, %v3529_v14  ;;  %v3875_v45 = vpop.f32.mrb[98].mxu0 }
 0x232   : > { %v3876_v17 = vpop.f32.mrb[99].mxu0 }
 0x233   : > { %v3912_v13 = vpop.f32.mrb[96].mxu1 }
 0x234   : > { %v4091_v8 = vadd.f32 %v3912_v13, %v3530_v15  ;;  %v3914_v52 = vpop.f32.mrb[97].mxu1 }
 0x235   : > { %v4092_v50 = vadd.f32 %v3914_v52, %v3531_v40  ;;  %v3916_v1 = vpop.f32.mrb[98].mxu1 }
 0x236   : > { %v3917_v38 = vpop.f32.mrb[99].mxu1 }
 0x237   : > { %v3953_v27 = vpop.f32.mrb[100].mxu0 }
 0x238   : > { %v4093_v18 = vadd.f32 %v3953_v27, %v3532_v58  ;;  %v3955_v62 = vpop.f32.mrb[101].mxu0 }
 0x239   : > { %v4094_v23 = vadd.f32 %v3955_v62, %v3533_v4  ;;  %v3957_v53 = vpop.f32.mrb[102].mxu0 }
 0x23a   : > { %v3958_v20 = vpop.f32.mrb[103].mxu0 }
 0x23b   : > { %v3994_v2 = vpop.f32.mrb[100].mxu1 }
 0x23c   : > { %v4095_v48 = vadd.f32 %v3994_v2, %v3534_v36  ;;  %v3996_v60 = vpop.f32.mrb[101].mxu1 }
 0x23d   : > { %v4096_v41 = vadd.f32 %v3996_v60, %v3535_v39  ;;  %v3998_v42 = vpop.f32.mrb[102].mxu1 }
 0x23e   : > { %v3999_v14 = vpop.f32.mrb[103].mxu1 }
 0x23f   : > { %v4035_v24 = vpop.f32.mrb[104].mxu0 }
 0x240   : > { %v4097_v11 = vadd.f32 %v4035_v24, %v3536_v30  ;;  %v4037_v63 = vpop.f32.mrb[105].mxu0 }
 0x241   : > { %v4098_v15 = vadd.f32 %v4037_v63, %v3537_v44  ;;  %v4039_v0 = vpop.f32.mrb[106].mxu0 }
 0x242   : > { %v4040_v40 = vpop.f32.mrb[107].mxu0 }
 0x243   : > { %v4076_v29 = vpop.f32.mrb[104].mxu1 }
 0x244   : > { %v4099_v37 = vadd.f32 %v4076_v29, %v3538_v21  ;;  %v4078_v10 = vpop.f32.mrb[105].mxu1 }
 0x245   : > { %v4100_v58 = vadd.f32 %v4078_v10, %v3539_v55  ;;  %v4080_v28 = vpop.f32.mrb[106].mxu1 }
 0x246   : > { %v4081_v4 = vpop.f32.mrb[107].mxu1 }
 0x247   : > { %v4309_v59 = vpop.f32.mrb[108].mxu0 }
 0x248   : > { %v4644_v25 = vadd.f32 %v4309_v59, %v4083_v56  ;;  %v4311_v54 = vpop.f32.mrb[109].mxu0 }
 0x249   : > { %v4645_v36 = vadd.f32 %v4311_v54, %v4084_v34  ;;  %v4313_v22 = vpop.f32.mrb[110].mxu0 }
 0x24a   : > { %v4314_v39 = vpop.f32.mrb[111].mxu0 }
 0x24b   : > { %v4350_v3 = vpop.f32.mrb[108].mxu1 }
 0x24c   : > { %v4646_v61 = vadd.f32 %v4350_v3, %v4085_v31  ;;  %v4352_v46 = vpop.f32.mrb[109].mxu1 }
 0x24d   : > { %v4647_v30 = vadd.f32 %v4352_v46, %v4086_v47  ;;  %v4354_v19 = vpop.f32.mrb[110].mxu1 }
 0x24e   : > { %v4355_v44 = vpop.f32.mrb[111].mxu1 }
 0x24f   : > { %v4391_v43 = vpop.f32.mrb[112].mxu0 }
 0x250   : > { %v4648_v7 = vadd.f32 %v4391_v43, %v4087_v26  ;;  %v4393_v5 = vpop.f32.mrb[113].mxu0 }
 0x251   : > { %v4649_v21 = vadd.f32 %v4393_v5, %v4088_v9  ;;  %v4395_v32 = vpop.f32.mrb[114].mxu0 }
 0x252   : > { %v4396_v55 = vpop.f32.mrb[115].mxu0 }
 0x253   : > { %v4432_v16 = vpop.f32.mrb[112].mxu1 }
 0x254   : > { %v4650_v35 = vadd.f32 %v4432_v16, %v4089_v57  ;;  %v4434_v33 = vpop.f32.mrb[113].mxu1 }
 0x255   : > { %v4651_v56 = vadd.f32 %v4434_v33, %v4090_v12  ;;  %v4436_v6 = vpop.f32.mrb[114].mxu1 }
 0x256   : > { %v4437_v34 = vpop.f32.mrb[115].mxu1 }
 0x257   : > { %v4473_v51 = vpop.f32.mrb[116].mxu0 }
 0x258   : > { %v4652_v49 = vadd.f32 %v4473_v51, %v4091_v8  ;;  %v4475_v45 = vpop.f32.mrb[117].mxu0 }
 0x259   : > { %v4653_v31 = vadd.f32 %v4475_v45, %v4092_v50  ;;  %v4477_v17 = vpop.f32.mrb[118].mxu0 }
 0x25a   : > { %v4478_v47 = vpop.f32.mrb[119].mxu0 }
 0x25b   : > { %v4514_v13 = vpop.f32.mrb[116].mxu1 }
 0x25c   : > { %v4654_v52 = vadd.f32 %v4514_v13, %v4093_v18  ;;  %v4516_v1 = vpop.f32.mrb[117].mxu1 }
 0x25d   : > { %v4655_v26 = vadd.f32 %v4516_v1, %v4094_v23  ;;  %v4518_v38 = vpop.f32.mrb[118].mxu1 }
 0x25e   : > { %v4519_v9 = vpop.f32.mrb[119].mxu1 }
 0x25f   : > { %v4555_v27 = vpop.f32.mrb[120].mxu0 }
 0x260   : > { %v4656_v62 = vadd.f32 %v4555_v27, %v4095_v48  ;;  %v4557_v53 = vpop.f32.mrb[121].mxu0 }
 0x261   : > { %v4657_v57 = vadd.f32 %v4557_v53, %v4096_v41  ;;  %v4559_v20 = vpop.f32.mrb[122].mxu0 }
 0x262   : > { %v4560_v12 = vpop.f32.mrb[123].mxu0 }
 0x263   : > { %v4596_v2 = vpop.f32.mrb[120].mxu1 }
 0x264   : > { %v4658_v60 = vadd.f32 %v4596_v2, %v4097_v11  ;;  %v4598_v42 = vpop.f32.mrb[121].mxu1 }
 0x265   : > { %v4659_v8 = vadd.f32 %v4598_v42, %v4098_v15  ;;  %v4600_v14 = vpop.f32.mrb[122].mxu1 }
 0x266   : > { %v4601_v50 = vpop.f32.mrb[123].mxu1 }
 0x267   : > { %v4637_v24 = vpop.f32.mrb[124].mxu0  ;;  %v8039_v50 = vpop.permute.xlu0 %5729 }
 0x268   : > { %v4660_v63 = vadd.f32 %v4637_v24, %v4099_v37  ;;  %v4639_v0 = vpop.f32.mrb[125].mxu0 }
 0x269   : > { %v4661_v18 = vadd.f32 %v4639_v0, %v4100_v58  ;;  %v4641_v40 = vpop.f32.mrb[126].mxu0 }
 0x26a   : > { %v4642_v23 = vpop.f32.mrb[127].mxu0 }
 0x26b   : > { %v4870_v29 = vpop.f32.mrb[124].mxu1 }
 0x26c   : > { %v5205_v10 = vadd.f32 %v4870_v29, %v4644_v25  ;;  %v4872_v28 = vpop.f32.mrb[125].mxu1 }
 0x26d   : > { %v5206_v48 = vadd.f32 %v4872_v28, %v4645_v36  ;;  %v4874_v4 = vpop.f32.mrb[126].mxu1 }
 0x26e   : > { %v4875_v41 = vpop.f32.mrb[127].mxu1 }
 0x26f   : > { %v4911_v59 = vpop.f32.mrb[128].mxu0 }
 0x270   : > { %v5207_v54 = vadd.f32 %v4911_v59, %v4646_v61  ;;  %v4913_v22 = vpop.f32.mrb[129].mxu0 }
 0x271   : > { %v5208_v11 = vadd.f32 %v4913_v22, %v4647_v30  ;;  %v4915_v39 = vpop.f32.mrb[130].mxu0 }
 0x272   : > { %v4916_v15 = vpop.f32.mrb[131].mxu0 }
 0x273   : > { %v4952_v3 = vpop.f32.mrb[128].mxu1 }
 0x274   : > { %v5209_v46 = vadd.f32 %v4952_v3, %v4648_v7  ;;  %v4954_v19 = vpop.f32.mrb[129].mxu1 }
 0x275   : > { %v8013_v37 = vadd.f32 %v4954_v19, %v4649_v21  ;;  %v4956_v58 = vpop.f32.mrb[130].mxu1 }
 0x276   : > { %v4957_v44 = vpop.f32.mrb[131].mxu1 }
 0x277   : > { %v4993_v43 = vpop.f32.mrb[132].mxu0 }
 0x278   : > { %v8015_v5 = vadd.f32 %v4993_v43, %v4650_v35  ;;  %v4995_v25 = vpop.f32.mrb[133].mxu0 }
 0x279   : > { %v8017_v36 = vadd.f32 %v4995_v25, %v4651_v56  ;;  %v4997_v32 = vpop.f32.mrb[134].mxu0 }
 0x27a   : > { %v4998_v55 = vpop.f32.mrb[135].mxu0 }
 0x27b   : > { %v5034_v61 = vpop.f32.mrb[132].mxu1 }
 0x27c   : > { %v8019_v16 = vadd.f32 %v5034_v61, %v4652_v49  ;;  %v5036_v30 = vpop.f32.mrb[133].mxu1 }
 0x27d   : > { %v8021_v33 = vadd.f32 %v5036_v30, %v4653_v31  ;;  %v5038_v7 = vpop.f32.mrb[134].mxu1 }
 0x27e   : > { %v5039_v6 = vpop.f32.mrb[135].mxu1 }
 0x27f   : > { %v5075_v21 = vpop.f32.mrb[136].mxu0 }
 0x280   : > { %v8023_v34 = vadd.f32 %v5075_v21, %v4654_v52  ;;  %v5077_v51 = vpop.f32.mrb[137].mxu0 }
 0x281   : > { %v8025_v45 = vadd.f32 %v5077_v51, %v4655_v26  ;;  %v5079_v35 = vpop.f32.mrb[138].mxu0 }
 0x282   : > { %v5080_v17 = vpop.f32.mrb[139].mxu0 }
 0x283   : > { %v5116_v56 = vpop.f32.mrb[136].mxu1 }
 0x284   : > { %v8027_v47 = vadd.f32 %v5116_v56, %v4656_v62  ;;  %v5118_v13 = vpop.f32.mrb[137].mxu1 }
 0x285   : > { %v8029_v1 = vadd.f32 %v5118_v13, %v4657_v57  ;;  %v5120_v49 = vpop.f32.mrb[138].mxu1 }
 0x286   : > { %v5121_v38 = vpop.f32.mrb[139].mxu1 }
 0x287   : > { %v5157_v31 = vpop.f32.mrb[140].mxu0 }
 0x288   : > { %v8031_v9 = vadd.f32 %v5157_v31, %v4658_v60  ;;  %v5159_v27 = vpop.f32.mrb[141].mxu0 }
 0x289   : > { %v8033_v53 = vadd.f32 %v5159_v27, %v4659_v8  ;;  %v5161_v52 = vpop.f32.mrb[142].mxu0 }
 0x28a   : > { %v5162_v20 = vpop.f32.mrb[143].mxu0 }
 0x28b   : > { %v5198_v26 = vpop.f32.mrb[140].mxu1 }
 0x28c   : > { %v8035_v12 = vadd.f32 %v5198_v26, %v4660_v63  ;;  %v5200_v2 = vpop.f32.mrb[141].mxu1 }
 0x28d   : > { %v8037_v62 = vadd.f32 %v5200_v2, %v4661_v18  ;;  %v5202_v42 = vpop.f32.mrb[142].mxu1 }
 0x28e   : > { %v5203_v57 = vpop.f32.mrb[143].mxu1 }
 0x28f   : > { %v5373_v14 = vpop.f32.mrb[144].mxu0 }
 0x290   : > { %v5708_v24 = vadd.f32 %v5373_v14, %v5205_v10  ;;  %v5375_v60 = vpop.f32.mrb[145].mxu0 }
 0x291   : > { %v5709_v0 = vadd.f32 %v5375_v60, %v5206_v48  ;;  %v5377_v40 = vpop.f32.mrb[146].mxu0 }
 0x292   : > { %v5378_v8 = vpop.f32.mrb[147].mxu0  ;;  %v5732_v23 = vadd.f32 %v8039_v50, %v5708_v24 }
 0x293   : > { %v5414_v29 = vpop.f32.mrb[144].mxu1  ;;  %v5733_v63 = vadd.f32 %v8039_v50, %v5709_v0 }
 0x294   : > { %v5710_v28 = vadd.f32 %v5414_v29, %v5207_v54  ;;  %v5416_v18 = vpop.f32.mrb[145].mxu1 }
 0x295   : > { %v5711_v10 = vadd.f32 %v5416_v18, %v5208_v11  ;;  %v5768_v4 = vcombine.low %v5732_v23, %v5733_v63  ;;  %v5418_v48 = vpop.f32.mrb[146].mxu1 }
 0x296   : > { %v5734_v41 = vadd.f32 %v8039_v50, %v5710_v28  ;;  %v5419_v59 = vpop.f32.mrb[147].mxu1 }
 0x297   : > { %v5735_v22 = vadd.f32 %v8039_v50, %v5711_v10  ;;  %5786 = vst [vmem:[%s8048_s8] sm:$0xff] %v5768_v4  ;;  %v5455_v39 = vpop.f32.mrb[148].mxu0 }
 0x298   : > { %v5712_v54 = vadd.f32 %v5455_v39, %v5209_v46  ;;  %v5457_v15 = vpop.f32.mrb[149].mxu0 }
 0x299   : > { %v5769_v3 = vcombine.low %v5734_v41, %v5735_v22  ;;  %v5713_v19 = vadd.f32 %v5457_v15, %v8013_v37  ;;  %v5459_v58 = vpop.f32.mrb[150].mxu0 }
 0x29a   : > { %v5736_v44 = vadd.f32 %v8039_v50, %v5712_v54  ;;  %v5460_v43 = vpop.f32.mrb[151].mxu0 }
 0x29b   : > { %5787 = vst [vmem:[%s8048_s8 + $0x8] sm:$0xff] %v5769_v3  ;;  %v5737_v11 = vadd.f32 %v8039_v50, %v5713_v19  ;;  %v5496_v25 = vpop.f32.mrb[148].mxu1 }
 0x29c   : > { %v5714_v32 = vadd.f32 %v5496_v25, %v8015_v5  ;;  %v5498_v55 = vpop.f32.mrb[149].mxu1 }
 0x29d   : > { %v5770_v61 = vcombine.low %v5736_v44, %v5737_v11  ;;  %v5715_v46 = vadd.f32 %v5498_v55, %v8017_v36  ;;  %v5500_v30 = vpop.f32.mrb[150].mxu1 }
 0x29e   : > { %v5738_v7 = vadd.f32 %v8039_v50, %v5714_v32  ;;  %v5501_v6 = vpop.f32.mrb[151].mxu1 }
 0x29f   : > { %5788 = vst [vmem:[%s8048_s8 + $0x10] sm:$0xff] %v5770_v61  ;;  %v5739_v37 = vadd.f32 %v8039_v50, %v5715_v46  ;;  %v5537_v21 = vpop.f32.mrb[152].mxu0 }
 0x2a0   : > { %v5716_v51 = vadd.f32 %v5537_v21, %v8019_v16  ;;  %v5539_v35 = vpop.f32.mrb[153].mxu0 }
 0x2a1   : > { %v5771_v17 = vcombine.low %v5738_v7, %v5739_v37  ;;  %v5717_v5 = vadd.f32 %v5539_v35, %v8021_v33  ;;  %v5541_v56 = vpop.f32.mrb[154].mxu0 }
 0x2a2   : > { %v5740_v13 = vadd.f32 %v8039_v50, %v5716_v51  ;;  %v5542_v49 = vpop.f32.mrb[155].mxu0 }
 0x2a3   : > { %5789 = vst [vmem:[%s8048_s8 + $0x18] sm:$0xff] %v5771_v17  ;;  %v5741_v36 = vadd.f32 %v8039_v50, %v5717_v5  ;;  %v5578_v38 = vpop.f32.mrb[152].mxu1 }
 0x2a4   : > { %v5718_v31 = vadd.f32 %v5578_v38, %v8023_v34  ;;  %v5580_v27 = vpop.f32.mrb[153].mxu1 }
 0x2a5   : > { %v5772_v52 = vcombine.low %v5740_v13, %v5741_v36  ;;  %v5719_v16 = vadd.f32 %v5580_v27, %v8025_v45  ;;  %v5582_v20 = vpop.f32.mrb[154].mxu1 }
 0x2a6   : > { %v5742_v26 = vadd.f32 %v8039_v50, %v5718_v31  ;;  %v5583_v2 = vpop.f32.mrb[155].mxu1 }
 0x2a7   : > { %5790 = vst [vmem:[%s8048_s8 + $0x20] sm:$0xff] %v5772_v52  ;;  %v5743_v33 = vadd.f32 %v8039_v50, %v5719_v16  ;;  %v5619_v42 = vpop.f32.mrb[156].mxu0 }
 0x2a8   : > { %v5720_v57 = vadd.f32 %v5619_v42, %v8027_v47  ;;  %v5621_v14 = vpop.f32.mrb[157].mxu0 }
 0x2a9   : > { %v5773_v24 = vcombine.low %v5742_v26, %v5743_v33  ;;  %v5721_v34 = vadd.f32 %v5621_v14, %v8029_v1  ;;  %v5623_v60 = vpop.f32.mrb[158].mxu0 }
 0x2aa   : > { %v5744_v0 = vadd.f32 %v8039_v50, %v5720_v57  ;;  %v5624_v40 = vpop.f32.mrb[159].mxu0 }
 0x2ab   : > { %5791 = vst [vmem:[%s8048_s8 + $0x28] sm:$0xff] %v5773_v24  ;;  %v5745_v45 = vadd.f32 %v8039_v50, %v5721_v34  ;;  %v5660_v8 = vpop.f32.mrb[156].mxu1 }
 0x2ac   : > { %v5722_v23 = vadd.f32 %v5660_v8, %v8031_v9  ;;  %v5662_v29 = vpop.f32.mrb[157].mxu1 }
 0x2ad   : > { %v5774_v63 = vcombine.low %v5744_v0, %v5745_v45  ;;  %v5723_v47 = vadd.f32 %v5662_v29, %v8033_v53  ;;  %v5664_v28 = vpop.f32.mrb[158].mxu1 }
 0x2ae   : > { %v5746_v18 = vadd.f32 %v8039_v50, %v5722_v23  ;;  %v5665_v1 = vpop.f32.mrb[159].mxu1 }
 0x2af   : > { %5792 = vst [vmem:[%s8048_s8 + $0x30] sm:$0xff] %v5774_v63  ;;  %v5747_v10 = vadd.f32 %v8039_v50, %v5723_v47  ;;  %v5701_v4 = vpop.f32.mrb[160].mxu0 }
 0x2b0   : > { %v5724_v48 = vadd.f32 %v5701_v4, %v8035_v12  ;;  %v5703_v41 = vpop.f32.mrb[161].mxu0 }
 0x2b1   : > { %v5775_v59 = vcombine.low %v5746_v18, %v5747_v10  ;;  %v5725_v9 = vadd.f32 %v5703_v41, %v8037_v62  ;;  %v5705_v22 = vpop.f32.mrb[162].mxu0 }
 0x2b2   : > { %v5748_v39 = vadd.f32 %v8039_v50, %v5724_v48  ;;  %v5706_v54 = vpop.f32.mrb[163].mxu0 }
 0x2b3   : > { %5793 = vst [vmem:[%s8048_s8 + $0x38] sm:$0xff] %v5775_v59  ;;  %v5749_v53 = vadd.f32 %v8039_v50, %v5725_v9 }
 0x2b5   : > { %v5776_v15 = vcombine.low %v5748_v39, %v5749_v53 }
 0x2b7   : > { %5794 = vst [vmem:[%s8048_s8 + $0x40] sm:$0xff] %v5776_v15 }
 0x2b8 PF: > { %s14_s15 = sadd.s32 1, %s6305_s15  }
 0x2b9   : > { %p11_p4 = scmp.ge.s32.totalorder %s14_s15, 4  }
 0x2bb   :  { %13 = sbr.rel (!%p11_p4) target bundleno = 1 (0x1), region = 74 }

</bundles_post_ra>
